<compile_context>
chip_gen: v7x
topology: tpu7x:2x2x1
jax: 0.10.0
libtpu: 0.0.40
codegen_flags: <defaults>
</compile_context>

<pallas_src>
import functools

import jax
import jax.numpy as jnp
from jax.experimental import pallas as pl
from jax.experimental.pallas import tpu as pltpu

K = 5        # conv kernel size
PAD = 2      # conv padding
HALO = 8     # per-tile halo rows each side (>= 3 convs * PAD, multiple of 8)


def _encoder_kernel(x_ref,                       # (1, Sp + 2*HALO, Ep) bf16 halo-padded embeds
                    w1_ref, s1_ref, t1_ref,      # (K*Ep, Hp) bf16, (1, Hp) f32, (1, Hp) f32
                    w2_ref, s2_ref, t2_ref,      # (K*Hp, Hp) bf16, ...
                    w3_ref, s3_ref, t3_ref,      # (K*Hp, Hp) bf16, ...
                    wfc_ref, bfc_ref,            # (Hp, Hp) bf16, (1, Hp) f32
                    pos_ref,                     # (1, tS, Hp) f32
                    out_ref,                     # (1, tS, Hp)
                    *, seq_len, roll_in_bf16):
    tS = out_ref.shape[1]
    L = tS + 2 * HALO                            # local window rows (multiple of 8)

    s = pl.program_id(1)
    start = pl.multiple_of(s * tS, 8)            # sublane-aligned dynamic window
    win = x_ref[0, pl.ds(start, L), :]           # (L, Ep) bf16

    # Rows of the local window whose *global* position lies inside [0, seq_len).
    # Conv1d zero-padding applies to each layer's input, so intermediate
    # activations must be exactly zero outside the real sequence.
    g = jax.lax.broadcasted_iota(jnp.int32, (L, 1), 0) + (s * tS - HALO)
    keep = jnp.logical_and(g >= 0, g < seq_len)  # (L, 1) bool

    roll_dt = jnp.bfloat16 if roll_in_bf16 else jnp.float32

    def conv_bn_relu(x, w_ref, scale, shift):
        # y[r] = sum_k x[r + k - PAD] @ W[k].  pltpu.roll follows jnp.roll
        # (out[i] = x[(i - shift) mod n]), so tap k is a roll by (PAD - k) mod L.
        # The 5 taps are concatenated along channels so the whole conv is ONE
        # MXU contraction against the (K*Cin, Cout) weight.
        xr = x.astype(roll_dt)                   # single cast per layer
        taps = [xr if (PAD - k) % L == 0 else pltpu.roll(xr, (PAD - k) % L, axis=0)
                for k in range(K)]
        x5 = jnp.concatenate(taps, axis=1).astype(jnp.bfloat16)   # (L, K*Cin)
        acc = jnp.dot(x5, w_ref[...], preferred_element_type=jnp.float32)
        return jnp.maximum(acc * scale + shift, 0.0)              # folded BN + ReLU (f32)

    # Window-edge rows are cyclic-wrap garbage, but HALO=8 > 3*PAD guarantees
    # they never propagate into the tS rows emitted below.
    h = jnp.where(keep, conv_bn_relu(win, w1_ref, s1_ref[...], t1_ref[...]), 0.0)
    h = jnp.where(keep, conv_bn_relu(h, w2_ref, s2_ref[...], t2_ref[...]), 0.0)
    h = conv_bn_relu(h, w3_ref, s3_ref[...], t3_ref[...])          # (L, Hp)

    hc = h[HALO:HALO + tS, :]                                      # aligned static slice
    y = jnp.dot(hc.astype(jnp.bfloat16), wfc_ref[...],
                preferred_element_type=jnp.float32)
    out_ref[0] = (y + bfc_ref[...] + pos_ref[0]).astype(out_ref.dtype)


def encoder_forward(token_ids, params, *, seq_tile=512, out_dtype=jnp.float32):
    """token_ids: (B, S) int32.  Returns (B, S, H) `out_dtype`.

    Pass out_dtype=jnp.bfloat16 to halve output HBM writeback when the
    downstream attention stack accepts bf16.
    """
    B, S = token_ids.shape
    E = params["embed_table"].shape[1]
    H = params["fc_w"].shape[1]
    max_len = params["pos_embed"].shape[1]
    if S > max_len:
        raise ValueError(f"sequence length {S} exceeds positional-embedding max_len {max_len}")

    rup = lambda a, b: (a + b - 1) // b * b
    # Lane-pad channels to multiples of 128: aligned tap concat, unmasked stores,
    # full MXU lane utilization.  Exact: padded BN scale/shift are 0, so padded
    # channels stay 0 through every layer and are sliced off at the end.
    Ep, Hp = rup(E, 128), rup(H, 128)
    tS = rup(min(seq_tile, rup(S, 8)), 8)        # sequence tile (multiple of 8)
    Sp = rup(S, tS)                              # padded sequence length
    n_s = Sp // tS

    f32, bf16 = jnp.float32, jnp.bfloat16

    # --- glue: embedding gather + halo/channel padding (bf16 DMA) + BN folding ---
    te = jnp.take(params["embed_table"], token_ids, axis=0)               # (B, S, E)
    te = jnp.pad(te, ((0, 0), (HALO, HALO + Sp - S), (0, Ep - E))).astype(bf16)

    def bn_fold(bias, gamma, beta, mean, var, eps=1e-5):
        scale = gamma / jnp.sqrt(var + eps)
        shift = beta + (bias - mean) * scale
        return (jnp.pad(scale, (0, Hp - H)).reshape(1, Hp).astype(f32),
                jnp.pad(shift, (0, Hp - H)).reshape(1, Hp).astype(f32))

    s1, t1 = bn_fold(params["b1"], *params["bn1"])
    s2, t2 = bn_fold(params["b2"], *params["bn2"])
    s3, t3 = bn_fold(params["b3"], *params["bn3"])

    def conv_w(w, cin_pad):                                               # (K, Cin, Cout)
        w = jnp.pad(w, ((0, 0), (0, cin_pad - w.shape[1]), (0, Hp - H)))
        return w.reshape(K * cin_pad, Hp).astype(bf16)                    # taps folded into contraction

    w1 = conv_w(params["w1"], Ep)
    w2 = conv_w(params["w2"], Hp)
    w3 = conv_w(params["w3"], Hp)
    wfc = jnp.pad(params["fc_w"], ((0, Hp - H), (0, Hp - H))).astype(bf16)
    bfc = jnp.pad(params["fc_b"], (0, Hp - H)).reshape(1, Hp).astype(f32)

    pos = jnp.pad(params["pos_embed"][:, :S, :].astype(f32),
                  ((0, 0), (0, Sp - S), (0, Hp - H)))                     # (1, Sp, Hp)

    # --- VMEM budget reflecting actual buffering + cost hint ------------------
    const_bytes = 2 * (K * Ep * Hp + 2 * K * Hp * Hp + Hp * Hp) + 4 * 7 * Hp
    x_blk = 2 * (Sp + 2 * HALO) * Ep                                      # bf16 per-batch block
    pos_blk = 4 * tS * Hp
    out_blk = jnp.dtype(out_dtype).itemsize * tS * Hp
    L = tS + 2 * HALO
    work_bytes = 2 * L * K * max(Ep, Hp) + 3 * 4 * L * Hp                 # X5 + live f32 intermediates
    try:
        phys_vmem = int(pltpu.get_tpu_info().vmem_capacity_bytes)
    except Exception:                                                     # query unavailable
        phys_vmem = 64 << 20                                              # conservative (v7x-sized)
    vmem_cap = (phys_vmem * 3) // 4       # ~96 MiB on 128 MiB parts, ~48 MiB on v7x

    flops = int(2 * B * Sp * (K * Ep * Hp + 2 * K * Hp * Hp + Hp * Hp))
    bytes_accessed = int(te.size * 2 + B * pos.size * 4
                         + B * Sp * Hp * jnp.dtype(out_dtype).itemsize + const_bytes)

    def run(roll_in_bf16, single_buffer_consts):
        if single_buffer_consts:
            # Constant-index blocks: single-buffered -> no redundant VMEM copy.
            cspec = lambda *shape: pl.BlockSpec(
                shape, lambda b, s: (0,) * len(shape), pipeline_mode=pl.Buffered(1))
        else:
            cspec = lambda *shape: pl.BlockSpec(shape, lambda b, s: (0,) * len(shape))

        in_specs = [
            # Per-batch resident halo-padded bf16 embeddings (block index constant
            # across the seq axis => DMA'd once per batch); kernel slices aligned windows.
            pl.BlockSpec((1, Sp + 2 * HALO, Ep), lambda b, s: (b, 0, 0)),
            cspec(K * Ep, Hp), cspec(1, Hp), cspec(1, Hp),                # conv1
            cspec(K * Hp, Hp), cspec(1, Hp), cspec(1, Hp),                # conv2
            cspec(K * Hp, Hp), cspec(1, Hp), cspec(1, Hp),                # conv3
            cspec(Hp, Hp), cspec(1, Hp),                                  # fc
            pl.BlockSpec((1, tS, Hp), lambda b, s: (0, s, 0)),            # positional
        ]
        out_specs = pl.BlockSpec((1, tS, Hp), lambda b, s: (b, s, 0))

        w_mult = 1 if single_buffer_consts else 2
        vmem_limit = int(min(max(w_mult * const_bytes + 2 * (x_blk + pos_blk + out_blk)
                                 + work_bytes + (4 << 20), 16 << 20), vmem_cap))

        # Shard the grid across TensorCores on the batch axis (v7x dual-TC /
        # megacore) so the per-batch embedding block is DMA'd and resident on
        # exactly one core; let the seq axis parallelize only when B == 1.
        dims = ("parallel", "parallel" if B == 1 else "arbitrary")

        return pl.pallas_call(
            functools.partial(_encoder_kernel, seq_len=S, roll_in_bf16=roll_in_bf16),
            out_shape=jax.ShapeDtypeStruct((B, Sp, Hp), out_dtype),
            grid=(B, n_s),
            in_specs=in_specs,
            out_specs=out_specs,
            compiler_params=pltpu.CompilerParams(
                dimension_semantics=dims, vmem_limit_bytes=vmem_limit),
            cost_estimate=pl.CostEstimate(flops=flops, transcendentals=0,
                                          bytes_accessed=bytes_accessed),
        )(te, w1, s1, t1, w2, s2, t2, w3, s3, t3, wfc, bfc, pos)

    # Preferred config first; fall back gracefully if this jax/libtpu build lacks
    # pl.Buffered(1) single-buffering or packed-bf16 sublane rolls.
    last_err = None
    out = None
    for cfg in ((True, True), (True, False), (False, True), (False, False)):
        try:
            out = run(*cfg)
            break
        except Exception as err:   # noqa: BLE001 - retry with a safer configuration
            last_err = err
    if out is None:
        raise last_err

    # Rows in [S, Sp) / channels in [H, Hp) of the raw pallas output are padding;
    # never consume the padded region directly.
    return out[:, :S, :H]


def make_params(key, vocab_size, embed_dims, hidden_dims, max_len):
    ks = jax.random.split(key, 16)
    f = jax.random.normal

    def bn(k):
        k1, k2, k3, k4 = jax.random.split(k, 4)
        gamma = 1.0 + 0.1 * f(k1, (hidden_dims,), jnp.float32)
        beta = 0.1 * f(k2, (hidden_dims,), jnp.float32)
        mean = 0.1 * f(k3, (hidden_dims,), jnp.float32)
        var = 1.0 + 0.1 * jnp.abs(f(k4, (hidden_dims,), jnp.float32))
        return (gamma, beta, mean, var)

    return {
        "embed_table": 0.1 * f(ks[0], (vocab_size, embed_dims), jnp.float32),
        "pos_embed":   0.02 * f(ks[1], (1, max_len, hidden_dims), jnp.float32),
        # conv weights stored as (K, Cin, Cout)  (== torch (Cout, Cin, K) permuted)
        "w1": 0.1 * f(ks[2], (K, embed_dims, hidden_dims), jnp.float32),
        "b1": 0.05 * f(ks[3], (hidden_dims,), jnp.float32),
        "w2": 0.1 * f(ks[4], (K, hidden_dims, hidden_dims), jnp.float32),
        "b2": 0.05 * f(ks[5], (hidden_dims,), jnp.float32),
        "w3": 0.1 * f(ks[6], (K, hidden_dims, hidden_dims), jnp.float32),
        "b3": 0.05 * f(ks[7], (hidden_dims,), jnp.float32),
        "bn1": bn(ks[8]), "bn2": bn(ks[9]), "bn3": bn(ks[10]),
        # fc stored as (H_in, H_out)
        "fc_w": 0.1 * f(ks[11], (hidden_dims, hidden_dims), jnp.float32),
        "fc_b": 0.05 * f(ks[12], (hidden_dims,), jnp.float32),
    }


def encoder_reference(token_ids, params):
    """Pure-JAX f32 reference for correctness checking (eval-mode semantics)."""
    B, S = token_ids.shape
    x = jnp.take(params["embed_table"], token_ids, axis=0)             # (B, S, E)

    def conv_bn_relu(x, w, b, bn, eps=1e-5):
        gamma, beta, mean, var = bn
        xp = jnp.pad(x, ((0, 0), (PAD, PAD), (0, 0)))
        y = sum(jnp.einsum("bsc,cd->bsd", xp[:, k:k + S, :], w[k]) for k in range(K))
        y = y + b
        y = (y - mean) / jnp.sqrt(var + eps) * gamma + beta
        return jnp.maximum(y, 0.0)

    x = conv_bn_relu(x, params["w1"], params["b1"], params["bn1"])
    x = conv_bn_relu(x, params["w2"], params["b2"], params["bn2"])
    x = conv_bn_relu(x, params["w3"], params["b3"], params["bn3"])
    x = jnp.einsum("bsh,hd->bsd", x, params["fc_w"]) + params["fc_b"]
    x = x + params["pos_embed"][:, :S, :]
    return x


if __name__ == "__main__":
    vocab_size, embed_dims, hidden_dims, max_len = 50, 16, 32, 16
    B, S = 2, 8

    key = jax.random.PRNGKey(0)
    kp, kx = jax.random.split(key)
    params = make_params(kp, vocab_size, embed_dims, hidden_dims, max_len)
    token_ids = jax.random.randint(kx, (B, S), 0, vocab_size, dtype=jnp.int32)

    out = encoder_forward(token_ids, params)
    out = jax.block_until_ready(out)

    ref = encoder_reference(token_ids, params)
    assert out.shape == (B, S, hidden_dims)
    # bf16 MXU operands / bf16 embedding DMA => looser tolerance than pure f32.
    assert jnp.allclose(out, ref, atol=3e-2, rtol=3e-2), "mismatch vs reference"

    print("KERNEL_OK")
</pallas_src>

<mosaic_0001>
module attributes {stable_mosaic.version = 11 : i64} {
  func.func @_encoder_kernel(%arg0: i32, %arg1: i32, %arg2: memref<1x24x128xbf16, #tpu.memory_space<vmem>>, %arg3: memref<640x128xbf16, #tpu.memory_space<vmem>>, %arg4: memref<1x128xf32, #tpu.memory_space<vmem>>, %arg5: memref<1x128xf32, #tpu.memory_space<vmem>>, %arg6: memref<640x128xbf16, #tpu.memory_space<vmem>>, %arg7: memref<1x128xf32, #tpu.memory_space<vmem>>, %arg8: memref<1x128xf32, #tpu.memory_space<vmem>>, %arg9: memref<640x128xbf16, #tpu.memory_space<vmem>>, %arg10: memref<1x128xf32, #tpu.memory_space<vmem>>, %arg11: memref<1x128xf32, #tpu.memory_space<vmem>>, %arg12: memref<128x128xbf16, #tpu.memory_space<vmem>>, %arg13: memref<1x128xf32, #tpu.memory_space<vmem>>, %arg14: memref<1x8x128xf32, #tpu.memory_space<vmem>>, %arg15: memref<1x8x128xf32, #tpu.memory_space<vmem>>) attributes {dimension_semantics = [#tpu.dimension_semantics<parallel>, #tpu.dimension_semantics<arbitrary>], iteration_bounds = array<i64: 2, 1>, scalar_prefetch = 0 : i64, scratch_operands = 0 : i64, tpu.core_type = #tpu.core_type<tc>, window_params = [{transform_indices = @transform_0, window_bounds = array<i64: 1, 24, 128>}, {pipeline_mode = #tpu.pipeline_mode<synchronous>, transform_indices = @transform_1, window_bounds = array<i64: 640, 128>}, {pipeline_mode = #tpu.pipeline_mode<synchronous>, transform_indices = @transform_2, window_bounds = array<i64: 1, 128>}, {pipeline_mode = #tpu.pipeline_mode<synchronous>, transform_indices = @transform_3, window_bounds = array<i64: 1, 128>}, {pipeline_mode = #tpu.pipeline_mode<synchronous>, transform_indices = @transform_4, window_bounds = array<i64: 640, 128>}, {pipeline_mode = #tpu.pipeline_mode<synchronous>, transform_indices = @transform_5, window_bounds = array<i64: 1, 128>}, {pipeline_mode = #tpu.pipeline_mode<synchronous>, transform_indices = @transform_6, window_bounds = array<i64: 1, 128>}, {pipeline_mode = #tpu.pipeline_mode<synchronous>, transform_indices = @transform_7, window_bounds = array<i64: 640, 128>}, {pipeline_mode = #tpu.pipeline_mode<synchronous>, transform_indices = @transform_8, window_bounds = array<i64: 1, 128>}, {pipeline_mode = #tpu.pipeline_mode<synchronous>, transform_indices = @transform_9, window_bounds = array<i64: 1, 128>}, {pipeline_mode = #tpu.pipeline_mode<synchronous>, transform_indices = @transform_10, window_bounds = array<i64: 128, 128>}, {pipeline_mode = #tpu.pipeline_mode<synchronous>, transform_indices = @transform_11, window_bounds = array<i64: 1, 128>}, {transform_indices = @transform_12, window_bounds = array<i64: 1, 8, 128>}, {transform_indices = @transform_13, window_bounds = array<i64: 1, 8, 128>}]} {
    %c8_i32 = arith.constant 8 : i32
    %0 = arith.muli %arg1, %c8_i32 : i32
    %1 = tpu.assume_multiple %0, 8 : i32
    %c0 = arith.constant 0 : index
    %2 = arith.index_cast %1 : i32 to index
    %c0_0 = arith.constant 0 : index
    %3 = vector.load %arg2[%c0, %2, %c0_0] : memref<1x24x128xbf16, #tpu.memory_space<vmem>>, vector<1x24x128xbf16>
    %4 = vector.shape_cast %3 : vector<1x24x128xbf16> to vector<24x128xbf16>
    %5 = tpu.iota {dimensions = array<i32: 0>} : vector<24x1xi32>
    %c8_i32_1 = arith.constant 8 : i32
    %6 = arith.muli %arg1, %c8_i32_1 : i32
    %c8_i32_2 = arith.constant 8 : i32
    %7 = arith.subi %6, %c8_i32_2 : i32
    %8 = vector.broadcast %7 : i32 to vector<24x1xi32>
    %9 = arith.addi %5, %8 : vector<24x1xi32>
    %c0_i32 = arith.constant 0 : i32
    %10 = vector.broadcast %c0_i32 : i32 to vector<24x1xi32>
    %11 = arith.cmpi sge, %9, %10 : vector<24x1xi32>
    %c8_i32_3 = arith.constant 8 : i32
    %12 = vector.broadcast %c8_i32_3 : i32 to vector<24x1xi32>
    %13 = arith.cmpi slt, %9, %12 : vector<24x1xi32>
    %14 = arith.andi %11, %13 : vector<24x1xi1>
    %c0_4 = arith.constant 0 : index
    %c0_5 = arith.constant 0 : index
    %15 = vector.load %arg4[%c0_4, %c0_5] : memref<1x128xf32, #tpu.memory_space<vmem>>, vector<1x128xf32>
    %c0_6 = arith.constant 0 : index
    %c0_7 = arith.constant 0 : index
    %16 = vector.load %arg5[%c0_6, %c0_7] : memref<1x128xf32, #tpu.memory_space<vmem>>, vector<1x128xf32>
    %c2_i32 = arith.constant 2 : i32
    %17 = tpu.dynamic_rotate %4 by %c2_i32 dim 0 : vector<24x128xbf16>, i32 -> vector<24x128xbf16>
    %c1_i32 = arith.constant 1 : i32
    %18 = tpu.dynamic_rotate %4 by %c1_i32 dim 0 : vector<24x128xbf16>, i32 -> vector<24x128xbf16>
    %c23_i32 = arith.constant 23 : i32
    %19 = tpu.dynamic_rotate %4 by %c23_i32 dim 0 : vector<24x128xbf16>, i32 -> vector<24x128xbf16>
    %c22_i32 = arith.constant 22 : i32
    %20 = tpu.dynamic_rotate %4 by %c22_i32 dim 0 : vector<24x128xbf16>, i32 -> vector<24x128xbf16>
    %21 = tpu.concatenate %17, %18, %4, %19, %20 in 1 : vector<24x128xbf16>, vector<24x128xbf16>, vector<24x128xbf16>, vector<24x128xbf16>, vector<24x128xbf16> -> vector<24x640xbf16>
    %c0_8 = arith.constant 0 : index
    %c0_9 = arith.constant 0 : index
    %22 = vector.load %arg3[%c0_8, %c0_9] : memref<640x128xbf16, #tpu.memory_space<vmem>>, vector<640x128xbf16>
    %cst = arith.constant dense<0.000000e+00> : vector<24x128xf32>
    %23 = tpu.matmul %21, %22, %cst {dimension_numbers = #tpu.dot_dimension_numbers<[1], [0], [0], [1], [0, 0, 1, 1], [], []>} : vector<24x640xbf16>, vector<640x128xbf16>, vector<24x128xf32> -> vector<24x128xf32>
    %24 = vector.broadcast %15 : vector<1x128xf32> to vector<24x128xf32>
    %25 = arith.mulf %23, %24 : vector<24x128xf32>
    %26 = vector.broadcast %16 : vector<1x128xf32> to vector<24x128xf32>
    %27 = arith.addf %25, %26 : vector<24x128xf32>
    %cst_10 = arith.constant 0.000000e+00 : f32
    %28 = vector.broadcast %cst_10 : f32 to vector<24x128xf32>
    %29 = arith.maximumf %27, %28 : vector<24x128xf32>
    %cst_11 = arith.constant 0.000000e+00 : f32
    %30 = vector.shape_cast %14 : vector<24x1xi1> to vector<24x1xi1>
    %31 = vector.broadcast %30 : vector<24x1xi1> to vector<24x128xi1>
    %32 = vector.broadcast %cst_11 : f32 to vector<24x128xf32>
    %33 = arith.select %31, %29, %32 : vector<24x128xi1>, vector<24x128xf32>
    %c0_12 = arith.constant 0 : index
    %c0_13 = arith.constant 0 : index
    %34 = vector.load %arg7[%c0_12, %c0_13] : memref<1x128xf32, #tpu.memory_space<vmem>>, vector<1x128xf32>
    %c0_14 = arith.constant 0 : index
    %c0_15 = arith.constant 0 : index
    %35 = vector.load %arg8[%c0_14, %c0_15] : memref<1x128xf32, #tpu.memory_space<vmem>>, vector<1x128xf32>
    %36 = arith.truncf %33 : vector<24x128xf32> to vector<24x128xbf16>
    %c2_i32_16 = arith.constant 2 : i32
    %37 = tpu.dynamic_rotate %36 by %c2_i32_16 dim 0 : vector<24x128xbf16>, i32 -> vector<24x128xbf16>
    %c1_i32_17 = arith.constant 1 : i32
    %38 = tpu.dynamic_rotate %36 by %c1_i32_17 dim 0 : vector<24x128xbf16>, i32 -> vector<24x128xbf16>
    %c23_i32_18 = arith.constant 23 : i32
    %39 = tpu.dynamic_rotate %36 by %c23_i32_18 dim 0 : vector<24x128xbf16>, i32 -> vector<24x128xbf16>
    %c22_i32_19 = arith.constant 22 : i32
    %40 = tpu.dynamic_rotate %36 by %c22_i32_19 dim 0 : vector<24x128xbf16>, i32 -> vector<24x128xbf16>
    %41 = tpu.concatenate %37, %38, %36, %39, %40 in 1 : vector<24x128xbf16>, vector<24x128xbf16>, vector<24x128xbf16>, vector<24x128xbf16>, vector<24x128xbf16> -> vector<24x640xbf16>
    %c0_20 = arith.constant 0 : index
    %c0_21 = arith.constant 0 : index
    %42 = vector.load %arg6[%c0_20, %c0_21] : memref<640x128xbf16, #tpu.memory_space<vmem>>, vector<640x128xbf16>
    %cst_22 = arith.constant dense<0.000000e+00> : vector<24x128xf32>
    %43 = tpu.matmul %41, %42, %cst_22 {dimension_numbers = #tpu.dot_dimension_numbers<[1], [0], [0], [1], [0, 0, 1, 1], [], []>} : vector<24x640xbf16>, vector<640x128xbf16>, vector<24x128xf32> -> vector<24x128xf32>
    %44 = vector.broadcast %34 : vector<1x128xf32> to vector<24x128xf32>
    %45 = arith.mulf %43, %44 : vector<24x128xf32>
    %46 = vector.broadcast %35 : vector<1x128xf32> to vector<24x128xf32>
    %47 = arith.addf %45, %46 : vector<24x128xf32>
    %cst_23 = arith.constant 0.000000e+00 : f32
    %48 = vector.broadcast %cst_23 : f32 to vector<24x128xf32>
    %49 = arith.maximumf %47, %48 : vector<24x128xf32>
    %cst_24 = arith.constant 0.000000e+00 : f32
    %50 = vector.shape_cast %14 : vector<24x1xi1> to vector<24x1xi1>
    %51 = vector.broadcast %50 : vector<24x1xi1> to vector<24x128xi1>
    %52 = vector.broadcast %cst_24 : f32 to vector<24x128xf32>
    %53 = arith.select %51, %49, %52 : vector<24x128xi1>, vector<24x128xf32>
    %c0_25 = arith.constant 0 : index
    %c0_26 = arith.constant 0 : index
    %54 = vector.load %arg10[%c0_25, %c0_26] : memref<1x128xf32, #tpu.memory_space<vmem>>, vector<1x128xf32>
    %c0_27 = arith.constant 0 : index
    %c0_28 = arith.constant 0 : index
    %55 = vector.load %arg11[%c0_27, %c0_28] : memref<1x128xf32, #tpu.memory_space<vmem>>, vector<1x128xf32>
    %56 = arith.truncf %53 : vector<24x128xf32> to vector<24x128xbf16>
    %c2_i32_29 = arith.constant 2 : i32
    %57 = tpu.dynamic_rotate %56 by %c2_i32_29 dim 0 : vector<24x128xbf16>, i32 -> vector<24x128xbf16>
    %c1_i32_30 = arith.constant 1 : i32
    %58 = tpu.dynamic_rotate %56 by %c1_i32_30 dim 0 : vector<24x128xbf16>, i32 -> vector<24x128xbf16>
    %c23_i32_31 = arith.constant 23 : i32
    %59 = tpu.dynamic_rotate %56 by %c23_i32_31 dim 0 : vector<24x128xbf16>, i32 -> vector<24x128xbf16>
    %c22_i32_32 = arith.constant 22 : i32
    %60 = tpu.dynamic_rotate %56 by %c22_i32_32 dim 0 : vector<24x128xbf16>, i32 -> vector<24x128xbf16>
    %61 = tpu.concatenate %57, %58, %56, %59, %60 in 1 : vector<24x128xbf16>, vector<24x128xbf16>, vector<24x128xbf16>, vector<24x128xbf16>, vector<24x128xbf16> -> vector<24x640xbf16>
    %c0_33 = arith.constant 0 : index
    %c0_34 = arith.constant 0 : index
    %62 = vector.load %arg9[%c0_33, %c0_34] : memref<640x128xbf16, #tpu.memory_space<vmem>>, vector<640x128xbf16>
    %cst_35 = arith.constant dense<0.000000e+00> : vector<24x128xf32>
    %63 = tpu.matmul %61, %62, %cst_35 {dimension_numbers = #tpu.dot_dimension_numbers<[1], [0], [0], [1], [0, 0, 1, 1], [], []>} : vector<24x640xbf16>, vector<640x128xbf16>, vector<24x128xf32> -> vector<24x128xf32>
    %64 = vector.broadcast %54 : vector<1x128xf32> to vector<24x128xf32>
    %65 = arith.mulf %63, %64 : vector<24x128xf32>
    %66 = vector.broadcast %55 : vector<1x128xf32> to vector<24x128xf32>
    %67 = arith.addf %65, %66 : vector<24x128xf32>
    %cst_36 = arith.constant 0.000000e+00 : f32
    %68 = vector.broadcast %cst_36 : f32 to vector<24x128xf32>
    %69 = arith.maximumf %67, %68 : vector<24x128xf32>
    %70 = vector.extract_strided_slice %69 {offsets = [8, 0], sizes = [8, 128], strides = [1, 1]} : vector<24x128xf32> to vector<8x128xf32>
    %71 = arith.truncf %70 : vector<8x128xf32> to vector<8x128xbf16>
    %c0_37 = arith.constant 0 : index
    %c0_38 = arith.constant 0 : index
    %72 = vector.load %arg12[%c0_37, %c0_38] : memref<128x128xbf16, #tpu.memory_space<vmem>>, vector<128x128xbf16>
    %cst_39 = arith.constant dense<0.000000e+00> : vector<8x128xf32>
    %73 = tpu.matmul %71, %72, %cst_39 {dimension_numbers = #tpu.dot_dimension_numbers<[1], [0], [0], [1], [0, 0, 1, 1], [], []>} : vector<8x128xbf16>, vector<128x128xbf16>, vector<8x128xf32> -> vector<8x128xf32>
    %c0_40 = arith.constant 0 : index
    %c0_41 = arith.constant 0 : index
    %74 = vector.load %arg13[%c0_40, %c0_41] : memref<1x128xf32, #tpu.memory_space<vmem>>, vector<1x128xf32>
    %75 = vector.broadcast %74 : vector<1x128xf32> to vector<8x128xf32>
    %76 = arith.addf %73, %75 : vector<8x128xf32>
    %c0_42 = arith.constant 0 : index
    %c0_43 = arith.constant 0 : index
    %c0_44 = arith.constant 0 : index
    %77 = vector.load %arg14[%c0_42, %c0_43, %c0_44] : memref<1x8x128xf32, #tpu.memory_space<vmem>>, vector<1x8x128xf32>
    %78 = vector.shape_cast %77 : vector<1x8x128xf32> to vector<8x128xf32>
    %79 = arith.addf %76, %78 : vector<8x128xf32>
    %c0_45 = arith.constant 0 : index
    %c0_46 = arith.constant 0 : index
    %c0_47 = arith.constant 0 : index
    %80 = vector.load %arg15[%c0_45, %c0_46, %c0_47] : memref<1x8x128xf32, #tpu.memory_space<vmem>>, vector<1x8x128xf32>
    %81 = vector.shape_cast %80 : vector<1x8x128xf32> to vector<8x128xf32>
    %82 = vector.shape_cast %79 : vector<8x128xf32> to vector<1x8x128xf32>
    tpu.vector_store %arg15[%c0_45, %c0_46, %c0_47], %82 {strides = array<i32>} : memref<1x8x128xf32, #tpu.memory_space<vmem>>, vector<1x8x128xf32>,
    return
  }
  func.func @transform_0(%arg0: i32, %arg1: i32) -> (i32, i32, i32) {
    %c0_i32 = arith.constant 0 : i32
    %c0_i32_0 = arith.constant 0 : i32
    %c0_i32_1 = arith.constant 0 : i32
    return %arg0, %c0_i32, %c0_i32_0 : i32, i32, i32
  }
  func.func @transform_1(%arg0: i32, %arg1: i32) -> (i32, i32) {
    %c0_i32 = arith.constant 0 : i32
    %c0_i32_0 = arith.constant 0 : i32
    %c0_i32_1 = arith.constant 0 : i32
    return %c0_i32, %c0_i32_0 : i32, i32
  }
  func.func @transform_2(%arg0: i32, %arg1: i32) -> (i32, i32) {
    %c0_i32 = arith.constant 0 : i32
    %c0_i32_0 = arith.constant 0 : i32
    %c0_i32_1 = arith.constant 0 : i32
    return %c0_i32, %c0_i32_0 : i32, i32
  }
  func.func @transform_3(%arg0: i32, %arg1: i32) -> (i32, i32) {
    %c0_i32 = arith.constant 0 : i32
    %c0_i32_0 = arith.constant 0 : i32
    %c0_i32_1 = arith.constant 0 : i32
    return %c0_i32, %c0_i32_0 : i32, i32
  }
  func.func @transform_4(%arg0: i32, %arg1: i32) -> (i32, i32) {
    %c0_i32 = arith.constant 0 : i32
    %c0_i32_0 = arith.constant 0 : i32
    %c0_i32_1 = arith.constant 0 : i32
    return %c0_i32, %c0_i32_0 : i32, i32
  }
  func.func @transform_5(%arg0: i32, %arg1: i32) -> (i32, i32) {
    %c0_i32 = arith.constant 0 : i32
    %c0_i32_0 = arith.constant 0 : i32
    %c0_i32_1 = arith.constant 0 : i32
    return %c0_i32, %c0_i32_0 : i32, i32
  }
  func.func @transform_6(%arg0: i32, %arg1: i32) -> (i32, i32) {
    %c0_i32 = arith.constant 0 : i32
    %c0_i32_0 = arith.constant 0 : i32
    %c0_i32_1 = arith.constant 0 : i32
    return %c0_i32, %c0_i32_0 : i32, i32
  }
  func.func @transform_7(%arg0: i32, %arg1: i32) -> (i32, i32) {
    %c0_i32 = arith.constant 0 : i32
    %c0_i32_0 = arith.constant 0 : i32
    %c0_i32_1 = arith.constant 0 : i32
    return %c0_i32, %c0_i32_0 : i32, i32
  }
  func.func @transform_8(%arg0: i32, %arg1: i32) -> (i32, i32) {
    %c0_i32 = arith.constant 0 : i32
    %c0_i32_0 = arith.constant 0 : i32
    %c0_i32_1 = arith.constant 0 : i32
    return %c0_i32, %c0_i32_0 : i32, i32
  }
  func.func @transform_9(%arg0: i32, %arg1: i32) -> (i32, i32) {
    %c0_i32 = arith.constant 0 : i32
    %c0_i32_0 = arith.constant 0 : i32
    %c0_i32_1 = arith.constant 0 : i32
    return %c0_i32, %c0_i32_0 : i32, i32
  }
  func.func @transform_10(%arg0: i32, %arg1: i32) -> (i32, i32) {
    %c0_i32 = arith.constant 0 : i32
    %c0_i32_0 = arith.constant 0 : i32
    %c0_i32_1 = arith.constant 0 : i32
    return %c0_i32, %c0_i32_0 : i32, i32
  }
  func.func @transform_11(%arg0: i32, %arg1: i32) -> (i32, i32) {
    %c0_i32 = arith.constant 0 : i32
    %c0_i32_0 = arith.constant 0 : i32
    %c0_i32_1 = arith.constant 0 : i32
    return %c0_i32, %c0_i32_0 : i32, i32
  }
  func.func @transform_12(%arg0: i32, %arg1: i32) -> (i32, i32, i32) {
    %c0_i32 = arith.constant 0 : i32
    %c0_i32_0 = arith.constant 0 : i32
    %c0_i32_1 = arith.constant 0 : i32
    return %c0_i32, %arg1, %c0_i32_0 : i32, i32, i32
  }
  func.func @transform_13(%arg0: i32, %arg1: i32) -> (i32, i32, i32) {
    %c0_i32 = arith.constant 0 : i32
    %c0_i32_0 = arith.constant 0 : i32
    return %arg0, %arg1, %c0_i32 : i32, i32, i32
  }
}

module attributes {stable_mosaic.version = 11 : i64} {
  func.func @_encoder_kernel(%arg0: i32, %arg1: i32, %arg2: memref<1x24x128xbf16, #tpu.memory_space<vmem>>, %arg3: memref<640x128xbf16, #tpu.memory_space<vmem>>, %arg4: memref<1x128xf32, #tpu.memory_space<vmem>>, %arg5: memref<1x128xf32, #tpu.memory_space<vmem>>, %arg6: memref<640x128xbf16, #tpu.memory_space<vmem>>, %arg7: memref<1x128xf32, #tpu.memory_space<vmem>>, %arg8: memref<1x128xf32, #tpu.memory_space<vmem>>, %arg9: memref<640x128xbf16, #tpu.memory_space<vmem>>, %arg10: memref<1x128xf32, #tpu.memory_space<vmem>>, %arg11: memref<1x128xf32, #tpu.memory_space<vmem>>, %arg12: memref<128x128xbf16, #tpu.memory_space<vmem>>, %arg13: memref<1x128xf32, #tpu.memory_space<vmem>>, %arg14: memref<1x8x128xf32, #tpu.memory_space<vmem>>, %arg15: memref<1x8x128xf32, #tpu.memory_space<vmem>>) attributes {dimension_semantics = [#tpu.dimension_semantics<parallel>, #tpu.dimension_semantics<arbitrary>], iteration_bounds = array<i64: 2, 1>, scalar_prefetch = 0 : i64, scratch_operands = 0 : i64, tpu.core_type = #tpu.core_type<tc>, window_params = [{transform_indices = @transform_0, window_bounds = array<i64: 1, 24, 128>}, {pipeline_mode = #tpu.pipeline_mode<synchronous>, transform_indices = @transform_1, window_bounds = array<i64: 640, 128>}, {pipeline_mode = #tpu.pipeline_mode<synchronous>, transform_indices = @transform_2, window_bounds = array<i64: 1, 128>}, {pipeline_mode = #tpu.pipeline_mode<synchronous>, transform_indices = @transform_3, window_bounds = array<i64: 1, 128>}, {pipeline_mode = #tpu.pipeline_mode<synchronous>, transform_indices = @transform_4, window_bounds = array<i64: 640, 128>}, {pipeline_mode = #tpu.pipeline_mode<synchronous>, transform_indices = @transform_5, window_bounds = array<i64: 1, 128>}, {pipeline_mode = #tpu.pipeline_mode<synchronous>, transform_indices = @transform_6, window_bounds = array<i64: 1, 128>}, {pipeline_mode = #tpu.pipeline_mode<synchronous>, transform_indices = @transform_7, window_bounds = array<i64: 640, 128>}, {pipeline_mode = #tpu.pipeline_mode<synchronous>, transform_indices = @transform_8, window_bounds = array<i64: 1, 128>}, {pipeline_mode = #tpu.pipeline_mode<synchronous>, transform_indices = @transform_9, window_bounds = array<i64: 1, 128>}, {pipeline_mode = #tpu.pipeline_mode<synchronous>, transform_indices = @transform_10, window_bounds = array<i64: 128, 128>}, {pipeline_mode = #tpu.pipeline_mode<synchronous>, transform_indices = @transform_11, window_bounds = array<i64: 1, 128>}, {transform_indices = @transform_12, window_bounds = array<i64: 1, 8, 128>}, {transform_indices = @transform_13, window_bounds = array<i64: 1, 8, 128>}]} {
    %c8_i32 = arith.constant 8 : i32
    %0 = arith.muli %arg1, %c8_i32 : i32
    %1 = tpu.assume_multiple %0, 8 : i32
    %c0 = arith.constant 0 : index
    %2 = arith.index_cast %1 : i32 to index
    %c0_0 = arith.constant 0 : index
    %3 = vector.load %arg2[%c0, %2, %c0_0] : memref<1x24x128xbf16, #tpu.memory_space<vmem>>, vector<1x24x128xbf16>
    %4 = vector.shape_cast %3 : vector<1x24x128xbf16> to vector<24x128xbf16>
    %5 = tpu.iota {dimensions = array<i32: 0>} : vector<24x1xi32>
    %c8_i32_1 = arith.constant 8 : i32
    %6 = arith.muli %arg1, %c8_i32_1 : i32
    %c8_i32_2 = arith.constant 8 : i32
    %7 = arith.subi %6, %c8_i32_2 : i32
    %8 = vector.broadcast %7 : i32 to vector<24x1xi32>
    %9 = arith.addi %5, %8 : vector<24x1xi32>
    %c0_i32 = arith.constant 0 : i32
    %10 = vector.broadcast %c0_i32 : i32 to vector<24x1xi32>
    %11 = arith.cmpi sge, %9, %10 : vector<24x1xi32>
    %c8_i32_3 = arith.constant 8 : i32
    %12 = vector.broadcast %c8_i32_3 : i32 to vector<24x1xi32>
    %13 = arith.cmpi slt, %9, %12 : vector<24x1xi32>
    %14 = arith.andi %11, %13 : vector<24x1xi1>
    %c0_4 = arith.constant 0 : index
    %c0_5 = arith.constant 0 : index
    %15 = vector.load %arg4[%c0_4, %c0_5] : memref<1x128xf32, #tpu.memory_space<vmem>>, vector<1x128xf32>
    %c0_6 = arith.constant 0 : index
    %c0_7 = arith.constant 0 : index
    %16 = vector.load %arg5[%c0_6, %c0_7] : memref<1x128xf32, #tpu.memory_space<vmem>>, vector<1x128xf32>
    %c2_i32 = arith.constant 2 : i32
    %17 = tpu.dynamic_rotate %4 by %c2_i32 dim 0 : vector<24x128xbf16>, i32 -> vector<24x128xbf16>
    %c1_i32 = arith.constant 1 : i32
    %18 = tpu.dynamic_rotate %4 by %c1_i32 dim 0 : vector<24x128xbf16>, i32 -> vector<24x128xbf16>
    %c23_i32 = arith.constant 23 : i32
    %19 = tpu.dynamic_rotate %4 by %c23_i32 dim 0 : vector<24x128xbf16>, i32 -> vector<24x128xbf16>
    %c22_i32 = arith.constant 22 : i32
    %20 = tpu.dynamic_rotate %4 by %c22_i32 dim 0 : vector<24x128xbf16>, i32 -> vector<24x128xbf16>
    %21 = tpu.concatenate %17, %18, %4, %19, %20 in 1 : vector<24x128xbf16>, vector<24x128xbf16>, vector<24x128xbf16>, vector<24x128xbf16>, vector<24x128xbf16> -> vector<24x640xbf16>
    %c0_8 = arith.constant 0 : index
    %c0_9 = arith.constant 0 : index
    %22 = vector.load %arg3[%c0_8, %c0_9] : memref<640x128xbf16, #tpu.memory_space<vmem>>, vector<640x128xbf16>
    %cst = arith.constant dense<0.000000e+00> : vector<24x128xf32>
    %23 = tpu.matmul %21, %22, %cst {dimension_numbers = #tpu.dot_dimension_numbers<[1], [0], [0], [1], [0, 0, 1, 1], [], []>} : vector<24x640xbf16>, vector<640x128xbf16>, vector<24x128xf32> -> vector<24x128xf32>
    %24 = vector.broadcast %15 : vector<1x128xf32> to vector<24x128xf32>
    %25 = arith.mulf %23, %24 : vector<24x128xf32>
    %26 = vector.broadcast %16 : vector<1x128xf32> to vector<24x128xf32>
    %27 = arith.addf %25, %26 : vector<24x128xf32>
    %cst_10 = arith.constant 0.000000e+00 : f32
    %28 = vector.broadcast %cst_10 : f32 to vector<24x128xf32>
    %29 = arith.maximumf %27, %28 : vector<24x128xf32>
    %cst_11 = arith.constant 0.000000e+00 : f32
    %30 = vector.shape_cast %14 : vector<24x1xi1> to vector<24x1xi1>
    %31 = vector.broadcast %30 : vector<24x1xi1> to vector<24x128xi1>
    %32 = vector.broadcast %cst_11 : f32 to vector<24x128xf32>
    %33 = arith.select %31, %29, %32 : vector<24x128xi1>, vector<24x128xf32>
    %c0_12 = arith.constant 0 : index
    %c0_13 = arith.constant 0 : index
    %34 = vector.load %arg7[%c0_12, %c0_13] : memref<1x128xf32, #tpu.memory_space<vmem>>, vector<1x128xf32>
    %c0_14 = arith.constant 0 : index
    %c0_15 = arith.constant 0 : index
    %35 = vector.load %arg8[%c0_14, %c0_15] : memref<1x128xf32, #tpu.memory_space<vmem>>, vector<1x128xf32>
    %36 = arith.truncf %33 : vector<24x128xf32> to vector<24x128xbf16>
    %c2_i32_16 = arith.constant 2 : i32
    %37 = tpu.dynamic_rotate %36 by %c2_i32_16 dim 0 : vector<24x128xbf16>, i32 -> vector<24x128xbf16>
    %c1_i32_17 = arith.constant 1 : i32
    %38 = tpu.dynamic_rotate %36 by %c1_i32_17 dim 0 : vector<24x128xbf16>, i32 -> vector<24x128xbf16>
    %c23_i32_18 = arith.constant 23 : i32
    %39 = tpu.dynamic_rotate %36 by %c23_i32_18 dim 0 : vector<24x128xbf16>, i32 -> vector<24x128xbf16>
    %c22_i32_19 = arith.constant 22 : i32
    %40 = tpu.dynamic_rotate %36 by %c22_i32_19 dim 0 : vector<24x128xbf16>, i32 -> vector<24x128xbf16>
    %41 = tpu.concatenate %37, %38, %36, %39, %40 in 1 : vector<24x128xbf16>, vector<24x128xbf16>, vector<24x128xbf16>, vector<24x128xbf16>, vector<24x128xbf16> -> vector<24x640xbf16>
    %c0_20 = arith.constant 0 : index
    %c0_21 = arith.constant 0 : index
    %42 = vector.load %arg6[%c0_20, %c0_21] : memref<640x128xbf16, #tpu.memory_space<vmem>>, vector<640x128xbf16>
    %cst_22 = arith.constant dense<0.000000e+00> : vector<24x128xf32>
    %43 = tpu.matmul %41, %42, %cst_22 {dimension_numbers = #tpu.dot_dimension_numbers<[1], [0], [0], [1], [0, 0, 1, 1], [], []>} : vector<24x640xbf16>, vector<640x128xbf16>, vector<24x128xf32> -> vector<24x128xf32>
    %44 = vector.broadcast %34 : vector<1x128xf32> to vector<24x128xf32>
    %45 = arith.mulf %43, %44 : vector<24x128xf32>
    %46 = vector.broadcast %35 : vector<1x128xf32> to vector<24x128xf32>
    %47 = arith.addf %45, %46 : vector<24x128xf32>
    %cst_23 = arith.constant 0.000000e+00 : f32
    %48 = vector.broadcast %cst_23 : f32 to vector<24x128xf32>
    %49 = arith.maximumf %47, %48 : vector<24x128xf32>
    %cst_24 = arith.constant 0.000000e+00 : f32
    %50 = vector.shape_cast %14 : vector<24x1xi1> to vector<24x1xi1>
    %51 = vector.broadcast %50 : vector<24x1xi1> to vector<24x128xi1>
    %52 = vector.broadcast %cst_24 : f32 to vector<24x128xf32>
    %53 = arith.select %51, %49, %52 : vector<24x128xi1>, vector<24x128xf32>
    %c0_25 = arith.constant 0 : index
    %c0_26 = arith.constant 0 : index
    %54 = vector.load %arg10[%c0_25, %c0_26] : memref<1x128xf32, #tpu.memory_space<vmem>>, vector<1x128xf32>
    %c0_27 = arith.constant 0 : index
    %c0_28 = arith.constant 0 : index
    %55 = vector.load %arg11[%c0_27, %c0_28] : memref<1x128xf32, #tpu.memory_space<vmem>>, vector<1x128xf32>
    %56 = arith.truncf %53 : vector<24x128xf32> to vector<24x128xbf16>
    %c2_i32_29 = arith.constant 2 : i32
    %57 = tpu.dynamic_rotate %56 by %c2_i32_29 dim 0 : vector<24x128xbf16>, i32 -> vector<24x128xbf16>
    %c1_i32_30 = arith.constant 1 : i32
    %58 = tpu.dynamic_rotate %56 by %c1_i32_30 dim 0 : vector<24x128xbf16>, i32 -> vector<24x128xbf16>
    %c23_i32_31 = arith.constant 23 : i32
    %59 = tpu.dynamic_rotate %56 by %c23_i32_31 dim 0 : vector<24x128xbf16>, i32 -> vector<24x128xbf16>
    %c22_i32_32 = arith.constant 22 : i32
    %60 = tpu.dynamic_rotate %56 by %c22_i32_32 dim 0 : vector<24x128xbf16>, i32 -> vector<24x128xbf16>
    %61 = tpu.concatenate %57, %58, %56, %59, %60 in 1 : vector<24x128xbf16>, vector<24x128xbf16>, vector<24x128xbf16>, vector<24x128xbf16>, vector<24x128xbf16> -> vector<24x640xbf16>
    %c0_33 = arith.constant 0 : index
    %c0_34 = arith.constant 0 : index
    %62 = vector.load %arg9[%c0_33, %c0_34] : memref<640x128xbf16, #tpu.memory_space<vmem>>, vector<640x128xbf16>
    %cst_35 = arith.constant dense<0.000000e+00> : vector<24x128xf32>
    %63 = tpu.matmul %61, %62, %cst_35 {dimension_numbers = #tpu.dot_dimension_numbers<[1], [0], [0], [1], [0, 0, 1, 1], [], []>} : vector<24x640xbf16>, vector<640x128xbf16>, vector<24x128xf32> -> vector<24x128xf32>
    %64 = vector.broadcast %54 : vector<1x128xf32> to vector<24x128xf32>
    %65 = arith.mulf %63, %64 : vector<24x128xf32>
    %66 = vector.broadcast %55 : vector<1x128xf32> to vector<24x128xf32>
    %67 = arith.addf %65, %66 : vector<24x128xf32>
    %cst_36 = arith.constant 0.000000e+00 : f32
    %68 = vector.broadcast %cst_36 : f32 to vector<24x128xf32>
    %69 = arith.maximumf %67, %68 : vector<24x128xf32>
    %70 = vector.extract_strided_slice %69 {offsets = [8, 0], sizes = [8, 128], strides = [1, 1]} : vector<24x128xf32> to vector<8x128xf32>
    %71 = arith.truncf %70 : vector<8x128xf32> to vector<8x128xbf16>
    %c0_37 = arith.constant 0 : index
    %c0_38 = arith.constant 0 : index
    %72 = vector.load %arg12[%c0_37, %c0_38] : memref<128x128xbf16, #tpu.memory_space<vmem>>, vector<128x128xbf16>
    %cst_39 = arith.constant dense<0.000000e+00> : vector<8x128xf32>
    %73 = tpu.matmul %71, %72, %cst_39 {dimension_numbers = #tpu.dot_dimension_numbers<[1], [0], [0], [1], [0, 0, 1, 1], [], []>} : vector<8x128xbf16>, vector<128x128xbf16>, vector<8x128xf32> -> vector<8x128xf32>
    %c0_40 = arith.constant 0 : index
    %c0_41 = arith.constant 0 : index
    %74 = vector.load %arg13[%c0_40, %c0_41] : memref<1x128xf32, #tpu.memory_space<vmem>>, vector<1x128xf32>
    %75 = vector.broadcast %74 : vector<1x128xf32> to vector<8x128xf32>
    %76 = arith.addf %73, %75 : vector<8x128xf32>
    %c0_42 = arith.constant 0 : index
    %c0_43 = arith.constant 0 : index
    %c0_44 = arith.constant 0 : index
    %77 = vector.load %arg14[%c0_42, %c0_43, %c0_44] : memref<1x8x128xf32, #tpu.memory_space<vmem>>, vector<1x8x128xf32>
    %78 = vector.shape_cast %77 : vector<1x8x128xf32> to vector<8x128xf32>
    %79 = arith.addf %76, %78 : vector<8x128xf32>
    %c0_45 = arith.constant 0 : index
    %c0_46 = arith.constant 0 : index
    %c0_47 = arith.constant 0 : index
    %80 = vector.load %arg15[%c0_45, %c0_46, %c0_47] : memref<1x8x128xf32, #tpu.memory_space<vmem>>, vector<1x8x128xf32>
    %81 = vector.shape_cast %80 : vector<1x8x128xf32> to vector<8x128xf32>
    %82 = vector.shape_cast %79 : vector<8x128xf32> to vector<1x8x128xf32>
    tpu.vector_store %arg15[%c0_45, %c0_46, %c0_47], %82 {strides = array<i32>} : memref<1x8x128xf32, #tpu.memory_space<vmem>>, vector<1x8x128xf32>,
    return
  }
  func.func @transform_0(%arg0: i32, %arg1: i32) -> (i32, i32, i32) {
    %c0_i32 = arith.constant 0 : i32
    %c0_i32_0 = arith.constant 0 : i32
    %c0_i32_1 = arith.constant 0 : i32
    return %arg0, %c0_i32, %c0_i32_0 : i32, i32, i32
  }
  func.func @transform_1(%arg0: i32, %arg1: i32) -> (i32, i32) {
    %c0_i32 = arith.constant 0 : i32
    %c0_i32_0 = arith.constant 0 : i32
    %c0_i32_1 = arith.constant 0 : i32
    return %c0_i32, %c0_i32_0 : i32, i32
  }
  func.func @transform_2(%arg0: i32, %arg1: i32) -> (i32, i32) {
    %c0_i32 = arith.constant 0 : i32
    %c0_i32_0 = arith.constant 0 : i32
    %c0_i32_1 = arith.constant 0 : i32
    return %c0_i32, %c0_i32_0 : i32, i32
  }
  func.func @transform_3(%arg0: i32, %arg1: i32) -> (i32, i32) {
    %c0_i32 = arith.constant 0 : i32
    %c0_i32_0 = arith.constant 0 : i32
    %c0_i32_1 = arith.constant 0 : i32
    return %c0_i32, %c0_i32_0 : i32, i32
  }
  func.func @transform_4(%arg0: i32, %arg1: i32) -> (i32, i32) {
    %c0_i32 = arith.constant 0 : i32
    %c0_i32_0 = arith.constant 0 : i32
    %c0_i32_1 = arith.constant 0 : i32
    return %c0_i32, %c0_i32_0 : i32, i32
  }
  func.func @transform_5(%arg0: i32, %arg1: i32) -> (i32, i32) {
    %c0_i32 = arith.constant 0 : i32
    %c0_i32_0 = arith.constant 0 : i32
    %c0_i32_1 = arith.constant 0 : i32
    return %c0_i32, %c0_i32_0 : i32, i32
  }
  func.func @transform_6(%arg0: i32, %arg1: i32) -> (i32, i32) {
    %c0_i32 = arith.constant 0 : i32
    %c0_i32_0 = arith.constant 0 : i32
    %c0_i32_1 = arith.constant 0 : i32
    return %c0_i32, %c0_i32_0 : i32, i32
  }
  func.func @transform_7(%arg0: i32, %arg1: i32) -> (i32, i32) {
    %c0_i32 = arith.constant 0 : i32
    %c0_i32_0 = arith.constant 0 : i32
    %c0_i32_1 = arith.constant 0 : i32
    return %c0_i32, %c0_i32_0 : i32, i32
  }
  func.func @transform_8(%arg0: i32, %arg1: i32) -> (i32, i32) {
    %c0_i32 = arith.constant 0 : i32
    %c0_i32_0 = arith.constant 0 : i32
    %c0_i32_1 = arith.constant 0 : i32
    return %c0_i32, %c0_i32_0 : i32, i32
  }
  func.func @transform_9(%arg0: i32, %arg1: i32) -> (i32, i32) {
    %c0_i32 = arith.constant 0 : i32
    %c0_i32_0 = arith.constant 0 : i32
    %c0_i32_1 = arith.constant 0 : i32
    return %c0_i32, %c0_i32_0 : i32, i32
  }
  func.func @transform_10(%arg0: i32, %arg1: i32) -> (i32, i32) {
    %c0_i32 = arith.constant 0 : i32
    %c0_i32_0 = arith.constant 0 : i32
    %c0_i32_1 = arith.constant 0 : i32
    return %c0_i32, %c0_i32_0 : i32, i32
  }
  func.func @transform_11(%arg0: i32, %arg1: i32) -> (i32, i32) {
    %c0_i32 = arith.constant 0 : i32
    %c0_i32_0 = arith.constant 0 : i32
    %c0_i32_1 = arith.constant 0 : i32
    return %c0_i32, %c0_i32_0 : i32, i32
  }
  func.func @transform_12(%arg0: i32, %arg1: i32) -> (i32, i32, i32) {
    %c0_i32 = arith.constant 0 : i32
    %c0_i32_0 = arith.constant 0 : i32
    %c0_i32_1 = arith.constant 0 : i32
    return %c0_i32, %arg1, %c0_i32_0 : i32, i32, i32
  }
  func.func @transform_13(%arg0: i32, %arg1: i32) -> (i32, i32, i32) {
    %c0_i32 = arith.constant 0 : i32
    %c0_i32_0 = arith.constant 0 : i32
    return %arg0, %arg1, %c0_i32 : i32, i32, i32
  }
}

module attributes {stable_mosaic.version = 11 : i64} {
  func.func @_encoder_kernel(%arg0: i32, %arg1: i32, %arg2: memref<1x24x128xbf16, #tpu.memory_space<vmem>>, %arg3: memref<640x128xbf16, #tpu.memory_space<vmem>>, %arg4: memref<1x128xf32, #tpu.memory_space<vmem>>, %arg5: memref<1x128xf32, #tpu.memory_space<vmem>>, %arg6: memref<640x128xbf16, #tpu.memory_space<vmem>>, %arg7: memref<1x128xf32, #tpu.memory_space<vmem>>, %arg8: memref<1x128xf32, #tpu.memory_space<vmem>>, %arg9: memref<640x128xbf16, #tpu.memory_space<vmem>>, %arg10: memref<1x128xf32, #tpu.memory_space<vmem>>, %arg11: memref<1x128xf32, #tpu.memory_space<vmem>>, %arg12: memref<128x128xbf16, #tpu.memory_space<vmem>>, %arg13: memref<1x128xf32, #tpu.memory_space<vmem>>, %arg14: memref<1x8x128xf32, #tpu.memory_space<vmem>>, %arg15: memref<1x8x128xf32, #tpu.memory_space<vmem>>) attributes {dimension_semantics = [#tpu.dimension_semantics<parallel>, #tpu.dimension_semantics<arbitrary>], iteration_bounds = array<i64: 2, 1>, scalar_prefetch = 0 : i64, scratch_operands = 0 : i64, tpu.core_type = #tpu.core_type<tc>, window_params = [{transform_indices = @transform_0, window_bounds = array<i64: 1, 24, 128>}, {pipeline_mode = #tpu.pipeline_mode<synchronous>, transform_indices = @transform_1, window_bounds = array<i64: 640, 128>}, {pipeline_mode = #tpu.pipeline_mode<synchronous>, transform_indices = @transform_2, window_bounds = array<i64: 1, 128>}, {pipeline_mode = #tpu.pipeline_mode<synchronous>, transform_indices = @transform_3, window_bounds = array<i64: 1, 128>}, {pipeline_mode = #tpu.pipeline_mode<synchronous>, transform_indices = @transform_4, window_bounds = array<i64: 640, 128>}, {pipeline_mode = #tpu.pipeline_mode<synchronous>, transform_indices = @transform_5, window_bounds = array<i64: 1, 128>}, {pipeline_mode = #tpu.pipeline_mode<synchronous>, transform_indices = @transform_6, window_bounds = array<i64: 1, 128>}, {pipeline_mode = #tpu.pipeline_mode<synchronous>, transform_indices = @transform_7, window_bounds = array<i64: 640, 128>}, {pipeline_mode = #tpu.pipeline_mode<synchronous>, transform_indices = @transform_8, window_bounds = array<i64: 1, 128>}, {pipeline_mode = #tpu.pipeline_mode<synchronous>, transform_indices = @transform_9, window_bounds = array<i64: 1, 128>}, {pipeline_mode = #tpu.pipeline_mode<synchronous>, transform_indices = @transform_10, window_bounds = array<i64: 128, 128>}, {pipeline_mode = #tpu.pipeline_mode<synchronous>, transform_indices = @transform_11, window_bounds = array<i64: 1, 128>}, {transform_indices = @transform_12, window_bounds = array<i64: 1, 8, 128>}, {transform_indices = @transform_13, window_bounds = array<i64: 1, 8, 128>}]} {
    %c8_i32 = arith.constant 8 : i32
    %0 = arith.muli %arg1, %c8_i32 : i32
    %1 = tpu.assume_multiple %0, 8 : i32
    %c0 = arith.constant 0 : index
    %2 = arith.index_cast %1 : i32 to index
    %c0_0 = arith.constant 0 : index
    %3 = vector.load %arg2[%c0, %2, %c0_0] : memref<1x24x128xbf16, #tpu.memory_space<vmem>>, vector<1x24x128xbf16>
    %4 = vector.shape_cast %3 : vector<1x24x128xbf16> to vector<24x128xbf16>
    %5 = tpu.iota {dimensions = array<i32: 0>} : vector<24x1xi32>
    %c8_i32_1 = arith.constant 8 : i32
    %6 = arith.muli %arg1, %c8_i32_1 : i32
    %c8_i32_2 = arith.constant 8 : i32
    %7 = arith.subi %6, %c8_i32_2 : i32
    %8 = vector.broadcast %7 : i32 to vector<24x1xi32>
    %9 = arith.addi %5, %8 : vector<24x1xi32>
    %c0_i32 = arith.constant 0 : i32
    %10 = vector.broadcast %c0_i32 : i32 to vector<24x1xi32>
    %11 = arith.cmpi sge, %9, %10 : vector<24x1xi32>
    %c8_i32_3 = arith.constant 8 : i32
    %12 = vector.broadcast %c8_i32_3 : i32 to vector<24x1xi32>
    %13 = arith.cmpi slt, %9, %12 : vector<24x1xi32>
    %14 = arith.andi %11, %13 : vector<24x1xi1>
    %c0_4 = arith.constant 0 : index
    %c0_5 = arith.constant 0 : index
    %15 = vector.load %arg4[%c0_4, %c0_5] : memref<1x128xf32, #tpu.memory_space<vmem>>, vector<1x128xf32>
    %c0_6 = arith.constant 0 : index
    %c0_7 = arith.constant 0 : index
    %16 = vector.load %arg5[%c0_6, %c0_7] : memref<1x128xf32, #tpu.memory_space<vmem>>, vector<1x128xf32>
    %17 = arith.extf %4 : vector<24x128xbf16> to vector<24x128xf32>
    %c2_i32 = arith.constant 2 : i32
    %18 = tpu.dynamic_rotate %17 by %c2_i32 dim 0 : vector<24x128xf32>, i32 -> vector<24x128xf32>
    %c1_i32 = arith.constant 1 : i32
    %19 = tpu.dynamic_rotate %17 by %c1_i32 dim 0 : vector<24x128xf32>, i32 -> vector<24x128xf32>
    %c23_i32 = arith.constant 23 : i32
    %20 = tpu.dynamic_rotate %17 by %c23_i32 dim 0 : vector<24x128xf32>, i32 -> vector<24x128xf32>
    %c22_i32 = arith.constant 22 : i32
    %21 = tpu.dynamic_rotate %17 by %c22_i32 dim 0 : vector<24x128xf32>, i32 -> vector<24x128xf32>
    %22 = tpu.concatenate %18, %19, %17, %20, %21 in 1 : vector<24x128xf32>, vector<24x128xf32>, vector<24x128xf32>, vector<24x128xf32>, vector<24x128xf32> -> vector<24x640xf32>
    %23 = arith.truncf %22 : vector<24x640xf32> to vector<24x640xbf16>
    %c0_8 = arith.constant 0 : index
    %c0_9 = arith.constant 0 : index
    %24 = vector.load %arg3[%c0_8, %c0_9] : memref<640x128xbf16, #tpu.memory_space<vmem>>, vector<640x128xbf16>
    %cst = arith.constant dense<0.000000e+00> : vector<24x128xf32>
    %25 = tpu.matmul %23, %24, %cst {dimension_numbers = #tpu.dot_dimension_numbers<[1], [0], [0], [1], [0, 0, 1, 1], [], []>} : vector<24x640xbf16>, vector<640x128xbf16>, vector<24x128xf32> -> vector<24x128xf32>
    %26 = vector.broadcast %15 : vector<1x128xf32> to vector<24x128xf32>
    %27 = arith.mulf %25, %26 : vector<24x128xf32>
    %28 = vector.broadcast %16 : vector<1x128xf32> to vector<24x128xf32>
    %29 = arith.addf %27, %28 : vector<24x128xf32>
    %cst_10 = arith.constant 0.000000e+00 : f32
    %30 = vector.broadcast %cst_10 : f32 to vector<24x128xf32>
    %31 = arith.maximumf %29, %30 : vector<24x128xf32>
    %cst_11 = arith.constant 0.000000e+00 : f32
    %32 = vector.shape_cast %14 : vector<24x1xi1> to vector<24x1xi1>
    %33 = vector.broadcast %32 : vector<24x1xi1> to vector<24x128xi1>
    %34 = vector.broadcast %cst_11 : f32 to vector<24x128xf32>
    %35 = arith.select %33, %31, %34 : vector<24x128xi1>, vector<24x128xf32>
    %c0_12 = arith.constant 0 : index
    %c0_13 = arith.constant 0 : index
    %36 = vector.load %arg7[%c0_12, %c0_13] : memref<1x128xf32, #tpu.memory_space<vmem>>, vector<1x128xf32>
    %c0_14 = arith.constant 0 : index
    %c0_15 = arith.constant 0 : index
    %37 = vector.load %arg8[%c0_14, %c0_15] : memref<1x128xf32, #tpu.memory_space<vmem>>, vector<1x128xf32>
    %c2_i32_16 = arith.constant 2 : i32
    %38 = tpu.dynamic_rotate %35 by %c2_i32_16 dim 0 : vector<24x128xf32>, i32 -> vector<24x128xf32>
    %c1_i32_17 = arith.constant 1 : i32
    %39 = tpu.dynamic_rotate %35 by %c1_i32_17 dim 0 : vector<24x128xf32>, i32 -> vector<24x128xf32>
    %c23_i32_18 = arith.constant 23 : i32
    %40 = tpu.dynamic_rotate %35 by %c23_i32_18 dim 0 : vector<24x128xf32>, i32 -> vector<24x128xf32>
    %c22_i32_19 = arith.constant 22 : i32
    %41 = tpu.dynamic_rotate %35 by %c22_i32_19 dim 0 : vector<24x128xf32>, i32 -> vector<24x128xf32>
    %42 = tpu.concatenate %38, %39, %35, %40, %41 in 1 : vector<24x128xf32>, vector<24x128xf32>, vector<24x128xf32>, vector<24x128xf32>, vector<24x128xf32> -> vector<24x640xf32>
    %43 = arith.truncf %42 : vector<24x640xf32> to vector<24x640xbf16>
    %c0_20 = arith.constant 0 : index
    %c0_21 = arith.constant 0 : index
    %44 = vector.load %arg6[%c0_20, %c0_21] : memref<640x128xbf16, #tpu.memory_space<vmem>>, vector<640x128xbf16>
    %cst_22 = arith.constant dense<0.000000e+00> : vector<24x128xf32>
    %45 = tpu.matmul %43, %44, %cst_22 {dimension_numbers = #tpu.dot_dimension_numbers<[1], [0], [0], [1], [0, 0, 1, 1], [], []>} : vector<24x640xbf16>, vector<640x128xbf16>, vector<24x128xf32> -> vector<24x128xf32>
    %46 = vector.broadcast %36 : vector<1x128xf32> to vector<24x128xf32>
    %47 = arith.mulf %45, %46 : vector<24x128xf32>
    %48 = vector.broadcast %37 : vector<1x128xf32> to vector<24x128xf32>
    %49 = arith.addf %47, %48 : vector<24x128xf32>
    %cst_23 = arith.constant 0.000000e+00 : f32
    %50 = vector.broadcast %cst_23 : f32 to vector<24x128xf32>
    %51 = arith.maximumf %49, %50 : vector<24x128xf32>
    %cst_24 = arith.constant 0.000000e+00 : f32
    %52 = vector.shape_cast %14 : vector<24x1xi1> to vector<24x1xi1>
    %53 = vector.broadcast %52 : vector<24x1xi1> to vector<24x128xi1>
    %54 = vector.broadcast %cst_24 : f32 to vector<24x128xf32>
    %55 = arith.select %53, %51, %54 : vector<24x128xi1>, vector<24x128xf32>
    %c0_25 = arith.constant 0 : index
    %c0_26 = arith.constant 0 : index
    %56 = vector.load %arg10[%c0_25, %c0_26] : memref<1x128xf32, #tpu.memory_space<vmem>>, vector<1x128xf32>
    %c0_27 = arith.constant 0 : index
    %c0_28 = arith.constant 0 : index
    %57 = vector.load %arg11[%c0_27, %c0_28] : memref<1x128xf32, #tpu.memory_space<vmem>>, vector<1x128xf32>
    %c2_i32_29 = arith.constant 2 : i32
    %58 = tpu.dynamic_rotate %55 by %c2_i32_29 dim 0 : vector<24x128xf32>, i32 -> vector<24x128xf32>
    %c1_i32_30 = arith.constant 1 : i32
    %59 = tpu.dynamic_rotate %55 by %c1_i32_30 dim 0 : vector<24x128xf32>, i32 -> vector<24x128xf32>
    %c23_i32_31 = arith.constant 23 : i32
    %60 = tpu.dynamic_rotate %55 by %c23_i32_31 dim 0 : vector<24x128xf32>, i32 -> vector<24x128xf32>
    %c22_i32_32 = arith.constant 22 : i32
    %61 = tpu.dynamic_rotate %55 by %c22_i32_32 dim 0 : vector<24x128xf32>, i32 -> vector<24x128xf32>
    %62 = tpu.concatenate %58, %59, %55, %60, %61 in 1 : vector<24x128xf32>, vector<24x128xf32>, vector<24x128xf32>, vector<24x128xf32>, vector<24x128xf32> -> vector<24x640xf32>
    %63 = arith.truncf %62 : vector<24x640xf32> to vector<24x640xbf16>
    %c0_33 = arith.constant 0 : index
    %c0_34 = arith.constant 0 : index
    %64 = vector.load %arg9[%c0_33, %c0_34] : memref<640x128xbf16, #tpu.memory_space<vmem>>, vector<640x128xbf16>
    %cst_35 = arith.constant dense<0.000000e+00> : vector<24x128xf32>
    %65 = tpu.matmul %63, %64, %cst_35 {dimension_numbers = #tpu.dot_dimension_numbers<[1], [0], [0], [1], [0, 0, 1, 1], [], []>} : vector<24x640xbf16>, vector<640x128xbf16>, vector<24x128xf32> -> vector<24x128xf32>
    %66 = vector.broadcast %56 : vector<1x128xf32> to vector<24x128xf32>
    %67 = arith.mulf %65, %66 : vector<24x128xf32>
    %68 = vector.broadcast %57 : vector<1x128xf32> to vector<24x128xf32>
    %69 = arith.addf %67, %68 : vector<24x128xf32>
    %cst_36 = arith.constant 0.000000e+00 : f32
    %70 = vector.broadcast %cst_36 : f32 to vector<24x128xf32>
    %71 = arith.maximumf %69, %70 : vector<24x128xf32>
    %72 = vector.extract_strided_slice %71 {offsets = [8, 0], sizes = [8, 128], strides = [1, 1]} : vector<24x128xf32> to vector<8x128xf32>
    %73 = arith.truncf %72 : vector<8x128xf32> to vector<8x128xbf16>
    %c0_37 = arith.constant 0 : index
    %c0_38 = arith.constant 0 : index
    %74 = vector.load %arg12[%c0_37, %c0_38] : memref<128x128xbf16, #tpu.memory_space<vmem>>, vector<128x128xbf16>
    %cst_39 = arith.constant dense<0.000000e+00> : vector<8x128xf32>
    %75 = tpu.matmul %73, %74, %cst_39 {dimension_numbers = #tpu.dot_dimension_numbers<[1], [0], [0], [1], [0, 0, 1, 1], [], []>} : vector<8x128xbf16>, vector<128x128xbf16>, vector<8x128xf32> -> vector<8x128xf32>
    %c0_40 = arith.constant 0 : index
    %c0_41 = arith.constant 0 : index
    %76 = vector.load %arg13[%c0_40, %c0_41] : memref<1x128xf32, #tpu.memory_space<vmem>>, vector<1x128xf32>
    %77 = vector.broadcast %76 : vector<1x128xf32> to vector<8x128xf32>
    %78 = arith.addf %75, %77 : vector<8x128xf32>
    %c0_42 = arith.constant 0 : index
    %c0_43 = arith.constant 0 : index
    %c0_44 = arith.constant 0 : index
    %79 = vector.load %arg14[%c0_42, %c0_43, %c0_44] : memref<1x8x128xf32, #tpu.memory_space<vmem>>, vector<1x8x128xf32>
    %80 = vector.shape_cast %79 : vector<1x8x128xf32> to vector<8x128xf32>
    %81 = arith.addf %78, %80 : vector<8x128xf32>
    %c0_45 = arith.constant 0 : index
    %c0_46 = arith.constant 0 : index
    %c0_47 = arith.constant 0 : index
    %82 = vector.load %arg15[%c0_45, %c0_46, %c0_47] : memref<1x8x128xf32, #tpu.memory_space<vmem>>, vector<1x8x128xf32>
    %83 = vector.shape_cast %82 : vector<1x8x128xf32> to vector<8x128xf32>
    %84 = vector.shape_cast %81 : vector<8x128xf32> to vector<1x8x128xf32>
    tpu.vector_store %arg15[%c0_45, %c0_46, %c0_47], %84 {strides = array<i32>} : memref<1x8x128xf32, #tpu.memory_space<vmem>>, vector<1x8x128xf32>,
    return
  }
  func.func @transform_0(%arg0: i32, %arg1: i32) -> (i32, i32, i32) {
    %c0_i32 = arith.constant 0 : i32
    %c0_i32_0 = arith.constant 0 : i32
    %c0_i32_1 = arith.constant 0 : i32
    return %arg0, %c0_i32, %c0_i32_0 : i32, i32, i32
  }
  func.func @transform_1(%arg0: i32, %arg1: i32) -> (i32, i32) {
    %c0_i32 = arith.constant 0 : i32
    %c0_i32_0 = arith.constant 0 : i32
    %c0_i32_1 = arith.constant 0 : i32
    return %c0_i32, %c0_i32_0 : i32, i32
  }
  func.func @transform_2(%arg0: i32, %arg1: i32) -> (i32, i32) {
    %c0_i32 = arith.constant 0 : i32
    %c0_i32_0 = arith.constant 0 : i32
    %c0_i32_1 = arith.constant 0 : i32
    return %c0_i32, %c0_i32_0 : i32, i32
  }
  func.func @transform_3(%arg0: i32, %arg1: i32) -> (i32, i32) {
    %c0_i32 = arith.constant 0 : i32
    %c0_i32_0 = arith.constant 0 : i32
    %c0_i32_1 = arith.constant 0 : i32
    return %c0_i32, %c0_i32_0 : i32, i32
  }
  func.func @transform_4(%arg0: i32, %arg1: i32) -> (i32, i32) {
    %c0_i32 = arith.constant 0 : i32
    %c0_i32_0 = arith.constant 0 : i32
    %c0_i32_1 = arith.constant 0 : i32
    return %c0_i32, %c0_i32_0 : i32, i32
  }
  func.func @transform_5(%arg0: i32, %arg1: i32) -> (i32, i32) {
    %c0_i32 = arith.constant 0 : i32
    %c0_i32_0 = arith.constant 0 : i32
    %c0_i32_1 = arith.constant 0 : i32
    return %c0_i32, %c0_i32_0 : i32, i32
  }
  func.func @transform_6(%arg0: i32, %arg1: i32) -> (i32, i32) {
    %c0_i32 = arith.constant 0 : i32
    %c0_i32_0 = arith.constant 0 : i32
    %c0_i32_1 = arith.constant 0 : i32
    return %c0_i32, %c0_i32_0 : i32, i32
  }
  func.func @transform_7(%arg0: i32, %arg1: i32) -> (i32, i32) {
    %c0_i32 = arith.constant 0 : i32
    %c0_i32_0 = arith.constant 0 : i32
    %c0_i32_1 = arith.constant 0 : i32
    return %c0_i32, %c0_i32_0 : i32, i32
  }
  func.func @transform_8(%arg0: i32, %arg1: i32) -> (i32, i32) {
    %c0_i32 = arith.constant 0 : i32
    %c0_i32_0 = arith.constant 0 : i32
    %c0_i32_1 = arith.constant 0 : i32
    return %c0_i32, %c0_i32_0 : i32, i32
  }
  func.func @transform_9(%arg0: i32, %arg1: i32) -> (i32, i32) {
    %c0_i32 = arith.constant 0 : i32
    %c0_i32_0 = arith.constant 0 : i32
    %c0_i32_1 = arith.constant 0 : i32
    return %c0_i32, %c0_i32_0 : i32, i32
  }
  func.func @transform_10(%arg0: i32, %arg1: i32) -> (i32, i32) {
    %c0_i32 = arith.constant 0 : i32
    %c0_i32_0 = arith.constant 0 : i32
    %c0_i32_1 = arith.constant 0 : i32
    return %c0_i32, %c0_i32_0 : i32, i32
  }
  func.func @transform_11(%arg0: i32, %arg1: i32) -> (i32, i32) {
    %c0_i32 = arith.constant 0 : i32
    %c0_i32_0 = arith.constant 0 : i32
    %c0_i32_1 = arith.constant 0 : i32
    return %c0_i32, %c0_i32_0 : i32, i32
  }
  func.func @transform_12(%arg0: i32, %arg1: i32) -> (i32, i32, i32) {
    %c0_i32 = arith.constant 0 : i32
    %c0_i32_0 = arith.constant 0 : i32
    %c0_i32_1 = arith.constant 0 : i32
    return %c0_i32, %arg1, %c0_i32_0 : i32, i32, i32
  }
  func.func @transform_13(%arg0: i32, %arg1: i32) -> (i32, i32, i32) {
    %c0_i32 = arith.constant 0 : i32
    %c0_i32_0 = arith.constant 0 : i32
    return %arg0, %arg1, %c0_i32 : i32, i32, i32
  }
}

module attributes {stable_mosaic.version = 11 : i64} {
  func.func @_encoder_kernel(%arg0: i32, %arg1: i32, %arg2: memref<1x24x128xbf16, #tpu.memory_space<vmem>>, %arg3: memref<640x128xbf16, #tpu.memory_space<vmem>>, %arg4: memref<1x128xf32, #tpu.memory_space<vmem>>, %arg5: memref<1x128xf32, #tpu.memory_space<vmem>>, %arg6: memref<640x128xbf16, #tpu.memory_space<vmem>>, %arg7: memref<1x128xf32, #tpu.memory_space<vmem>>, %arg8: memref<1x128xf32, #tpu.memory_space<vmem>>, %arg9: memref<640x128xbf16, #tpu.memory_space<vmem>>, %arg10: memref<1x128xf32, #tpu.memory_space<vmem>>, %arg11: memref<1x128xf32, #tpu.memory_space<vmem>>, %arg12: memref<128x128xbf16, #tpu.memory_space<vmem>>, %arg13: memref<1x128xf32, #tpu.memory_space<vmem>>, %arg14: memref<1x8x128xf32, #tpu.memory_space<vmem>>, %arg15: memref<1x8x128xf32, #tpu.memory_space<vmem>>) attributes {dimension_semantics = [#tpu.dimension_semantics<parallel>, #tpu.dimension_semantics<arbitrary>], iteration_bounds = array<i64: 2, 1>, scalar_prefetch = 0 : i64, scratch_operands = 0 : i64, tpu.core_type = #tpu.core_type<tc>, window_params = [{transform_indices = @transform_0, window_bounds = array<i64: 1, 24, 128>}, {pipeline_mode = #tpu.pipeline_mode<synchronous>, transform_indices = @transform_1, window_bounds = array<i64: 640, 128>}, {pipeline_mode = #tpu.pipeline_mode<synchronous>, transform_indices = @transform_2, window_bounds = array<i64: 1, 128>}, {pipeline_mode = #tpu.pipeline_mode<synchronous>, transform_indices = @transform_3, window_bounds = array<i64: 1, 128>}, {pipeline_mode = #tpu.pipeline_mode<synchronous>, transform_indices = @transform_4, window_bounds = array<i64: 640, 128>}, {pipeline_mode = #tpu.pipeline_mode<synchronous>, transform_indices = @transform_5, window_bounds = array<i64: 1, 128>}, {pipeline_mode = #tpu.pipeline_mode<synchronous>, transform_indices = @transform_6, window_bounds = array<i64: 1, 128>}, {pipeline_mode = #tpu.pipeline_mode<synchronous>, transform_indices = @transform_7, window_bounds = array<i64: 640, 128>}, {pipeline_mode = #tpu.pipeline_mode<synchronous>, transform_indices = @transform_8, window_bounds = array<i64: 1, 128>}, {pipeline_mode = #tpu.pipeline_mode<synchronous>, transform_indices = @transform_9, window_bounds = array<i64: 1, 128>}, {pipeline_mode = #tpu.pipeline_mode<synchronous>, transform_indices = @transform_10, window_bounds = array<i64: 128, 128>}, {pipeline_mode = #tpu.pipeline_mode<synchronous>, transform_indices = @transform_11, window_bounds = array<i64: 1, 128>}, {transform_indices = @transform_12, window_bounds = array<i64: 1, 8, 128>}, {transform_indices = @transform_13, window_bounds = array<i64: 1, 8, 128>}]} {
    %c8_i32 = arith.constant 8 : i32
    %0 = arith.muli %arg1, %c8_i32 : i32
    %1 = tpu.assume_multiple %0, 8 : i32
    %c0 = arith.constant 0 : index
    %2 = arith.index_cast %1 : i32 to index
    %c0_0 = arith.constant 0 : index
    %3 = vector.load %arg2[%c0, %2, %c0_0] : memref<1x24x128xbf16, #tpu.memory_space<vmem>>, vector<1x24x128xbf16>
    %4 = vector.shape_cast %3 : vector<1x24x128xbf16> to vector<24x128xbf16>
    %5 = tpu.iota {dimensions = array<i32: 0>} : vector<24x1xi32>
    %c8_i32_1 = arith.constant 8 : i32
    %6 = arith.muli %arg1, %c8_i32_1 : i32
    %c8_i32_2 = arith.constant 8 : i32
    %7 = arith.subi %6, %c8_i32_2 : i32
    %8 = vector.broadcast %7 : i32 to vector<24x1xi32>
    %9 = arith.addi %5, %8 : vector<24x1xi32>
    %c0_i32 = arith.constant 0 : i32
    %10 = vector.broadcast %c0_i32 : i32 to vector<24x1xi32>
    %11 = arith.cmpi sge, %9, %10 : vector<24x1xi32>
    %c8_i32_3 = arith.constant 8 : i32
    %12 = vector.broadcast %c8_i32_3 : i32 to vector<24x1xi32>
    %13 = arith.cmpi slt, %9, %12 : vector<24x1xi32>
    %14 = arith.andi %11, %13 : vector<24x1xi1>
    %c0_4 = arith.constant 0 : index
    %c0_5 = arith.constant 0 : index
    %15 = vector.load %arg4[%c0_4, %c0_5] : memref<1x128xf32, #tpu.memory_space<vmem>>, vector<1x128xf32>
    %c0_6 = arith.constant 0 : index
    %c0_7 = arith.constant 0 : index
    %16 = vector.load %arg5[%c0_6, %c0_7] : memref<1x128xf32, #tpu.memory_space<vmem>>, vector<1x128xf32>
    %17 = arith.extf %4 : vector<24x128xbf16> to vector<24x128xf32>
    %c2_i32 = arith.constant 2 : i32
    %18 = tpu.dynamic_rotate %17 by %c2_i32 dim 0 : vector<24x128xf32>, i32 -> vector<24x128xf32>
    %c1_i32 = arith.constant 1 : i32
    %19 = tpu.dynamic_rotate %17 by %c1_i32 dim 0 : vector<24x128xf32>, i32 -> vector<24x128xf32>
    %c23_i32 = arith.constant 23 : i32
    %20 = tpu.dynamic_rotate %17 by %c23_i32 dim 0 : vector<24x128xf32>, i32 -> vector<24x128xf32>
    %c22_i32 = arith.constant 22 : i32
    %21 = tpu.dynamic_rotate %17 by %c22_i32 dim 0 : vector<24x128xf32>, i32 -> vector<24x128xf32>
    %22 = tpu.concatenate %18, %19, %17, %20, %21 in 1 : vector<24x128xf32>, vector<24x128xf32>, vector<24x128xf32>, vector<24x128xf32>, vector<24x128xf32> -> vector<24x640xf32>
    %23 = arith.truncf %22 : vector<24x640xf32> to vector<24x640xbf16>
    %c0_8 = arith.constant 0 : index
    %c0_9 = arith.constant 0 : index
    %24 = vector.load %arg3[%c0_8, %c0_9] : memref<640x128xbf16, #tpu.memory_space<vmem>>, vector<640x128xbf16>
    %cst = arith.constant dense<0.000000e+00> : vector<24x128xf32>
    %25 = tpu.matmul %23, %24, %cst {dimension_numbers = #tpu.dot_dimension_numbers<[1], [0], [0], [1], [0, 0, 1, 1], [], []>} : vector<24x640xbf16>, vector<640x128xbf16>, vector<24x128xf32> -> vector<24x128xf32>
    %26 = vector.broadcast %15 : vector<1x128xf32> to vector<24x128xf32>
    %27 = arith.mulf %25, %26 : vector<24x128xf32>
    %28 = vector.broadcast %16 : vector<1x128xf32> to vector<24x128xf32>
    %29 = arith.addf %27, %28 : vector<24x128xf32>
    %cst_10 = arith.constant 0.000000e+00 : f32
    %30 = vector.broadcast %cst_10 : f32 to vector<24x128xf32>
    %31 = arith.maximumf %29, %30 : vector<24x128xf32>
    %cst_11 = arith.constant 0.000000e+00 : f32
    %32 = vector.shape_cast %14 : vector<24x1xi1> to vector<24x1xi1>
    %33 = vector.broadcast %32 : vector<24x1xi1> to vector<24x128xi1>
    %34 = vector.broadcast %cst_11 : f32 to vector<24x128xf32>
    %35 = arith.select %33, %31, %34 : vector<24x128xi1>, vector<24x128xf32>
    %c0_12 = arith.constant 0 : index
    %c0_13 = arith.constant 0 : index
    %36 = vector.load %arg7[%c0_12, %c0_13] : memref<1x128xf32, #tpu.memory_space<vmem>>, vector<1x128xf32>
    %c0_14 = arith.constant 0 : index
    %c0_15 = arith.constant 0 : index
    %37 = vector.load %arg8[%c0_14, %c0_15] : memref<1x128xf32, #tpu.memory_space<vmem>>, vector<1x128xf32>
    %c2_i32_16 = arith.constant 2 : i32
    %38 = tpu.dynamic_rotate %35 by %c2_i32_16 dim 0 : vector<24x128xf32>, i32 -> vector<24x128xf32>
    %c1_i32_17 = arith.constant 1 : i32
    %39 = tpu.dynamic_rotate %35 by %c1_i32_17 dim 0 : vector<24x128xf32>, i32 -> vector<24x128xf32>
    %c23_i32_18 = arith.constant 23 : i32
    %40 = tpu.dynamic_rotate %35 by %c23_i32_18 dim 0 : vector<24x128xf32>, i32 -> vector<24x128xf32>
    %c22_i32_19 = arith.constant 22 : i32
    %41 = tpu.dynamic_rotate %35 by %c22_i32_19 dim 0 : vector<24x128xf32>, i32 -> vector<24x128xf32>
    %42 = tpu.concatenate %38, %39, %35, %40, %41 in 1 : vector<24x128xf32>, vector<24x128xf32>, vector<24x128xf32>, vector<24x128xf32>, vector<24x128xf32> -> vector<24x640xf32>
    %43 = arith.truncf %42 : vector<24x640xf32> to vector<24x640xbf16>
    %c0_20 = arith.constant 0 : index
    %c0_21 = arith.constant 0 : index
    %44 = vector.load %arg6[%c0_20, %c0_21] : memref<640x128xbf16, #tpu.memory_space<vmem>>, vector<640x128xbf16>
    %cst_22 = arith.constant dense<0.000000e+00> : vector<24x128xf32>
    %45 = tpu.matmul %43, %44, %cst_22 {dimension_numbers = #tpu.dot_dimension_numbers<[1], [0], [0], [1], [0, 0, 1, 1], [], []>} : vector<24x640xbf16>, vector<640x128xbf16>, vector<24x128xf32> -> vector<24x128xf32>
    %46 = vector.broadcast %36 : vector<1x128xf32> to vector<24x128xf32>
    %47 = arith.mulf %45, %46 : vector<24x128xf32>
    %48 = vector.broadcast %37 : vector<1x128xf32> to vector<24x128xf32>
    %49 = arith.addf %47, %48 : vector<24x128xf32>
    %cst_23 = arith.constant 0.000000e+00 : f32
    %50 = vector.broadcast %cst_23 : f32 to vector<24x128xf32>
    %51 = arith.maximumf %49, %50 : vector<24x128xf32>
    %cst_24 = arith.constant 0.000000e+00 : f32
    %52 = vector.shape_cast %14 : vector<24x1xi1> to vector<24x1xi1>
    %53 = vector.broadcast %52 : vector<24x1xi1> to vector<24x128xi1>
    %54 = vector.broadcast %cst_24 : f32 to vector<24x128xf32>
    %55 = arith.select %53, %51, %54 : vector<24x128xi1>, vector<24x128xf32>
    %c0_25 = arith.constant 0 : index
    %c0_26 = arith.constant 0 : index
    %56 = vector.load %arg10[%c0_25, %c0_26] : memref<1x128xf32, #tpu.memory_space<vmem>>, vector<1x128xf32>
    %c0_27 = arith.constant 0 : index
    %c0_28 = arith.constant 0 : index
    %57 = vector.load %arg11[%c0_27, %c0_28] : memref<1x128xf32, #tpu.memory_space<vmem>>, vector<1x128xf32>
    %c2_i32_29 = arith.constant 2 : i32
    %58 = tpu.dynamic_rotate %55 by %c2_i32_29 dim 0 : vector<24x128xf32>, i32 -> vector<24x128xf32>
    %c1_i32_30 = arith.constant 1 : i32
    %59 = tpu.dynamic_rotate %55 by %c1_i32_30 dim 0 : vector<24x128xf32>, i32 -> vector<24x128xf32>
    %c23_i32_31 = arith.constant 23 : i32
    %60 = tpu.dynamic_rotate %55 by %c23_i32_31 dim 0 : vector<24x128xf32>, i32 -> vector<24x128xf32>
    %c22_i32_32 = arith.constant 22 : i32
    %61 = tpu.dynamic_rotate %55 by %c22_i32_32 dim 0 : vector<24x128xf32>, i32 -> vector<24x128xf32>
    %62 = tpu.concatenate %58, %59, %55, %60, %61 in 1 : vector<24x128xf32>, vector<24x128xf32>, vector<24x128xf32>, vector<24x128xf32>, vector<24x128xf32> -> vector<24x640xf32>
    %63 = arith.truncf %62 : vector<24x640xf32> to vector<24x640xbf16>
    %c0_33 = arith.constant 0 : index
    %c0_34 = arith.constant 0 : index
    %64 = vector.load %arg9[%c0_33, %c0_34] : memref<640x128xbf16, #tpu.memory_space<vmem>>, vector<640x128xbf16>
    %cst_35 = arith.constant dense<0.000000e+00> : vector<24x128xf32>
    %65 = tpu.matmul %63, %64, %cst_35 {dimension_numbers = #tpu.dot_dimension_numbers<[1], [0], [0], [1], [0, 0, 1, 1], [], []>} : vector<24x640xbf16>, vector<640x128xbf16>, vector<24x128xf32> -> vector<24x128xf32>
    %66 = vector.broadcast %56 : vector<1x128xf32> to vector<24x128xf32>
    %67 = arith.mulf %65, %66 : vector<24x128xf32>
    %68 = vector.broadcast %57 : vector<1x128xf32> to vector<24x128xf32>
    %69 = arith.addf %67, %68 : vector<24x128xf32>
    %cst_36 = arith.constant 0.000000e+00 : f32
    %70 = vector.broadcast %cst_36 : f32 to vector<24x128xf32>
    %71 = arith.maximumf %69, %70 : vector<24x128xf32>
    %72 = vector.extract_strided_slice %71 {offsets = [8, 0], sizes = [8, 128], strides = [1, 1]} : vector<24x128xf32> to vector<8x128xf32>
    %73 = arith.truncf %72 : vector<8x128xf32> to vector<8x128xbf16>
    %c0_37 = arith.constant 0 : index
    %c0_38 = arith.constant 0 : index
    %74 = vector.load %arg12[%c0_37, %c0_38] : memref<128x128xbf16, #tpu.memory_space<vmem>>, vector<128x128xbf16>
    %cst_39 = arith.constant dense<0.000000e+00> : vector<8x128xf32>
    %75 = tpu.matmul %73, %74, %cst_39 {dimension_numbers = #tpu.dot_dimension_numbers<[1], [0], [0], [1], [0, 0, 1, 1], [], []>} : vector<8x128xbf16>, vector<128x128xbf16>, vector<8x128xf32> -> vector<8x128xf32>
    %c0_40 = arith.constant 0 : index
    %c0_41 = arith.constant 0 : index
    %76 = vector.load %arg13[%c0_40, %c0_41] : memref<1x128xf32, #tpu.memory_space<vmem>>, vector<1x128xf32>
    %77 = vector.broadcast %76 : vector<1x128xf32> to vector<8x128xf32>
    %78 = arith.addf %75, %77 : vector<8x128xf32>
    %c0_42 = arith.constant 0 : index
    %c0_43 = arith.constant 0 : index
    %c0_44 = arith.constant 0 : index
    %79 = vector.load %arg14[%c0_42, %c0_43, %c0_44] : memref<1x8x128xf32, #tpu.memory_space<vmem>>, vector<1x8x128xf32>
    %80 = vector.shape_cast %79 : vector<1x8x128xf32> to vector<8x128xf32>
    %81 = arith.addf %78, %80 : vector<8x128xf32>
    %c0_45 = arith.constant 0 : index
    %c0_46 = arith.constant 0 : index
    %c0_47 = arith.constant 0 : index
    %82 = vector.load %arg15[%c0_45, %c0_46, %c0_47] : memref<1x8x128xf32, #tpu.memory_space<vmem>>, vector<1x8x128xf32>
    %83 = vector.shape_cast %82 : vector<1x8x128xf32> to vector<8x128xf32>
    %84 = vector.shape_cast %81 : vector<8x128xf32> to vector<1x8x128xf32>
    tpu.vector_store %arg15[%c0_45, %c0_46, %c0_47], %84 {strides = array<i32>} : memref<1x8x128xf32, #tpu.memory_space<vmem>>, vector<1x8x128xf32>,
    return
  }
  func.func @transform_0(%arg0: i32, %arg1: i32) -> (i32, i32, i32) {
    %c0_i32 = arith.constant 0 : i32
    %c0_i32_0 = arith.constant 0 : i32
    %c0_i32_1 = arith.constant 0 : i32
    return %arg0, %c0_i32, %c0_i32_0 : i32, i32, i32
  }
  func.func @transform_1(%arg0: i32, %arg1: i32) -> (i32, i32) {
    %c0_i32 = arith.constant 0 : i32
    %c0_i32_0 = arith.constant 0 : i32
    %c0_i32_1 = arith.constant 0 : i32
    return %c0_i32, %c0_i32_0 : i32, i32
  }
  func.func @transform_2(%arg0: i32, %arg1: i32) -> (i32, i32) {
    %c0_i32 = arith.constant 0 : i32
    %c0_i32_0 = arith.constant 0 : i32
    %c0_i32_1 = arith.constant 0 : i32
    return %c0_i32, %c0_i32_0 : i32, i32
  }
  func.func @transform_3(%arg0: i32, %arg1: i32) -> (i32, i32) {
    %c0_i32 = arith.constant 0 : i32
    %c0_i32_0 = arith.constant 0 : i32
    %c0_i32_1 = arith.constant 0 : i32
    return %c0_i32, %c0_i32_0 : i32, i32
  }
  func.func @transform_4(%arg0: i32, %arg1: i32) -> (i32, i32) {
    %c0_i32 = arith.constant 0 : i32
    %c0_i32_0 = arith.constant 0 : i32
    %c0_i32_1 = arith.constant 0 : i32
    return %c0_i32, %c0_i32_0 : i32, i32
  }
  func.func @transform_5(%arg0: i32, %arg1: i32) -> (i32, i32) {
    %c0_i32 = arith.constant 0 : i32
    %c0_i32_0 = arith.constant 0 : i32
    %c0_i32_1 = arith.constant 0 : i32
    return %c0_i32, %c0_i32_0 : i32, i32
  }
  func.func @transform_6(%arg0: i32, %arg1: i32) -> (i32, i32) {
    %c0_i32 = arith.constant 0 : i32
    %c0_i32_0 = arith.constant 0 : i32
    %c0_i32_1 = arith.constant 0 : i32
    return %c0_i32, %c0_i32_0 : i32, i32
  }
  func.func @transform_7(%arg0: i32, %arg1: i32) -> (i32, i32) {
    %c0_i32 = arith.constant 0 : i32
    %c0_i32_0 = arith.constant 0 : i32
    %c0_i32_1 = arith.constant 0 : i32
    return %c0_i32, %c0_i32_0 : i32, i32
  }
  func.func @transform_8(%arg0: i32, %arg1: i32) -> (i32, i32) {
    %c0_i32 = arith.constant 0 : i32
    %c0_i32_0 = arith.constant 0 : i32
    %c0_i32_1 = arith.constant 0 : i32
    return %c0_i32, %c0_i32_0 : i32, i32
  }
  func.func @transform_9(%arg0: i32, %arg1: i32) -> (i32, i32) {
    %c0_i32 = arith.constant 0 : i32
    %c0_i32_0 = arith.constant 0 : i32
    %c0_i32_1 = arith.constant 0 : i32
    return %c0_i32, %c0_i32_0 : i32, i32
  }
  func.func @transform_10(%arg0: i32, %arg1: i32) -> (i32, i32) {
    %c0_i32 = arith.constant 0 : i32
    %c0_i32_0 = arith.constant 0 : i32
    %c0_i32_1 = arith.constant 0 : i32
    return %c0_i32, %c0_i32_0 : i32, i32
  }
  func.func @transform_11(%arg0: i32, %arg1: i32) -> (i32, i32) {
    %c0_i32 = arith.constant 0 : i32
    %c0_i32_0 = arith.constant 0 : i32
    %c0_i32_1 = arith.constant 0 : i32
    return %c0_i32, %c0_i32_0 : i32, i32
  }
  func.func @transform_12(%arg0: i32, %arg1: i32) -> (i32, i32, i32) {
    %c0_i32 = arith.constant 0 : i32
    %c0_i32_0 = arith.constant 0 : i32
    %c0_i32_1 = arith.constant 0 : i32
    return %c0_i32, %arg1, %c0_i32_0 : i32, i32, i32
  }
  func.func @transform_13(%arg0: i32, %arg1: i32) -> (i32, i32, i32) {
    %c0_i32 = arith.constant 0 : i32
    %c0_i32_0 = arith.constant 0 : i32
    return %arg0, %arg1, %c0_i32 : i32, i32, i32
  }
}

</mosaic_0001>

<bundles_post_ra>
// kernel: tpu_custom_call.1
= control target key start
LH: loop header
LB: loop body
LE: loop exit
PB: predicated region body
PF: predicated region fallthrough
CT: control target
= control target key end

     0   :  { %s3892_s0 = inlined_call_operand.hbm [shape: bf16[2,24,128], index: 0, kind: input, shape index: {}]   ;;  %s3893_s1 = inlined_call_operand.hbm [shape: bf16[640,128], index: 1, kind: input, shape index: {}]   ;;  %s3894_s2 = inlined_call_operand.vmem [shape: f32[1,128], index: 2, kind: input, shape index: {}]   ;;  %s3895_s3 = inlined_call_operand.vmem [shape: f32[1,128], index: 3, kind: input, shape index: {}]   ;;  %s3896_s4 = inlined_call_operand.hbm [shape: bf16[640,128], index: 4, kind: input, shape index: {}]   ;;  %s3897_s5 = inlined_call_operand.vmem [shape: f32[1,128], index: 5, kind: input, shape index: {}]   ;;  %s3898_s6 = inlined_call_operand.vmem [shape: f32[1,128], index: 6, kind: input, shape index: {}]   ;;  %s3899_s7 = inlined_call_operand.hbm [shape: bf16[640,128], index: 7, kind: input, shape index: {}]   ;;  %s3900_s8 = inlined_call_operand.vmem [shape: f32[1,128], index: 8, kind: input, shape index: {}]   ;;  %s3901_s9 = inlined_call_operand.vmem [shape: f32[1,128], index: 9, kind: input, shape index: {}]   ;;  %s3902_s10 = inlined_call_operand.hbm [shape: bf16[128,128], index: 10, kind: input, shape index: {}]   ;;  %s3903_s11 = inlined_call_operand.vmem [shape: f32[1,128], index: 11, kind: input, shape index: {}]   ;;  %s3904_s12 = inlined_call_operand.vmem [shape: f32[1,8,128], index: 12, kind: input, shape index: {}]   ;;  %s3905_s13 = inlined_call_operand.hbm [shape: f32[2,8,128], index: 13, kind: output, shape index: {}]  }
   0x1   :  { %3913 = sst [smem:[#allocation19_spill]] %s3897_s5 }
   0x2   :  { %3914 = sst [smem:[#allocation20_spill]] %s3898_s6 }
   0x3   :  { %3915 = sst [smem:[#allocation21_spill]] %s3900_s8 }
   0x4   :  { %3916 = sst [smem:[#allocation22_spill]] %s3901_s9 }
   0x5   :  { %3917 = sst [smem:[#allocation23_spill]] %s3903_s11 }
   0x6   :  { %3918 = sst [smem:[#allocation24_spill]] %s3904_s12 }
   0x7   :  { %3919 = sst [smem:[#allocation25_spill]] %s3905_s13 }
   0x8   :  { %18 = vsyncpa [#allocation3], 0 }
   0x9   :  { %20 = vsyncpa [#allocation3 + $0x1], 0 }
   0xa   :  { %21 = vsyncpa [#allocation6], 0 }
   0xb   :  { %22 = vsyncpa [#allocation9], 0 }
   0xc   :  { %23 = vsyncpa [#allocation4], 0 }
   0xd   :  { %25 = vsyncpa [#allocation4 + $0x1], 0  ;;  %s3410_s25 = smov 0   ;;  %s3412_s26 = smov 0  }
   0xe   :  { %s3414_s27 = smov 0   ;;  %s3416_s28 = smov 0  }
   0xf   :  { %s3418_s29 = smov 0   ;;  %s3420_s30 = smov 0  }
  0x10 LB: > { %3920 = sst [smem:[#allocation16_spill]] %s3307_s25  ;;  %s2409_s14 = sadd.s32 4294967295, %s3327_s30   ;;  %s3327_s30 = sphi %s3420_s30, %s31_s30   ;;  %s3323_s29 = sphi %s3418_s29, %s3952_s29   ;;  %s3319_s28 = sphi %s3416_s28, %s3951_s28   ;;  %s3315_s27 = sphi %s3414_s27, %s3950_s27   ;;  %s3311_s26 = sphi %s3412_s26, %s3949_s26   ;;  %s3307_s25 = sphi %s3410_s25, %s3948_s25  }
  0x11   : > { %3921 = sst [smem:[#allocation17_spill]] %s3319_s28  ;;  %s2410_s15 = sadd.s32 4294967294, %s3327_s30  }
  0x12   : > { %p63_p0 = scmp.ne.s32.totalorder %s3311_s26, %s3307_s25  ;;  %p3444_p1 = scmp.eq.s32.totalorder %s2409_s14, 0 }
  0x13   : > { %p3448_p2 = scmp.eq.s32.totalorder %s2409_s14, 1  ;;  %p352_p3 = scmp.eq.s32.totalorder %s2410_s15, 1 }
  0x14   : > { %s3922_s16 = scalar_select %p3444_p1, 1, 0 }
  0x15   : > { %s3923_s17 = scalar_select %p3448_p2, 1, 0 }
  0x16   : > { %p3454_p4 = por %p3444_p1, %p63_p0  ;;  %p2411_p5 = scmp.ge.s32.totalorder %s3327_s30, 1 }
  0x17   : > { %p3459_p6 = por %p352_p3, %p63_p0  ;;  %p359_p7 = scmp.lt.s32.totalorder %s3327_s30, 3 }
  0x18   : > { %s3924_s18 = scalar_select %p3454_p4, 1, 0 }
  0x19   : > { %s3925_s19 = scalar_select %p3459_p6, 1, 0 }
  0x1a   : > { %p3464_p8 = pnand %p2411_p5, %p359_p7  ;;  %s3329_s21 = smov [#allocation5]  }
  0x1b   : > { %3926 = sst [smem:[#allocation18_spill]] %s3925_s19  ;;  %s371_s22 = sshll.u32 %s3329_s21, 4  ;;  %s3468_s22 = int_to_ptr.vmem [resolvable:$true] %s371_s22 }
  0x1c   : > { %s3927_s20 = scalar_select %p3464_p8, 1, 0 }
  0x1d   : > { %p2876_p9 = pneg %p3464_p8  ;;  %s3330_s24 = smov [#allocation8]  }
  0x1e   : > { %s409_s14 = sshll.u32 %s3330_s24, 4  ;;  %s3331_s15 = smov [#allocation7]   ;;  %s3479_s14 = int_to_ptr.vmem [resolvable:$true] %s409_s14 }
  0x1f   : > { %p3475_p11 = pnand %p2876_p9, %p3444_p1  ;;  %s3481_s19 = sshll.u32 %s3331_s15, 4  ;;  %s391_s19 = int_to_ptr.vmem [resolvable:$true] %s3481_s19 }
  0x20   : > { %s3095_s13 = scalar_lea.hbm %s3893_s1, 5120 }
  0x21   : > { %p3096_p12 = scmp.ne.s32.totalorder %s3893_s1, %s3095_s13  ;;  %p3491_p13 = pneg %p3475_p11 }
  0x22   : > { %p3102_p5 = scmp.lt.u32.totalorder %s3095_s13, %s3893_s1 }
  0x23   : > { %p3098_p0 = pnand %p3491_p13, %p3096_p12 }
  0x25   : > { %p3099_p3 = pneg %p3098_p0 }
  0x27   : > { %p3104_p7 = pnand %p3102_p5, %p3099_p3 }
  0x29   : > { %3107 = shalt.err (!%p3104_p7)
}
  0x2a   : > { %s3108_s11 = scalar_lea.vmem %s3468_s22, 5120  ;;  %p3116_p1 = scmp.lt.s32.totalorder %s3468_s22, %s3468_s22 }
  0x2b   : > { %p3109_p9 = scmp.ne.s32.totalorder %s3468_s22, %s3108_s11  ;;  %p3117_p4 = scmp.lt.s32.totalorder %s3108_s11, %s3108_s11 }
  0x2d   : > { %p3111_p10 = pnand %p3109_p9, %p3491_p13  ;;  %p3118_p12 = por %p3117_p4, %p3116_p1 }
  0x2f   : > { %p3112_p6 = pneg %p3111_p10 }
  0x31   : > { %p3119_p0 = pnand %p3118_p12, %p3112_p6 }
  0x33   : > { %3122 = shalt.err (!%p3119_p0)
}
  0x34   : > { %s3332_s12 = smov 64   ;;  %s3333_s13 = smov 4  }
  0x35   : > { %2879 = dma.hbm_to_vmem [thread:$0]  (!%p3475_p11), %s3893_s1, 5120, %s3468_s22, [#allocation6], %s3332_s12, %s3332_s12, %s3333_s13  }
  0x36   : > { %s3123_s11 = scalar_lea.hbm %s3899_s7, 5120 }
  0x37   : > { %p3124_p1 = scmp.ne.s32.totalorder %s3899_s7, %s3123_s11  ;;  %p3130_p10 = scmp.lt.u32.totalorder %s3123_s11, %s3899_s7 }
  0x39   : > { %p3126_p4 = pnand %p3124_p1, %p3491_p13 }
  0x3b   : > { %p3127_p6 = pneg %p3126_p4 }
  0x3d   : > { %p3132_p3 = pnand %p3130_p10, %p3127_p6 }
  0x3f   : > { %3135 = shalt.err (!%p3132_p3)
}
  0x40   : > { %s3136_s22 = scalar_lea.vmem %s3479_s14, 5120  ;;  %p3144_p12 = scmp.lt.s32.totalorder %s3479_s14, %s3479_s14 }
  0x41   : > { %p3137_p5 = scmp.ne.s32.totalorder %s3479_s14, %s3136_s22  ;;  %p3145_p0 = scmp.lt.s32.totalorder %s3136_s22, %s3136_s22 }
  0x43   : > { %p3139_p7 = pnand %p3137_p5, %p3491_p13  ;;  %p3146_p1 = por %p3145_p0, %p3144_p12 }
  0x45   : > { %p3140_p9 = pneg %p3139_p7 }
  0x47   : > { %p3147_p4 = pnand %p3146_p1, %p3140_p9 }
  0x49   : > { %3150 = shalt.err (!%p3147_p4)
}
  0x4a   : > { %2885 = dma.hbm_to_vmem [thread:$0]  (!%p3475_p11), %s3899_s7, 5120, %s3479_s14, [#allocation9], %s3332_s12, %s3332_s12, %s3333_s13  }
  0x4b   : > { %s3151_s25 = scalar_lea.hbm %s3896_s4, 5120 }
  0x4c   : > { %p3152_p6 = scmp.ne.s32.totalorder %s3896_s4, %s3151_s25  ;;  %p3158_p5 = scmp.lt.u32.totalorder %s3151_s25, %s3896_s4 }
  0x4e   : > { %p3154_p10 = pnand %p3152_p6, %p3491_p13 }
  0x50   : > { %p3155_p3 = pneg %p3154_p10 }
  0x52   : > { %p3160_p7 = pnand %p3158_p5, %p3155_p3 }
  0x54   : > { %3163 = shalt.err (!%p3160_p7)
}
  0x55   : > { %s3164_s22 = scalar_lea.vmem %s391_s19, 5120  ;;  %p3172_p1 = scmp.lt.s32.totalorder %s391_s19, %s391_s19 }
  0x56   : > { %p3165_p9 = scmp.ne.s32.totalorder %s391_s19, %s3164_s22  ;;  %p3173_p4 = scmp.lt.s32.totalorder %s3164_s22, %s3164_s22 }
  0x58   : > { %p3167_p12 = pnand %p3165_p9, %p3491_p13  ;;  %p3174_p8 = por %p3173_p4, %p3172_p1 }
  0x5a   : > { %p3168_p0 = pneg %p3167_p12 }
  0x5c   : > { %p3175_p2 = pnand %p3174_p8, %p3168_p0 }
  0x5e   : > { %3178 = shalt.err (!%p3175_p2)
}
  0x5f   : > { %2882 = dma.hbm_to_vmem [thread:$0]  (!%p3475_p11), %s3896_s4, 5120, %s391_s19, [#allocation6], %s3332_s12, %s3332_s12, %s3333_s13  }
  0x60   : > { %s3334_s6 = smov [#allocation10]   ;;  %s3179_s21 = scalar_lea.hbm %s3902_s10, 1024 }
  0x61   : > { %s428_s8 = sshll.u32 %s3334_s6, 4  ;;  %p3180_p2 = scmp.ne.s32.totalorder %s3902_s10, %s3179_s21  ;;  %s429_s8 = int_to_ptr.vmem [resolvable:$true] %s428_s8 }
  0x62   : > { %p3186_p10 = scmp.lt.u32.totalorder %s3179_s21, %s3902_s10 }
  0x63   : > { %p3182_p8 = pnand %p3180_p2, %p3491_p13 }
  0x65   : > { %p3183_p6 = pneg %p3182_p8 }
  0x67   : > { %p3188_p3 = pnand %p3186_p10, %p3183_p6 }
  0x69   : > { %3191 = shalt.err (!%p3188_p3)
}
  0x6a   : > { %s3192_s19 = scalar_lea.vmem %s429_s8, 1024  ;;  %p3200_p12 = scmp.lt.s32.totalorder %s429_s8, %s429_s8 }
  0x6b   : > { %p3193_p5 = scmp.ne.s32.totalorder %s429_s8, %s3192_s19  ;;  %p3201_p0 = scmp.lt.s32.totalorder %s3192_s19, %s3192_s19 }
  0x6d   : > { %p3195_p7 = pnand %p3193_p5, %p3491_p13  ;;  %p3202_p1 = por %p3201_p0, %p3200_p12 }
  0x6f   : > { %p3196_p9 = pneg %p3195_p7 }
  0x71   : > { %p3203_p4 = pnand %p3202_p1, %p3196_p9 }
  0x73   : > { %3206 = shalt.err (!%p3203_p4)
}
  0x74   : > { %2888 = dma.hbm_to_vmem [thread:$0]  (!%p3475_p11), %s3902_s10, 1024, %s429_s8, [#allocation9], %s3332_s12, %s3332_s12, %s3333_s13  }
  0x75   : > { %s43_s9 = sadd.s32 1, %s3323_s29  ;;  %s50_s23 = sadd.s32 1, %s3315_s27 }
  0x76   : > { %p45_p13 = scmp.ge.s32.totalorder %s43_s9, 2  ;;  %p57_p2 = scmp.ne.s32.totalorder %s3315_s27, %s3311_s26 }
  0x77   : > { %p58_p8 = scmp.eq.s32.totalorder %s3327_s30, 0  ;;  %p2901_p6 = scmp.lt.s32.totalorder %s3327_s30, 2 }
  0x78   : > { %s3954_s9 = smov (%p45_p13, %s43_s9), 0  ;;  %p3930_p3 = scmp.ne.s32.totalorder %s3923_s17, 0 }
  0x79   : > { %p59_p10 = por %p58_p8, %p57_p2  ;;  %s47_s28 = ssub.s32 %s3323_s29, %s3954_s9 }
  0x7a   : > { %p3594_p5 = por %p3930_p3, %p57_p2  ;;  %s452_s25 = sand.u32 1, %s3315_s27  }
  0x7b   : > { %p48_p7 = scmp.eq.s32.totalorder %s47_s28, 0  ;;  %s2853_s8 = smul.u32 12, %s452_s25 }
  0x7c   : > { %p3601_p11 = pnand %p2901_p6, %p59_p10  ;;  %s2854_s15 = smul.u32 192, %s3323_s29 }
  0x7d   : > { %s3606_s24 = scalar_select %p48_p7, %s3315_s27, %s50_s23  }
  0x7e   : > { %s456_s11 = scalar_lea.vmem [#allocation2], %s2853_s8  ;;  %s3612_s14 = scalar_lea.hbm %s3892_s0, %s2854_s15 }
  0x7f   : > { %s463_s22 = sshll.u32 %s456_s11, 4  ;;  %s3616_s5 = scalar_lea.sflag [#allocation3], %s452_s25  ;;  %s3614_s22 = int_to_ptr.vmem [resolvable:$true] %s463_s22 }
  0x80   : > { %s3207_s28 = scalar_lea.hbm %s3612_s14, 192  ;;  %p3209_p12 = pneg %p3601_p11 }
  0x81   : > { %p3208_p9 = scmp.ne.s32.totalorder %s3612_s14, %s3207_s28  ;;  %s3212_s15 = scalar_lea.hbm %s3892_s0, 384 }
  0x82   : > { %p3213_p4 = scmp.lt.u32.totalorder %s3612_s14, %s3892_s0  ;;  %p3214_p13 = scmp.lt.u32.totalorder %s3212_s15, %s3207_s28 }
  0x83   : > { %p3210_p0 = pnand %p3209_p12, %p3208_p9  ;;  %p3216_p8 = scmp.lt.u32.totalorder %s3207_s28, %s3612_s14 }
  0x84   : > { %p3215_p2 = por %p3214_p13, %p3213_p4 }
  0x85   : > { %p3211_p1 = pneg %p3210_p0 }
  0x86   : > { %p3217_p6 = por %p3216_p8, %p3215_p2 }
  0x88   : > { %p3218_p10 = pnand %p3217_p6, %p3211_p1 }
  0x8a   : > { %3221 = shalt.err (!%p3218_p10)
}
  0x8b   : > { %s3222_s25 = scalar_lea.vmem %s3614_s22, 192  ;;  %s3335_s19 = smov [#allocation2]  }
  0x8c   : > { %p3223_p3 = scmp.ne.s32.totalorder %s3614_s22, %s3222_s25  ;;  %s3227_s23 = sshll.u32 %s3335_s19, 4  ;;  %s3228_s23 = int_to_ptr.vmem [resolvable:$false] %s3227_s23 }
  0x8d   : > { %s3229_s8 = scalar_lea.vmem %s3228_s23, 384  ;;  %p3230_p0 = scmp.lt.s32.totalorder %s3614_s22, %s3228_s23 }
  0x8e   : > { %p3225_p7 = pnand %p3223_p3, %p3209_p12  ;;  %p3231_p4 = scmp.lt.s32.totalorder %s3229_s8, %s3222_s25 }
  0x90   : > { %p3226_p9 = pneg %p3225_p7  ;;  %p3232_p13 = por %p3231_p4, %p3230_p0 }
  0x92   : > { %p3233_p2 = pnand %p3232_p13, %p3226_p9 }
  0x94   : > { %3236 = shalt.err (!%p3233_p2)
}
  0x95   : > { %2892 = dma.hbm_to_vmem [thread:$0]  (!%p3601_p11), %s3612_s14, 192, %s3614_s22, %s3616_s5, %s3332_s12, %s3332_s12, %s3333_s13  }
  0x96   : > { %p3933_p12 = scmp.ne.s32.totalorder %s3927_s20, 0 }
  0x97   : > { %s3650_s28 = sand.u32 (!%p3933_p12), 1, %s3311_s26   ;;  %p3934_p1 = scmp.ne.s32.totalorder (!%p3933_p12), %s3924_s18, 0 }
  0x98   : > { %475 = sbr.rel (%p3933_p12) target bundleno = 1208 (0x4b8), region = 72  ;;  %s478_s11 = scalar_lea.sflag (!%p3933_p12), [#allocation3], %s3650_s28 }
  0x99   : > { %s2855_s15 = smul.u32 (!%p3933_p12), 12, %s3650_s28 }
  0x9b   : > { %s3654_s17 = scalar_lea.vmem (!%p3933_p12), [#allocation2], %s2855_s15 }
  0x9f   : > { %3290 = dma.done.wait (%p3934_p1), %s478_s11, 192  }
  0xa0   : > { %3292 = vsyncadd (%p3934_p1), %s478_s11, 4294967104  ;;  %p3935_p11 = scmp.ne.s32.totalorder %s3922_s16, 0 }
  0xa2   : > { %3294 = dma.done.wait (%p3935_p11), [#allocation6], 10240  }
  0xa3   : > { %3296 = vsyncadd (%p3935_p11), [#allocation6], 4294957056 }
  0xa4   : > { %3298 = dma.done.wait (%p3935_p11), [#allocation9], 6144  }
  0xa5   : > { %3300 = vsyncadd (%p3935_p11), [#allocation9], 4294961152  ;;  %v2964_v0 = vld [vmem:[#allocation5 + $0x40] sm:$0xff]   ;;  %v2968_v4 = vld [vmem:[#allocation5 + $0x48] sm:$0xff]   ;;  %v557_v26 = vlaneseq  ;;  %s3936_s22 = sld [smem:[#allocation19_spill]]  ;;  %s3937_s25 = sld [smem:[#allocation20_spill]] }
  0xa6   : > { %v2965_v1 = vld [vmem:[#allocation5 + $0xc0] sm:$0xff]   ;;  %2566 = vmatprep.subr.bf16.mxu0 %v2964_v0  ;;  %v2969_v5 = vld [vmem:[#allocation5 + $0xc8] sm:$0xff]   ;;  %v2972_v8 = vld [vmem:[#allocation5 + $0x50] sm:$0xff]   ;;  %vm3338_vm4 = vmmov 0   ;;  %s3938_s19 = sld [smem:[#allocation17_spill]]  ;;  %s3939_s15 = sld [smem:[#allocation21_spill]] }
  0xa7   : > { %v2966_v2 = vld [vmem:[#allocation5] sm:$0xff]   ;;  %2594 = vmatprep.subr.bf16.mxu1 %v2965_v1  ;;  %v2970_v6 = vld [vmem:[#allocation5 + $0x8] sm:$0xff]   ;;  %v2973_v9 = vld [vmem:[#allocation5 + $0xd0] sm:$0xff]   ;;  %v3668_v31 = vshrl.u32 %v557_v26, 7  ;;  %s3940_s16 = sld [smem:[#allocation22_spill]]  ;;  %s2424_s18 = sshll.u32 %s3650_s28, 3 }
  0xa8   : > { %v2967_v3 = vld [vmem:[#allocation5 + $0x80] sm:$0xff]   ;;  %2567 = vmatpush3.bf16.msra.mxu0 %v2966_v2  ;;  %v2971_v7 = vld [vmem:[#allocation5 + $0x88] sm:$0xff]   ;;  %v2974_v10 = vld [vmem:[#allocation5 + $0x10] sm:$0xff]   ;;  %s3941_s13 = sld [smem:[#allocation23_spill]]  ;;  %s3942_s14 = sld [smem:[#allocation24_spill]] }
  0xa9   : > { %2595 = vmatpush3.bf16.msra.mxu1 %v2967_v3  ;;  %2568 = vmatprep.subr.bf16.mxu0 %v2968_v4  ;;  %v2975_v11 = vld [vmem:[#allocation5 + $0x90] sm:$0xff]   ;;  %v2976_v12 = vld [vmem:[#allocation5 + $0x58] sm:$0xff]   ;;  %v2980_v16 = vld [vmem:[#allocation5 + $0x60] sm:$0xff]   ;;  %vm590_vm0 = vcmp.lt.s32.totalorder %v3668_v31, 1  ;;  %vm597_vm1 = vcmp.lt.s32.totalorder %v3668_v31, 7  ;;  %vm583_vm2 = vcmp.lt.s32.totalorder %v3668_v31, 2 }
  0xaa   : > { %2596 = vmatprep.subr.bf16.mxu1 %v2969_v5  ;;  %v2977_v13 = vld [vmem:[#allocation5 + $0xd8] sm:$0xff]   ;;  %v2981_v17 = vld [vmem:[#allocation5 + $0xe0] sm:$0xff]   ;;  %v2984_v20 = vld [vmem:[#allocation5 + $0x68] sm:$0xff]   ;;  %vm604_vm3 = vcmp.lt.s32.totalorder %v3668_v31, 6  ;;  %s3943_s11 = sld [smem:[#allocation25_spill]] }
  0xab   : > { %v2978_v14 = vld [vmem:[#allocation5 + $0x18] sm:$0xff]   ;;  %v2982_v18 = vld [vmem:[#allocation5 + $0x20] sm:$0xff]   ;;  %v2985_v21 = vld [vmem:[#allocation5 + $0xe8] sm:$0xff]  }
  0xac   : > { %2569 = vmatpush3.bf16.msra.mxu0 %v2970_v6  ;;  %v2979_v15 = vld [vmem:[#allocation5 + $0x98] sm:$0xff]   ;;  %v2983_v19 = vld [vmem:[#allocation5 + $0xa0] sm:$0xff]   ;;  %v2986_v22 = vld [vmem:[#allocation5 + $0x28] sm:$0xff]   ;;  %s2563_s5 = sshll.u32 %s3938_s19, 7 }
  0xad   : > { %2597 = vmatpush3.bf16.msra.mxu1 %v2971_v7  ;;  %2570 = vmatprep.subr.bf16.mxu0 %v2972_v8  ;;  %v2987_v23 = vld [vmem:[#allocation5 + $0xa8] sm:$0xff]   ;;  %v2988_v24 = vld [vmem:[#allocation5 + $0x70] sm:$0xff]   ;;  %v2992_v29 = vld [vmem:[#allocation5 + $0x78] sm:$0xff]  }
  0xae   : > { %2598 = vmatprep.subr.bf16.mxu1 %v2973_v9  ;;  %v2989_v25 = vld [vmem:[#allocation5 + $0xf0] sm:$0xff]   ;;  %v2993_v30 = vld [vmem:[#allocation5 + $0xf8] sm:$0xff]   ;;  %v2997_v39 = vld [vmem:[#allocation5 + $0x100] sm:$0xff]  }
  0xaf   : > { %v2990_v27 = vld [vmem:[#allocation5 + $0x30] sm:$0xff]   ;;  %v2994_v32 = vld [vmem:[#allocation5 + $0x38] sm:$0xff]   ;;  %v2998_v60 = vld [vmem:[#allocation5 + $0x108] sm:$0xff]  }
  0xb0   : > { %2571 = vmatpush3.bf16.msra.mxu0 %v2974_v10  ;;  %v2991_v28 = vld [vmem:[#allocation5 + $0xb0] sm:$0xff]   ;;  %v2995_v33 = vld [vmem:[#allocation5 + $0xb8] sm:$0xff]   ;;  %v3001_v7 = vld [vmem:[#allocation5 + $0x120] sm:$0xff]  }
  0xb1   : > { %2599 = vmatpush3.bf16.msra.mxu1 %v2975_v11  ;;  %2572 = vmatprep.subr.bf16.mxu0 %v2976_v12  ;;  %v554_v34 = vld [vmem:[%s3654_s17] sm:$0xff]   ;;  %v3672_v35 = vld [vmem:[%s3654_s17 + $0x8] sm:$0xf]  ;;  %s3843_s17 = scalar_lea.hbm %s3943_s11, %s2563_s5 }
  0xb2   : > { %2600 = vmatprep.subr.bf16.mxu1 %v2977_v13  ;;  %v3674_v36 = vunpack.c.l.bf16 %v554_v34  ;;  %v578_v37 = vunpack.c.h.bf16 %v554_v34  ;;  %v3677_v38 = vunpack.c.l.bf16 %v3672_v35  ;;  %v2999_v0 = vld [vmem:[#allocation5 + $0x110] sm:$0xff]   ;;  %v3000_v4 = vld [vmem:[#allocation5 + $0x118] sm:$0xff]   ;;  %v3002_v8 = vld [vmem:[#allocation5 + $0x128] sm:$0xff]  }
  0xb3   : > { %v3003_v9 = vld [vmem:[#allocation5 + $0x130] sm:$0xff]   ;;  %v3004_v10 = vld [vmem:[#allocation5 + $0x138] sm:$0xff]   ;;  %v3005_v13 = vld [vmem:[#allocation7 + $0x40] sm:$0xff]  }
  0xb4   : > { %2573 = vmatpush3.bf16.msra.mxu0 %v2978_v14  ;;  %v587_v40 = vrot.slane %v3674_v36, 7  ;;  %v588_v41 = vrot.slane %v578_v37, 7  ;;  %v589_v42 = vrot.slane %v3677_v38, 7  ;;  %v594_v43 = vrot.slane %v3674_v36, 1  ;;  %v3006_v14 = vld [vmem:[#allocation7] sm:$0xff]   ;;  %v3019_v26 = vld [vmem:[#allocation7 + $0xd8] sm:$0xff]  }
  0xb5   : > { %2601 = vmatpush3.bf16.msra.mxu1 %v2979_v15  ;;  %2574 = vmatprep.subr.bf16.mxu0 %v2980_v16  ;;  %v595_v44 = vrot.slane %v578_v37, 1  ;;  %v596_v45 = vrot.slane %v3677_v38, 1  ;;  %v580_v46 = vrot.slane %v3674_v36, 6  ;;  %v581_v47 = vrot.slane %v578_v37, 6  ;;  %v3007_v15 = vld [vmem:[#allocation7 + $0xc0] sm:$0xff]   ;;  %v3085_v31 = vld [vmem:[#allocation8 + $0x138] sm:$0xff]  }
  0xb6   : > { %2602 = vmatprep.subr.bf16.mxu1 %v2981_v17  ;;  %v592_v48 = vsel %vm590_vm0, %v587_v40, %v588_v41  ;;  %v593_v49 = vsel %vm590_vm0, %v589_v42, %v587_v40  ;;  %v582_v50 = vrot.slane %v3677_v38, 6  ;;  %v591_v51 = vsel %vm590_vm0, %v588_v41, %v589_v42  ;;  %v3008_v16 = vld [vmem:[#allocation7 + $0x80] sm:$0xff]   ;;  %v3009_v17 = vld [vmem:[#allocation7 + $0x48] sm:$0xff]  }
  0xb7   : > { %v609_v52 = vpack.c.bf16 %v592_v48, %v593_v49  ;;  %v598_v53 = vsel %vm597_vm1, %v595_v44, %v596_v45  ;;  %v599_v54 = vsel %vm597_vm1, %v594_v43, %v595_v44  ;;  %v585_v55 = vsel %vm583_vm2, %v580_v46, %v581_v47  ;;  %v3026_v40 = vld [vmem:[#allocation7 + $0x28] sm:$0xff]   ;;  %v3036_v48 = vld [vmem:[#allocation7 + $0xf8] sm:$0xff]  }
  0xb8   : > { %2575 = vmatpush3.bf16.msra.mxu0 %v2982_v18  ;;  %v611_v56 = vpack.c.bf16 %v598_v53, %v599_v54  ;;  %v586_v57 = vsel %vm583_vm2, %v582_v50, %v580_v46  ;;  %v614_v58 = vpack.c.bf16 %v591_v51, %v591_v51  ;;  %v601_v61 = vrot.slane %v3674_v36, 2  ;;  %v3010_v18 = vld [vmem:[#allocation7 + $0x8] sm:$0xff]   ;;  %v3030_v46 = vld [vmem:[#allocation7 + $0x70] sm:$0xff]   ;;  %v3037_v49 = vld [vmem:[#allocation7 + $0xb8] sm:$0xff]  }
  0xb9   : > { %2603 = vmatpush3.bf16.msra.mxu1 %v2983_v19  ;;  %2576 = vmatprep.subr.bf16.mxu0 %v2984_v20  ;;  %v608_v59 = vpack.c.bf16 %v585_v55, %v586_v57  ;;  %v602_v62 = vrot.slane %v578_v37, 2  ;;  %v603_v63 = vrot.slane %v3677_v38, 2  ;;  %v584_v1 = vsel %vm583_vm2, %v581_v47, %v582_v50  ;;  %v3011_v19 = vld [vmem:[#allocation7 + $0xc8] sm:$0xff]   ;;  %v3031_v36 = vld [vmem:[#allocation7 + $0x30] sm:$0xff]  }
  0xba   : > { %2604 = vmatprep.subr.bf16.mxu1 %v2985_v21  ;;  %970 = vmatprep.mubr.bf16.mxu0 %v609_v52  ;;  %v613_v5 = vpack.c.bf16 %v584_v1, %v584_v1  ;;  %v3012_v20 = vld [vmem:[#allocation7 + $0x88] sm:$0xff]   ;;  %v3013_v21 = vld [vmem:[#allocation7 + $0x50] sm:$0xff]   ;;  %v600_v37 = vsel %vm597_vm1, %v596_v45, %v594_v43  ;;  %v2426_v42 = vcombine.low %v3672_v35, %v3672_v35  ;;  %v3034_v43 = vld [vmem:[#allocation7 + $0x78] sm:$0xff]  }
  0xbb   : > { %1018 = vmatprep.mubr.bf16.mxu1 %v611_v56  ;;  %v605_v2 = vsel %vm604_vm3, %v602_v62, %v603_v63  ;;  %v606_v3 = vsel %vm604_vm3, %v601_v61, %v602_v62  ;;  %v607_v11 = vsel %vm604_vm3, %v603_v63, %v601_v61  ;;  %v3027_v41 = vld [vmem:[#allocation7 + $0xe8] sm:$0xff]   ;;  %v3032_v47 = vld [vmem:[#allocation7 + $0xf0] sm:$0xff]   ;;  %v3035_v45 = vld [vmem:[#allocation7 + $0x38] sm:$0xff]  }
  0xbc   : > { %2577 = vmatpush3.bf16.msra.mxu0 %v2986_v22  ;;  %v612_v6 = vpack.c.bf16 %v605_v2, %v606_v3  ;;  %v617_v12 = vpack.c.bf16 %v607_v11, %v607_v11  ;;  %v3014_v22 = vld [vmem:[#allocation7 + $0x10] sm:$0xff]   ;;  %v3029_v44 = vld [vmem:[#allocation7 + $0xa8] sm:$0xff]   ;;  %v3038_v35 = vld [vmem:[#allocation7 + $0x100] sm:$0xff]   ;;  %v3336_v11 = vmov 0.0  }
  0xbd   : > { %2605 = vmatpush3.bf16.msra.mxu1 %v2987_v23  ;;  %2578 = vmatprep.subr.bf16.mxu0 %v2988_v24  ;;  %v3015_v23 = vld [vmem:[#allocation7 + $0xd0] sm:$0xff]  }
  0xbe   : > { %2606 = vmatprep.subr.bf16.mxu1 %v2989_v25  ;;  %v3016_v24 = vld [vmem:[#allocation7 + $0x90] sm:$0xff]   ;;  %v3017_v25 = vld [vmem:[#allocation7 + $0x58] sm:$0xff]  }
  0xbf   : > { %v3033_v38 = vld [vmem:[#allocation7 + $0xb0] sm:$0xff]  }
  0xc0   : > { %2579 = vmatpush3.bf16.msra.mxu0 %v2990_v27  ;;  %v3018_v27 = vld [vmem:[#allocation7 + $0x18] sm:$0xff]  }
  0xc1   : > { %2607 = vmatpush3.bf16.msra.mxu1 %v2991_v28  ;;  %2580 = vmatprep.subr.bf16.mxu0 %v2992_v29  ;;  %v3020_v28 = vld [vmem:[#allocation7 + $0x98] sm:$0xff]   ;;  %v3021_v29 = vld [vmem:[#allocation7 + $0x60] sm:$0xff]  }
  0xc2   : > { %2608 = vmatprep.subr.bf16.mxu1 %v2993_v30  ;;  %v3022_v30 = vld [vmem:[#allocation7 + $0x20] sm:$0xff]  }
  0xc4   : > { %2581 = vmatpush3.bf16.msra.mxu0 %v2994_v32  ;;  %v3023_v32 = vld [vmem:[#allocation7 + $0xe0] sm:$0xff]  }
  0xc5   : > { %2609 = vmatpush3.bf16.msra.mxu1 %v2995_v33  ;;  %2773 = vmatprep.subr.bf16.mxu0 %v2997_v39  ;;  %v3024_v33 = vld [vmem:[#allocation7 + $0xa0] sm:$0xff]  }
  0xc6   : > { %2632 = vmatprep.subr.bf16.mxu1 %v3005_v13  ;;  %v3735_v13 = vrot.slane %v3336_v11, 1 }
  0xc7   : > { %971 = vmatmul.mubr.bf16.vlgmr.msra.gmra.mrb[0].mxu0 %v608_v59 }
  0xc8   : > { %1019 = vmatmul.mubr.bf16.vlgmr.msra.gmra.mrb[0].mxu1 %v554_v34  ;;  %2774 = vmatpush3.bf16.msra.mxu0 %v2997_v39  ;;  %v3025_v34 = vld [vmem:[#allocation7 + $0x68] sm:$0xff]   ;;  %v616_v39 = vpack.c.bf16 %v600_v37, %v600_v37 }
  0xc9   : > { %978 = vmatprep.mubr.bf16.mxu0 %v614_v58  ;;  %2775 = vmatprep.subr.bf16.mxu0 %v2998_v60 }
  0xca   : > { %2633 = vmatpush3.bf16.msra.mxu1 %v3006_v14  ;;  %1026 = vmatprep.mubr.bf16.mxu1 %v616_v39  ;;  %v3738_v14 = vrot.slane %v3336_v11, 6 }
  0xcb   : > { %2634 = vmatprep.subr.bf16.mxu1 %v3009_v17 }
  0xcc   : > { %2776 = vmatpush3.bf16.msra.mxu0 %v2998_v60 }
  0xcd   : > { %2777 = vmatprep.subr.bf16.mxu0 %v2999_v0 }
  0xce   : > { %2635 = vmatpush3.bf16.msra.mxu1 %v3010_v18 }
  0xcf   : > { %979 = vmatmul.mubr.bf16.gmra.mrb[4].mxu0 %v613_v5  ;;  %2636 = vmatprep.subr.bf16.mxu1 %v3013_v21 }
  0xd0   : > { %2778 = vmatpush3.bf16.msra.mxu0 %v2999_v0  ;;  %2789 = vmatprep.mubr.bf16.mxu0 %v612_v6 }
  0xd1   : > { %2779 = vmatprep.subr.bf16.mxu0 %v3000_v4  ;;  %1027 = vmatmul.mubr.bf16.gmra.mrb[4].mxu1 %v2426_v42  ;;  %v3042_v42 = vld [vmem:[#allocation7 + $0x120] sm:$0xff]  }
  0xd2   : > { %2637 = vmatpush3.bf16.msra.mxu1 %v3014_v22 }
  0xd3   : > { %2638 = vmatprep.subr.bf16.mxu1 %v3017_v25 }
  0xd4   : > { %2780 = vmatpush3.bf16.msra.mxu0 %v3000_v4  ;;  %v2467_v4 = vld [vmem:[%s3894_s2] ss:$0 sm:$0xff] }
  0xd5   : > { %2781 = vmatprep.subr.bf16.mxu0 %v3001_v7 }
  0xd6   : > { %2639 = vmatpush3.bf16.msra.mxu1 %v3018_v27  ;;  %v3039_v27 = vld [vmem:[#allocation7 + $0x108] sm:$0xff]  }
  0xd7   : > { %2640 = vmatprep.subr.bf16.mxu1 %v3021_v29  ;;  %v3759_v29 = vrot.slane %v3336_v11, 2 }
  0xd8   : > { %2782 = vmatpush3.bf16.msra.mxu0 %v3001_v7  ;;  %v2468_v7 = vld [vmem:[%s3895_s3] ss:$0 sm:$0xff] }
  0xd9   : > { %2783 = vmatprep.subr.bf16.mxu0 %v3002_v8 }
  0xda   : > { %2641 = vmatpush3.bf16.msra.mxu1 %v3022_v30 }
  0xdb   : > { %2642 = vmatprep.subr.bf16.mxu1 %v3025_v34 }
  0xdc   : > { %2784 = vmatpush3.bf16.msra.mxu0 %v3002_v8 }
  0xdd   : > { %2785 = vmatprep.subr.bf16.mxu0 %v3003_v9 }
  0xde   : > { %2643 = vmatpush3.bf16.msra.mxu1 %v3026_v40  ;;  %v3041_v40 = vld [vmem:[#allocation7 + $0x118] sm:$0xff]  }
  0xdf   : > { %2644 = vmatprep.subr.bf16.mxu1 %v3030_v46  ;;  %v3044_v46 = vld [vmem:[#allocation7 + $0x130] sm:$0xff]  }
  0xe0   : > { %2786 = vmatpush3.bf16.msra.mxu0 %v3003_v9 }
  0xe1   : > { %2787 = vmatprep.subr.bf16.mxu0 %v3004_v10 }
  0xe2   : > { %2645 = vmatpush3.bf16.msra.mxu1 %v3031_v36  ;;  %v3045_v36 = vld [vmem:[#allocation7 + $0x138] sm:$0xff]  }
  0xe3   : > { %2646 = vmatprep.subr.bf16.mxu1 %v3034_v43 }
  0xe4   : > { %2788 = vmatpush3.bf16.msra.mxu0 %v3004_v10 }
  0xe5   : > { %2660 = vmatprep.subr.bf16.mxu0 %v3007_v15 }
  0xe6   : > { %2647 = vmatpush3.bf16.msra.mxu1 %v3035_v45 }
  0xe7   : > { %2790 = vmatmul.mubr.bf16.vlgmr.msra.gmra.mrb[8].mxu0 %v617_v12  ;;  %2793 = vmatprep.subr.bf16.mxu1 %v3038_v35  ;;  %v3732_v12 = vrot.slane %v3336_v11, 7 }
  0xe8   : > { %2661 = vmatpush3.bf16.msra.mxu0 %v3008_v16 }
  0xe9   : > { %2662 = vmatprep.subr.bf16.mxu0 %v3011_v19 }
  0xec   : > { %2663 = vmatpush3.bf16.msra.mxu0 %v3012_v20 }
  0xed   : > { %2664 = vmatprep.subr.bf16.mxu0 %v3015_v23 }
  0xf0   : > { %2665 = vmatpush3.bf16.msra.mxu0 %v3016_v24 }
  0xf1   : > { %2666 = vmatprep.subr.bf16.mxu0 %v3019_v26 }
  0xf4   : > { %2667 = vmatpush3.bf16.msra.mxu0 %v3020_v28 }
  0xf5   : > { %2668 = vmatprep.subr.bf16.mxu0 %v3023_v32  ;;  %v3040_v32 = vld [vmem:[#allocation7 + $0x110] sm:$0xff]  }
  0xf8   : > { %2669 = vmatpush3.bf16.msra.mxu0 %v3024_v33 }
  0xf9   : > { %2670 = vmatprep.subr.bf16.mxu0 %v3027_v41 }
  0xfc   : > { %2671 = vmatpush3.bf16.msra.mxu0 %v3029_v44  ;;  %v3043_v44 = vld [vmem:[#allocation7 + $0x128] sm:$0xff]  }
  0xfd   : > { %2672 = vmatprep.subr.bf16.mxu0 %v3032_v47  ;;  %v3772_v47 = vpack.c.bf16 %v3759_v29, %v3759_v29 }
 0x100   : > { %2673 = vmatpush3.bf16.msra.mxu0 %v3033_v38 }
 0x101   : > { %2674 = vmatprep.subr.bf16.mxu0 %v3036_v48 }
 0x104   : > { %2675 = vmatpush3.bf16.msra.mxu0 %v3037_v49  ;;  %v3046_v49 = vld [vmem:[#allocation8 + $0x40] sm:$0xff]  }
 0x105   : > { %2698 = vmatprep.subr.bf16.mxu0 %v3046_v49 }
 0x19a   : > { %v2582_v50 = vpop.f32.mrb[0].mxu0 }
 0x19b   : > { %v2610_v51 = vpop.f32.mrb[0].mxu1  ;;  %v2583_v52 = vpop.f32.mrb[1].mxu0  ;;  %v3048_v50 = vld [vmem:[#allocation8 + $0xc0] sm:$0xff]  }
 0x19c   : > { %v2611_v53 = vpop.f32.mrb[1].mxu1  ;;  %v2585_v54 = vpop.f32.mrb[2].mxu0  ;;  %v3049_v51 = vld [vmem:[#allocation8 + $0x80] sm:$0xff]   ;;  %v3050_v52 = vld [vmem:[#allocation8 + $0x48] sm:$0xff]  }
 0x19d   : > { %v2613_v55 = vpop.f32.mrb[2].mxu1  ;;  %v2586_v56 = vpop.f32.mrb[3].mxu0  ;;  %v3052_v53 = vld [vmem:[#allocation8 + $0xc8] sm:$0xff]  }
 0x19e   : > { %v2614_v57 = vpop.f32.mrb[3].mxu1  ;;  %v2587_v58 = vadd.f32 %v2586_v56, %v2585_v54  ;;  %v3051_v54 = vld [vmem:[#allocation8 + $0x8] sm:$0xff]   ;;  %v3054_v56 = vld [vmem:[#allocation8 + $0x50] sm:$0xff]  }
 0x19f   : > { %v2615_v59 = vadd.f32 %v2614_v57, %v2613_v55  ;;  %v3053_v55 = vld [vmem:[#allocation8 + $0x88] sm:$0xff]   ;;  %v3056_v57 = vld [vmem:[#allocation8 + $0xd0] sm:$0xff]  }
 0x1a1   : > { %v1024_v60 = vadd.f32 %v2615_v59, %v2587_v58  ;;  %v3055_v58 = vld [vmem:[#allocation8 + $0x10] sm:$0xff]  }
 0x1a2   : > { %v2588_v61 = vpop.f32.mrb[4].mxu0  ;;  %v3057_v59 = vld [vmem:[#allocation8 + $0x90] sm:$0xff]  }
 0x1a3   : > { %v2589_v62 = vpop.f32.mrb[5].mxu0  ;;  %v3060_v61 = vld [vmem:[#allocation8 + $0xd8] sm:$0xff]  }
 0x1a4   : > { %v2591_v63 = vpop.f32.mrb[6].mxu0  ;;  %v2616_v38 = vpop.f32.mrb[4].mxu1  ;;  %v3059_v62 = vld [vmem:[#allocation8 + $0x18] sm:$0xff]  }
 0x1a5   : > { %v2592_v0 = vpop.f32.mrb[7].mxu0  ;;  %v2617_v43 = vpop.f32.mrb[5].mxu1  ;;  %v3061_v63 = vld [vmem:[#allocation8 + $0x98] sm:$0xff]   ;;  %v2509_v38 = vld [vmem:[%s3936_s22] ss:$0 sm:$0xff] }
 0x1a6   : > { %v2619_v45 = vpop.f32.mrb[6].mxu1  ;;  %v3062_v0 = vld [vmem:[#allocation8 + $0x60] sm:$0xff]  }
 0x1a7   : > { %v2620_v48 = vpop.f32.mrb[7].mxu1 }
 0x1a8   : > { %v2510_v48 = vld [vmem:[%s3937_s25] ss:$0 sm:$0xff]  ;;  %s543_s25 = scalar_lea.vmem [#allocation11], %s2424_s18  ;;  %s3339_s18 = smov [#allocation11]  }
 0x1a9   : > { %s2275_s23 = sshll.u32 %s543_s25, 4  ;;  %s3241_s20 = sshll.u32 %s3339_s18, 4  ;;  %s3845_s23 = int_to_ptr.vmem [resolvable:$true] %s2275_s23  ;;  %s3242_s20 = int_to_ptr.vmem [resolvable:$false] %s3241_s20 }
 0x1aa   : > { %s3237_s19 = scalar_lea.vmem %s3845_s23, 128  ;;  %s3243_s12 = scalar_lea.vmem %s3242_s20, 256 }
 0x1ab   : > { %p3238_p8 = scmp.ne.s32.totalorder %s3845_s23, %s3237_s19  ;;  %p3244_p3 = scmp.lt.s32.totalorder %s3845_s23, %s3242_s20 }
 0x1ac   : > { %p3245_p7 = scmp.lt.s32.totalorder %s3243_s12, %s3237_s19 }
 0x1ad   : > { %p3239_p6 = pnand %p3238_p8, %p3594_p5 }
 0x1ae   : > { %p3246_p9 = por %p3245_p7, %p3244_p3 }
 0x1af   : > { %p3240_p10 = pneg %p3239_p6 }
 0x1b1   : > { %p3247_p0 = pnand %p3246_p9, %p3240_p10 }
 0x1ba   : > { %v2791_v1 = vpop.f32.mrb[8].mxu0 }
 0x1bb   : > { %v1068_v2 = vpop.f32.mrb[9].mxu0  ;;  %v3063_v1 = vld [vmem:[#allocation8 + $0x20] sm:$0xff]  }
 0x1bc   : > { %v2792_v3 = vpop.f32.mrb[10].mxu0  ;;  %v3064_v2 = vld [vmem:[#allocation8 + $0xe0] sm:$0xff]  }
 0x1bd   : > { %v1071_v5 = vpop.f32.mrb[11].mxu0  ;;  %v3065_v3 = vld [vmem:[#allocation8 + $0xa0] sm:$0xff]  }
 0x1be   : > { %v1072_v6 = vadd.f32 %v1071_v5, %v1024_v60  ;;  %v3058_v60 = vld [vmem:[#allocation8 + $0x58] sm:$0xff]   ;;  %v3777_v5 = vpack.c.bf16 %v3735_v13, %v3735_v13 }
 0x1c0   : > { %v1089_v8 = vmul.f32 %v2467_v4, %v1072_v6  ;;  %v3066_v4 = vld [vmem:[#allocation8 + $0x68] sm:$0xff]  }
 0x1c1   : > { %v3067_v6 = vld [vmem:[#allocation8 + $0x28] sm:$0xff]  }
 0x1c2   : > { %v1098_v9 = vadd.f32 %v2468_v7, %v1089_v8  ;;  %v3068_v7 = vld [vmem:[#allocation8 + $0xe8] sm:$0xff]  }
 0x1c3   : > { %v3069_v8 = vld [vmem:[#allocation8 + $0xa8] sm:$0xff]  }
 0x1c4   : > { %v1101_v10 = vmax.f32 %v1098_v9, 0.0  ;;  %v3337_v9 = vmov 0.0|0.0  }
 0x1c6   : > { %v1121_v15 = vrot.slane %v1101_v10, 7  ;;  %v1127_v16 = vrot.slane %v1101_v10, 1  ;;  %v1115_v17 = vrot.slane %v1101_v10, 6  ;;  %v1140_v26 = vpack.c.bf16 %v1101_v10, %v3336_v11 }
 0x1c7   : > { %v1133_v30 = vrot.slane %v1101_v10, 2  ;;  %v3070_v10 = vld [vmem:[#allocation8 + $0x70] sm:$0xff]  }
 0x1c8   : > { %v1124_v18 = vsel %vm590_vm0, %v3732_v12, %v1121_v15  ;;  %v1129_v19 = vsel %vm597_vm1, %v1127_v16, %v3735_v13  ;;  %v1130_v20 = vsel %vm597_vm1, %v3735_v13, %v1127_v16  ;;  %v1118_v21 = vsel %vm583_vm2, %v3738_v14, %v1115_v17  ;;  %v3072_v16 = vld [vmem:[#allocation8 + $0xf0] sm:$0xff]  }
 0x1c9   : > { %v1139_v22 = vpack.c.bf16 %v1124_v18, %v3732_v12  ;;  %v1141_v23 = vpack.c.bf16 %v1129_v19, %v1130_v20  ;;  %v1138_v24 = vpack.c.bf16 %v1118_v21, %v3738_v14  ;;  %v1123_v25 = vsel %vm590_vm0, %v1121_v15, %v3732_v12  ;;  %v3071_v15 = vld [vmem:[#allocation8 + $0x30] sm:$0xff]   ;;  %v3074_v18 = vld [vmem:[#allocation8 + $0x78] sm:$0xff]  }
 0x1ca   : > { %v1144_v28 = vpack.c.bf16 %v1123_v25, %v1123_v25  ;;  %v1117_v33 = vsel %vm583_vm2, %v1115_v17, %v3738_v14  ;;  %v1135_v34 = vsel %vm604_vm3, %v1133_v30, %v3759_v29  ;;  %v1136_v37 = vsel %vm604_vm3, %v3759_v29, %v1133_v30  ;;  %v3073_v17 = vld [vmem:[#allocation8 + $0xb0] sm:$0xff]   ;;  %v3075_v19 = vld [vmem:[#allocation8 + $0x38] sm:$0xff]  }
 0x1cb   : > { %1500 = vmatprep.mubr.bf16.mxu1 %v1139_v22  ;;  %1548 = vmatprep.mubr.bf16.mxu0 %v1141_v23  ;;  %v1143_v39 = vpack.c.bf16 %v1117_v33, %v1117_v33  ;;  %v1142_v41 = vpack.c.bf16 %v1135_v34, %v1136_v37  ;;  %v3076_v20 = vld [vmem:[#allocation8 + $0xf8] sm:$0xff]   ;;  %v3078_v22 = vld [vmem:[#allocation8 + $0x100] sm:$0xff]  }
 0x1cc   : > { %1501 = vmatmul.mubr.bf16.vlgmr.msra.gmra.mrb[8].mxu1 %v1138_v24  ;;  %1549 = vmatmul.mubr.bf16.vlgmr.msra.gmra.mrb[12].mxu0 %v1140_v26  ;;  %v3077_v21 = vld [vmem:[#allocation8 + $0xb8] sm:$0xff]  }
 0x1cd   : > { %2794 = vmatpush3.bf16.msra.mxu1 %v3038_v35  ;;  %1508 = vmatprep.mubr.bf16.mxu1 %v1144_v28  ;;  %v3047_v35 = vld [vmem:[#allocation8] sm:$0xff]  }
 0x1ce   : > { %2795 = vmatprep.subr.bf16.mxu1 %v3039_v27  ;;  %2699 = vmatpush3.bf16.msra.mxu0 %v3047_v35 }
 0x1cf   : > { %2700 = vmatprep.subr.bf16.mxu0 %v3050_v52  ;;  %1556 = vmatprep.mubr.bf16.mxu0 %v3777_v5 }
 0x1d1   : > { %2796 = vmatpush3.bf16.msra.mxu1 %v3039_v27 }
 0x1d2   : > { %2797 = vmatprep.subr.bf16.mxu1 %v3040_v32  ;;  %2701 = vmatpush3.bf16.msra.mxu0 %v3051_v54 }
 0x1d3   : > { %2702 = vmatprep.subr.bf16.mxu0 %v3054_v56 }
 0x1d4   : > { %1509 = vmatmul.mubr.bf16.gmra.mrb[12].mxu1 %v1143_v39  ;;  %1557 = vmatmul.mubr.bf16.gmra.mrb[16].mxu0 %v3337_v9 }
 0x1d5   : > { %2798 = vmatpush3.bf16.msra.mxu1 %v3040_v32  ;;  %2809 = vmatprep.mubr.bf16.mxu1 %v1142_v41 }
 0x1d6   : > { %2799 = vmatprep.subr.bf16.mxu1 %v3041_v40  ;;  %2703 = vmatpush3.bf16.msra.mxu0 %v3055_v58 }
 0x1d7   : > { %2704 = vmatprep.subr.bf16.mxu0 %v3058_v60 }
 0x1d9   : > { %2800 = vmatpush3.bf16.msra.mxu1 %v3041_v40 }
 0x1da   : > { %2801 = vmatprep.subr.bf16.mxu1 %v3042_v42  ;;  %2705 = vmatpush3.bf16.msra.mxu0 %v3059_v62 }
 0x1db   : > { %2706 = vmatprep.subr.bf16.mxu0 %v3062_v0 }
 0x1dd   : > { %2802 = vmatpush3.bf16.msra.mxu1 %v3042_v42 }
 0x1de   : > { %2803 = vmatprep.subr.bf16.mxu1 %v3043_v44  ;;  %2707 = vmatpush3.bf16.msra.mxu0 %v3063_v1  ;;  %v3080_v1 = vld [vmem:[#allocation8 + $0x110] sm:$0xff]  }
 0x1df   : > { %2708 = vmatprep.subr.bf16.mxu0 %v3066_v4 }
 0x1e1   : > { %2804 = vmatpush3.bf16.msra.mxu1 %v3043_v44 }
 0x1e2   : > { %2805 = vmatprep.subr.bf16.mxu1 %v3044_v46  ;;  %2709 = vmatpush3.bf16.msra.mxu0 %v3067_v6  ;;  %v3081_v6 = vld [vmem:[#allocation8 + $0x118] sm:$0xff]  }
 0x1e3   : > { %2710 = vmatprep.subr.bf16.mxu0 %v3070_v10 }
 0x1e5   : > { %2806 = vmatpush3.bf16.msra.mxu1 %v3044_v46 }
 0x1e6   : > { %2807 = vmatprep.subr.bf16.mxu1 %v3045_v36  ;;  %2711 = vmatpush3.bf16.msra.mxu0 %v3071_v15 }
 0x1e7   : > { %2712 = vmatprep.subr.bf16.mxu0 %v3074_v18  ;;  %v3088_v18 = vld [vmem:[#allocation10 + $0x10] sm:$0xff]  }
 0x1e9   : > { %2808 = vmatpush3.bf16.msra.mxu1 %v3045_v36 }
 0x1ea   : > { %2726 = vmatprep.subr.bf16.mxu1 %v3048_v50  ;;  %2713 = vmatpush3.bf16.msra.mxu0 %v3075_v19  ;;  %v3089_v19 = vld [vmem:[#allocation10 + $0x18] sm:$0xff]  }
 0x1eb   : > { %2813 = vmatprep.subr.bf16.mxu0 %v3078_v22 }
 0x1ec   : > { %2810 = vmatmul.mubr.bf16.vlgmr.msra.gmra.mrb[16].mxu1 %v3772_v47 }
 0x1ed   : > { %2727 = vmatpush3.bf16.msra.mxu1 %v3049_v51 }
 0x1ee   : > { %2728 = vmatprep.subr.bf16.mxu1 %v3052_v53 }
 0x1f1   : > { %2729 = vmatpush3.bf16.msra.mxu1 %v3053_v55 }
 0x1f2   : > { %2730 = vmatprep.subr.bf16.mxu1 %v3056_v57 }
 0x1f5   : > { %2731 = vmatpush3.bf16.msra.mxu1 %v3057_v59 }
 0x1f6   : > { %2732 = vmatprep.subr.bf16.mxu1 %v3060_v61 }
 0x1f9   : > { %2733 = vmatpush3.bf16.msra.mxu1 %v3061_v63  ;;  %v3079_v63 = vld [vmem:[#allocation8 + $0x108] sm:$0xff]  }
 0x1fa   : > { %2734 = vmatprep.subr.bf16.mxu1 %v3064_v2 }
 0x1fd   : > { %2735 = vmatpush3.bf16.msra.mxu1 %v3065_v3 }
 0x1fe   : > { %2736 = vmatprep.subr.bf16.mxu1 %v3068_v7 }
 0x201   : > { %2737 = vmatpush3.bf16.msra.mxu1 %v3069_v8  ;;  %v3084_v8 = vld [vmem:[#allocation8 + $0x130] sm:$0xff]  }
 0x202   : > { %2738 = vmatprep.subr.bf16.mxu1 %v3072_v16  ;;  %v3086_v16 = vld [vmem:[#allocation10] sm:$0xff]  }
 0x205   : > { %2739 = vmatpush3.bf16.msra.mxu1 %v3073_v17  ;;  %v3087_v17 = vld [vmem:[#allocation10 + $0x8] sm:$0xff]  }
 0x206   : > { %2740 = vmatprep.subr.bf16.mxu1 %v3076_v20  ;;  %v3090_v20 = vld [vmem:[#allocation10 + $0x20] sm:$0xff]  }
 0x209   : > { %2741 = vmatpush3.bf16.msra.mxu1 %v3077_v21  ;;  %v3092_v21 = vld [vmem:[#allocation10 + $0x30] sm:$0xff]  }
 0x20a   : > { %2833 = vmatprep.subr.bf16.mxu1 %v3336_v11 }
 0x29f   : > { %v2648_v23 = vpop.f32.mrb[8].mxu1  ;;  %v2676_v24 = vpop.f32.mrb[12].mxu0 }
 0x2a0   : > { %v2649_v25 = vpop.f32.mrb[9].mxu1  ;;  %v2677_v26 = vpop.f32.mrb[13].mxu0 }
 0x2a1   : > { %v2651_v27 = vpop.f32.mrb[10].mxu1  ;;  %v2679_v28 = vpop.f32.mrb[14].mxu0 }
 0x2a2   : > { %v2652_v30 = vpop.f32.mrb[11].mxu1  ;;  %v2680_v32 = vpop.f32.mrb[15].mxu0 }
 0x2a3   : > { %v2653_v33 = vadd.f32 %v2652_v30, %v2651_v27  ;;  %v2681_v34 = vadd.f32 %v2680_v32, %v2679_v28 }
 0x2a5   : > { %v1554_v37 = vadd.f32 %v2681_v34, %v2653_v33 }
 0x2a7   : > { %v2654_v39 = vpop.f32.mrb[12].mxu1 }
 0x2a8   : > { %v2655_v40 = vpop.f32.mrb[13].mxu1 }
 0x2a9   : > { %v2657_v41 = vpop.f32.mrb[14].mxu1 }
 0x2aa   : > { %v2658_v42 = vpop.f32.mrb[15].mxu1 }
 0x2bf   : > { %v2811_v44 = vpop.f32.mrb[16].mxu1 }
 0x2c0   : > { %v1598_v46 = vpop.f32.mrb[17].mxu1 }
 0x2c1   : > { %v2812_v36 = vpop.f32.mrb[18].mxu1 }
 0x2c2   : > { %v1601_v43 = vpop.f32.mrb[19].mxu1 }
 0x2c3   : > { %v1602_v45 = vadd.f32 %v1601_v43, %v1554_v37 }
 0x2c5   : > { %v1619_v49 = vmul.f32 %v2509_v38, %v1602_v45 }
 0x2c7   : > { %v1628_v35 = vadd.f32 %v2510_v48, %v1619_v49  ;;  %v2551_v48 = vld [vmem:[%s3939_s15] ss:$0 sm:$0xff] }
 0x2c9   : > { %v1631_v50 = vmax.f32 %v1628_v35, 0.0 }
 0x2cb   : > { %v1645_v51 = vrot.slane %v1631_v50, 7  ;;  %v1651_v52 = vrot.slane %v1631_v50, 1  ;;  %v1639_v53 = vrot.slane %v1631_v50, 6  ;;  %v1664_v62 = vpack.c.bf16 %v1631_v50, %v3336_v11 }
 0x2cd   : > { %v1648_v54 = vsel %vm590_vm0, %v3732_v12, %v1645_v51  ;;  %v1653_v55 = vsel %vm597_vm1, %v1651_v52, %v3735_v13  ;;  %v1654_v56 = vsel %vm597_vm1, %v3735_v13, %v1651_v52  ;;  %v1642_v57 = vsel %vm583_vm2, %v3738_v14, %v1639_v53 }
 0x2ce   : > { %v1663_v58 = vpack.c.bf16 %v1648_v54, %v3732_v12  ;;  %v1665_v59 = vpack.c.bf16 %v1653_v55, %v1654_v56  ;;  %v1662_v60 = vpack.c.bf16 %v1642_v57, %v3738_v14  ;;  %v1647_v61 = vsel %vm590_vm0, %v1645_v51, %v3732_v12  ;;  %v2553_v55 = vld [vmem:[%s3941_s13] ss:$0 sm:$0xff] }
 0x2cf   : > { %v1668_v0 = vpack.c.bf16 %v1647_v61, %v1647_v61  ;;  %v1657_v13 = vrot.slane %v1631_v50, 2  ;;  %v1641_v2 = vsel %vm583_vm2, %v1639_v53, %v3738_v14  ;;  %v3082_v14 = vld [vmem:[#allocation8 + $0x120] sm:$0xff]   ;;  %v2552_v50 = vld [vmem:[%s3940_s16] ss:$0 sm:$0xff]  ;;  %s2261_s16 = scalar_lea.sflag [#allocation4], %s3650_s28 }
 0x2d0   : > { %2024 = vmatprep.mubr.bf16.mxu0 %v1663_v58  ;;  %2070 = vmatprep.mubr.bf16.mxu1 %v1665_v59  ;;  %v1667_v4 = vpack.c.bf16 %v1641_v2, %v1641_v2  ;;  %v2257_v57 = vld [vmem:[%s3942_s14] sm:$0xff] }
 0x2d1   : > { %2025 = vmatmul.mubr.bf16.vlgmr.msra.gmra.mrb[20].mxu0 %v1662_v60  ;;  %2071 = vmatmul.mubr.bf16.vlgmr.msra.gmra.mrb[20].mxu1 %v1664_v62  ;;  %v1659_v12 = vsel %vm604_vm3, %v1657_v13, %v3759_v29  ;;  %v1660_v3 = vsel %vm604_vm3, %v3759_v29, %v1657_v13  ;;  %v2682_v29 = vpop.f32.mrb[16].mxu0 }
 0x2d2   : > { %2814 = vmatpush3.bf16.msra.mxu0 %v3078_v22  ;;  %2031 = vmatprep.mubr.bf16.mxu0 %v1668_v0  ;;  %v1666_v7 = vpack.c.bf16 %v1659_v12, %v1660_v3  ;;  %v3093_v22 = vld [vmem:[#allocation10 + $0x38] sm:$0xff]  }
 0x2d3   : > { %2815 = vmatprep.subr.bf16.mxu0 %v3079_v63  ;;  %2077 = vmatprep.mubr.bf16.mxu1 %v3777_v5  ;;  %v3083_v5 = vld [vmem:[#allocation8 + $0x128] sm:$0xff]  }
 0x2d4   : > { %2834 = vmatpush3.bf16.msra.mxu1 %v3086_v16 }
 0x2d5   : > { %2835 = vmatprep.subr.bf16.mxu1 %v3336_v11 }
 0x2d6   : > { %2816 = vmatpush3.bf16.msra.mxu0 %v3079_v63 }
 0x2d7   : > { %2817 = vmatprep.subr.bf16.mxu0 %v3080_v1 }
 0x2d8   : > { %2836 = vmatpush3.bf16.msra.mxu1 %v3087_v17 }
 0x2d9   : > { %2032 = vmatmul.mubr.bf16.gmra.mrb[24].mxu0 %v1667_v4  ;;  %2078 = vmatmul.mubr.bf16.gmra.mrb[24].mxu1 %v3337_v9  ;;  %v2683_v9 = vpop.f32.mrb[17].mxu0 }
 0x2da   : > { %2818 = vmatpush3.bf16.msra.mxu0 %v3080_v1  ;;  %2829 = vmatprep.mubr.bf16.mxu0 %v1666_v7  ;;  %v2685_v10 = vpop.f32.mrb[18].mxu0 }
 0x2db   : > { %2819 = vmatprep.subr.bf16.mxu0 %v3081_v6  ;;  %v2686_v15 = vpop.f32.mrb[19].mxu0  ;;  %2837 = vmatprep.subr.bf16.mxu1 %v3336_v11 }
 0x2dc   : > { %2838 = vmatpush3.bf16.msra.mxu1 %v3088_v18  ;;  %2849 = vmatprep.mubr.msk.bf16.mxu1 %vm3338_vm4, %v3336_v11 }
 0x2dd   : > { %2839 = vmatprep.subr.bf16.mxu1 %v3336_v11 }
 0x2de   : > { %2820 = vmatpush3.bf16.msra.mxu0 %v3081_v6 }
 0x2df   : > { %2821 = vmatprep.subr.bf16.mxu0 %v3082_v14 }
 0x2e0   : > { %2840 = vmatpush3.bf16.msra.mxu1 %v3089_v19 }
 0x2e1   : > { %2841 = vmatprep.subr.bf16.mxu1 %v3336_v11 }
 0x2e2   : > { %2822 = vmatpush3.bf16.msra.mxu0 %v3082_v14 }
 0x2e3   : > { %2823 = vmatprep.subr.bf16.mxu0 %v3083_v5 }
 0x2e4   : > { %2842 = vmatpush3.bf16.msra.mxu1 %v3090_v20 }
 0x2e5   : > { %2843 = vmatprep.subr.bf16.mxu1 %v3336_v11 }
 0x2e6   : > { %2824 = vmatpush3.bf16.msra.mxu0 %v3083_v5 }
 0x2e7   : > { %2825 = vmatprep.subr.bf16.mxu0 %v3084_v8 }
 0x2ea   : > { %2826 = vmatpush3.bf16.msra.mxu0 %v3084_v8 }
 0x2eb   : > { %2827 = vmatprep.subr.bf16.mxu0 %v3085_v31 }
 0x2ee   : > { %2828 = vmatpush3.bf16.msra.mxu0 %v3085_v31 }
 0x2f1   : > { %2830 = vmatmul.mubr.bf16.vlgmr.msra.gmra.mrb[28].mxu0 %v3772_v47  ;;  %v3091_v47 = vld [vmem:[#allocation10 + $0x28] sm:$0xff]  }
 0x2f2   : > { %2844 = vmatpush3.bf16.msra.mxu1 %v3091_v47 }
 0x2f3   : > { %2845 = vmatprep.subr.bf16.mxu1 %v3336_v11 }
 0x2f6   : > { %2846 = vmatpush3.bf16.msra.mxu1 %v3092_v21 }
 0x2f7   : > { %2847 = vmatprep.subr.bf16.mxu1 %v3336_v11 }
 0x2fa   : > { %2848 = vmatpush3.bf16.msra.mxu1 %v3093_v22 }
 0x3a4   : > { %v2714_v23 = vpop.f32.mrb[20].mxu0  ;;  %v2742_v24 = vpop.f32.mrb[20].mxu1 }
 0x3a5   : > { %v2715_v25 = vpop.f32.mrb[21].mxu0  ;;  %v2743_v26 = vpop.f32.mrb[21].mxu1 }
 0x3a6   : > { %v2717_v27 = vpop.f32.mrb[22].mxu0  ;;  %v2745_v28 = vpop.f32.mrb[22].mxu1 }
 0x3a7   : > { %v2718_v30 = vpop.f32.mrb[23].mxu0  ;;  %v2746_v32 = vpop.f32.mrb[23].mxu1 }
 0x3a8   : > { %v2719_v33 = vadd.f32 %v2718_v30, %v2717_v27  ;;  %v2747_v34 = vadd.f32 %v2746_v32, %v2745_v28 }
 0x3aa   : > { %v2075_v37 = vadd.f32 %v2747_v34, %v2719_v33 }
 0x3ac   : > { %v2720_v39 = vpop.f32.mrb[24].mxu0  ;;  %v2748_v40 = vpop.f32.mrb[24].mxu1 }
 0x3ad   : > { %v2721_v41 = vpop.f32.mrb[25].mxu0  ;;  %v2749_v42 = vpop.f32.mrb[25].mxu1 }
 0x3ae   : > { %v2723_v44 = vpop.f32.mrb[26].mxu0  ;;  %v2751_v46 = vpop.f32.mrb[26].mxu1 }
 0x3af   : > { %v2724_v36 = vpop.f32.mrb[27].mxu0  ;;  %v2752_v11 = vpop.f32.mrb[27].mxu1 }
 0x3c4   : > { %v2831_v38 = vpop.f32.mrb[28].mxu0 }
 0x3c5   : > { %v2118_v43 = vpop.f32.mrb[29].mxu0 }
 0x3c6   : > { %v2832_v45 = vpop.f32.mrb[30].mxu0 }
 0x3c7   : > { %v2120_v49 = vpop.f32.mrb[31].mxu0 }
 0x3c8   : > { %v2121_v35 = vadd.f32 %v2120_v49, %v2075_v37 }
 0x3ca   : > { %v2136_v51 = vmul.f32 %v2551_v48, %v2121_v35 }
 0x3cc   : > { %v2143_v52 = vadd.f32 %v2552_v50, %v2136_v51 }
 0x3ce   : > { %v2144_v53 = vmax.f32 %v2143_v52, 0.0 }
 0x3d0   : > { %v2145_v54 = vpack.c.bf16 %v2144_v53, %v2144_v53 }
 0x3d2   : > { %2850 = vmatmul.mubr.bf16.vlgmr.msra.gmra.mrb[28].mxu1 %v2145_v54 }
 0x4a5   : > { %v2251_v56 = vpop.f32.mrb[28].mxu1 }
 0x4a6   : > { %v2252_v58 = vadd.f32 %v2553_v55, %v2251_v56  ;;  %v2851_v59 = vpop.f32.mrb[29].mxu1 }
 0x4a7   : > { %v2254_v60 = vpop.f32.mrb[30].mxu1 }
 0x4a8   : > { %v2258_v61 = vadd.f32 %v2257_v57, %v2252_v58  ;;  %v2852_v62 = vpop.f32.mrb[31].mxu1 }
 0x4aa   : > { %2259 = vst [vmem:[%s543_s25] sm:$0xff] %v2258_v61 }
 0x4ab   : > { %3250 = shalt.err (!%p3247_p0)
}
 0x4ac   : > { %s3251_s28 = scalar_lea.hbm %s3843_s17, 128  ;;  %s3255_s22 = scalar_lea.hbm %s3943_s11, 256 }
 0x4ad   : > { %p3252_p4 = scmp.ne.s32.totalorder %s3843_s17, %s3251_s28  ;;  %p3256_p12 = scmp.lt.u32.totalorder %s3843_s17, %s3943_s11 }
 0x4ae   : > { %p3257_p1 = scmp.lt.u32.totalorder %s3255_s22, %s3251_s28  ;;  %p3259_p8 = scmp.lt.u32.totalorder %s3251_s28, %s3843_s17 }
 0x4af   : > { %p3253_p13 = pnand %p3252_p4, %p3594_p5 }
 0x4b0   : > { %p3258_p11 = por %p3257_p1, %p3256_p12 }
 0x4b1   : > { %p3254_p2 = pneg %p3253_p13 }
 0x4b2   : > { %p3260_p6 = por %p3259_p8, %p3258_p11 }
 0x4b4   : > { %p3261_p10 = pnand %p3260_p6, %p3254_p2 }
 0x4b6   : > { %3264 = shalt.err (!%p3261_p10)
}
 0x4b7   : > { %2874 = dma.vmem_to_hbm [thread:$0]  (%p3594_p5), %s3845_s23, 128, %s3843_s17, %s2261_s16  }
 0x4b8 PF: > { %s3944_s25 = sld [smem:[#allocation16_spill]]  ;;  %s3945_s8 = sld [smem:[#allocation18_spill]] }
 0x4b9   : > { %p3947_p7 = scmp.ge.s32.totalorder %s3327_s30, 2 }
 0x4be   : > { %s2287_s15 = sand.u32 1, %s3944_s25   ;;  %p3946_p3 = scmp.ne.s32.totalorder %s3945_s8, 0 }
 0x4bf   : > { %s2288_s19 = scalar_lea.sflag [#allocation4], %s2287_s15 }
 0x4c0   : > { %p2894_p9 = pnand %p3947_p7, %p3946_p3 }
 0x4c2   : > { %3302 = dma.done.wait (!%p2894_p9), %s2288_s19, 128  }
 0x4c3   : > { %3304 = vsyncadd (!%p2894_p9), %s2288_s19, 4294967168  ;;  %s31_s30 = sadd.s32 1, %s3327_s30   ;;  %s3948_s25 = smov %s3311_s26 }
 0x4c4   : > { %p28_p0 = scmp.ge.s32.totalorder %s31_s30, 4   ;;  %s3949_s26 = smov %s3315_s27 }
 0x4c5   : > { %s3950_s27 = smov %s3606_s24  ;;  %s3951_s28 = smov %s3323_s29 }
 0x4c6   : > { %s3952_s29 = smov %s3954_s9  ;;  %30 = sbr.rel (!%p28_p0) target bundleno = 16 (0x10), region = 137 }
 0x4cd   :  { %2293 = vsyncpa [#allocation3], 1 }
 0x4ce   :  { %2295 = vsyncpa [#allocation3 + $0x1], 1 }
 0x4cf   :  { %2296 = vsyncpa [#allocation6], 1 }
 0x4d0   :  { %2297 = vsyncpa [#allocation9], 1 }
 0x4d1   :  { %2298 = vsyncpa [#allocation4], 1 }
 0x4d2   :  { %2300 = vsyncpa [#allocation4 + $0x1], 1 }

// kernel: tpu_custom_call.1
= control target key start
LH: loop header
LB: loop body
LE: loop exit
PB: predicated region body
PF: predicated region fallthrough
CT: control target
= control target key end

     0   :  { %s3892_s0 = inlined_call_operand.hbm [shape: bf16[2,24,128], index: 0, kind: input, shape index: {}]   ;;  %s3893_s1 = inlined_call_operand.hbm [shape: bf16[640,128], index: 1, kind: input, shape index: {}]   ;;  %s3894_s2 = inlined_call_operand.vmem [shape: f32[1,128], index: 2, kind: input, shape index: {}]   ;;  %s3895_s3 = inlined_call_operand.vmem [shape: f32[1,128], index: 3, kind: input, shape index: {}]   ;;  %s3896_s4 = inlined_call_operand.hbm [shape: bf16[640,128], index: 4, kind: input, shape index: {}]   ;;  %s3897_s5 = inlined_call_operand.vmem [shape: f32[1,128], index: 5, kind: input, shape index: {}]   ;;  %s3898_s6 = inlined_call_operand.vmem [shape: f32[1,128], index: 6, kind: input, shape index: {}]   ;;  %s3899_s7 = inlined_call_operand.hbm [shape: bf16[640,128], index: 7, kind: input, shape index: {}]   ;;  %s3900_s8 = inlined_call_operand.vmem [shape: f32[1,128], index: 8, kind: input, shape index: {}]   ;;  %s3901_s9 = inlined_call_operand.vmem [shape: f32[1,128], index: 9, kind: input, shape index: {}]   ;;  %s3902_s10 = inlined_call_operand.hbm [shape: bf16[128,128], index: 10, kind: input, shape index: {}]   ;;  %s3903_s11 = inlined_call_operand.vmem [shape: f32[1,128], index: 11, kind: input, shape index: {}]   ;;  %s3904_s12 = inlined_call_operand.vmem [shape: f32[1,8,128], index: 12, kind: input, shape index: {}]   ;;  %s3905_s13 = inlined_call_operand.hbm [shape: f32[2,8,128], index: 13, kind: output, shape index: {}]  }
   0x1   :  { %3913 = sst [smem:[#allocation19_spill]] %s3897_s5 }
   0x2   :  { %3914 = sst [smem:[#allocation20_spill]] %s3898_s6 }
   0x3   :  { %3915 = sst [smem:[#allocation21_spill]] %s3900_s8 }
   0x4   :  { %3916 = sst [smem:[#allocation22_spill]] %s3901_s9 }
   0x5   :  { %3917 = sst [smem:[#allocation23_spill]] %s3903_s11 }
   0x6   :  { %3918 = sst [smem:[#allocation24_spill]] %s3904_s12 }
   0x7   :  { %3919 = sst [smem:[#allocation25_spill]] %s3905_s13 }
   0x8   :  { %18 = vsyncpa [#allocation3], 0 }
   0x9   :  { %20 = vsyncpa [#allocation3 + $0x1], 0 }
   0xa   :  { %21 = vsyncpa [#allocation6], 0 }
   0xb   :  { %22 = vsyncpa [#allocation9], 0 }
   0xc   :  { %23 = vsyncpa [#allocation4], 0 }
   0xd   :  { %25 = vsyncpa [#allocation4 + $0x1], 0  ;;  %s3410_s25 = smov 0   ;;  %s3412_s26 = smov 0  }
   0xe   :  { %s3414_s27 = smov 0   ;;  %s3416_s28 = smov 0  }
   0xf   :  { %s3418_s29 = smov 0   ;;  %s3420_s30 = smov 0  }
  0x10 LB: > { %3920 = sst [smem:[#allocation16_spill]] %s3307_s25  ;;  %s2409_s14 = sadd.s32 4294967295, %s3327_s30   ;;  %s3327_s30 = sphi %s3420_s30, %s31_s30   ;;  %s3323_s29 = sphi %s3418_s29, %s3952_s29   ;;  %s3319_s28 = sphi %s3416_s28, %s3951_s28   ;;  %s3315_s27 = sphi %s3414_s27, %s3950_s27   ;;  %s3311_s26 = sphi %s3412_s26, %s3949_s26   ;;  %s3307_s25 = sphi %s3410_s25, %s3948_s25  }
  0x11   : > { %3921 = sst [smem:[#allocation17_spill]] %s3319_s28  ;;  %s2410_s15 = sadd.s32 4294967294, %s3327_s30  }
  0x12   : > { %p63_p0 = scmp.ne.s32.totalorder %s3311_s26, %s3307_s25  ;;  %p3444_p1 = scmp.eq.s32.totalorder %s2409_s14, 0 }
  0x13   : > { %p3448_p2 = scmp.eq.s32.totalorder %s2409_s14, 1  ;;  %p352_p3 = scmp.eq.s32.totalorder %s2410_s15, 1 }
  0x14   : > { %s3922_s16 = scalar_select %p3444_p1, 1, 0 }
  0x15   : > { %s3923_s17 = scalar_select %p3448_p2, 1, 0 }
  0x16   : > { %p3454_p4 = por %p3444_p1, %p63_p0  ;;  %p2411_p5 = scmp.ge.s32.totalorder %s3327_s30, 1 }
  0x17   : > { %p3459_p6 = por %p352_p3, %p63_p0  ;;  %p359_p7 = scmp.lt.s32.totalorder %s3327_s30, 3 }
  0x18   : > { %s3924_s18 = scalar_select %p3454_p4, 1, 0 }
  0x19   : > { %s3925_s19 = scalar_select %p3459_p6, 1, 0 }
  0x1a   : > { %p3464_p8 = pnand %p2411_p5, %p359_p7  ;;  %s3329_s21 = smov [#allocation5]  }
  0x1b   : > { %3926 = sst [smem:[#allocation18_spill]] %s3925_s19  ;;  %s371_s22 = sshll.u32 %s3329_s21, 4  ;;  %s3468_s22 = int_to_ptr.vmem [resolvable:$true] %s371_s22 }
  0x1c   : > { %s3927_s20 = scalar_select %p3464_p8, 1, 0 }
  0x1d   : > { %p2876_p9 = pneg %p3464_p8  ;;  %s3330_s24 = smov [#allocation8]  }
  0x1e   : > { %s409_s14 = sshll.u32 %s3330_s24, 4  ;;  %s3331_s15 = smov [#allocation7]   ;;  %s3479_s14 = int_to_ptr.vmem [resolvable:$true] %s409_s14 }
  0x1f   : > { %p3475_p11 = pnand %p2876_p9, %p3444_p1  ;;  %s3481_s19 = sshll.u32 %s3331_s15, 4  ;;  %s391_s19 = int_to_ptr.vmem [resolvable:$true] %s3481_s19 }
  0x20   : > { %s3095_s13 = scalar_lea.hbm %s3893_s1, 5120 }
  0x21   : > { %p3096_p12 = scmp.ne.s32.totalorder %s3893_s1, %s3095_s13  ;;  %p3491_p13 = pneg %p3475_p11 }
  0x22   : > { %p3102_p5 = scmp.lt.u32.totalorder %s3095_s13, %s3893_s1 }
  0x23   : > { %p3098_p0 = pnand %p3491_p13, %p3096_p12 }
  0x25   : > { %p3099_p3 = pneg %p3098_p0 }
  0x27   : > { %p3104_p7 = pnand %p3102_p5, %p3099_p3 }
  0x29   : > { %3107 = shalt.err (!%p3104_p7)
}
  0x2a   : > { %s3108_s11 = scalar_lea.vmem %s3468_s22, 5120  ;;  %p3116_p1 = scmp.lt.s32.totalorder %s3468_s22, %s3468_s22 }
  0x2b   : > { %p3109_p9 = scmp.ne.s32.totalorder %s3468_s22, %s3108_s11  ;;  %p3117_p4 = scmp.lt.s32.totalorder %s3108_s11, %s3108_s11 }
  0x2d   : > { %p3111_p10 = pnand %p3109_p9, %p3491_p13  ;;  %p3118_p12 = por %p3117_p4, %p3116_p1 }
  0x2f   : > { %p3112_p6 = pneg %p3111_p10 }
  0x31   : > { %p3119_p0 = pnand %p3118_p12, %p3112_p6 }
  0x33   : > { %3122 = shalt.err (!%p3119_p0)
}
  0x34   : > { %s3332_s12 = smov 64   ;;  %s3333_s13 = smov 4  }
  0x35   : > { %2879 = dma.hbm_to_vmem [thread:$0]  (!%p3475_p11), %s3893_s1, 5120, %s3468_s22, [#allocation6], %s3332_s12, %s3332_s12, %s3333_s13  }
  0x36   : > { %s3123_s11 = scalar_lea.hbm %s3899_s7, 5120 }
  0x37   : > { %p3124_p1 = scmp.ne.s32.totalorder %s3899_s7, %s3123_s11  ;;  %p3130_p10 = scmp.lt.u32.totalorder %s3123_s11, %s3899_s7 }
  0x39   : > { %p3126_p4 = pnand %p3124_p1, %p3491_p13 }
  0x3b   : > { %p3127_p6 = pneg %p3126_p4 }
  0x3d   : > { %p3132_p3 = pnand %p3130_p10, %p3127_p6 }
  0x3f   : > { %3135 = shalt.err (!%p3132_p3)
}
  0x40   : > { %s3136_s22 = scalar_lea.vmem %s3479_s14, 5120  ;;  %p3144_p12 = scmp.lt.s32.totalorder %s3479_s14, %s3479_s14 }
  0x41   : > { %p3137_p5 = scmp.ne.s32.totalorder %s3479_s14, %s3136_s22  ;;  %p3145_p0 = scmp.lt.s32.totalorder %s3136_s22, %s3136_s22 }
  0x43   : > { %p3139_p7 = pnand %p3137_p5, %p3491_p13  ;;  %p3146_p1 = por %p3145_p0, %p3144_p12 }
  0x45   : > { %p3140_p9 = pneg %p3139_p7 }
  0x47   : > { %p3147_p4 = pnand %p3146_p1, %p3140_p9 }
  0x49   : > { %3150 = shalt.err (!%p3147_p4)
}
  0x4a   : > { %2885 = dma.hbm_to_vmem [thread:$0]  (!%p3475_p11), %s3899_s7, 5120, %s3479_s14, [#allocation9], %s3332_s12, %s3332_s12, %s3333_s13  }
  0x4b   : > { %s3151_s25 = scalar_lea.hbm %s3896_s4, 5120 }
  0x4c   : > { %p3152_p6 = scmp.ne.s32.totalorder %s3896_s4, %s3151_s25  ;;  %p3158_p5 = scmp.lt.u32.totalorder %s3151_s25, %s3896_s4 }
  0x4e   : > { %p3154_p10 = pnand %p3152_p6, %p3491_p13 }
  0x50   : > { %p3155_p3 = pneg %p3154_p10 }
  0x52   : > { %p3160_p7 = pnand %p3158_p5, %p3155_p3 }
  0x54   : > { %3163 = shalt.err (!%p3160_p7)
}
  0x55   : > { %s3164_s22 = scalar_lea.vmem %s391_s19, 5120  ;;  %p3172_p1 = scmp.lt.s32.totalorder %s391_s19, %s391_s19 }
  0x56   : > { %p3165_p9 = scmp.ne.s32.totalorder %s391_s19, %s3164_s22  ;;  %p3173_p4 = scmp.lt.s32.totalorder %s3164_s22, %s3164_s22 }
  0x58   : > { %p3167_p12 = pnand %p3165_p9, %p3491_p13  ;;  %p3174_p8 = por %p3173_p4, %p3172_p1 }
  0x5a   : > { %p3168_p0 = pneg %p3167_p12 }
  0x5c   : > { %p3175_p2 = pnand %p3174_p8, %p3168_p0 }
  0x5e   : > { %3178 = shalt.err (!%p3175_p2)
}
  0x5f   : > { %2882 = dma.hbm_to_vmem [thread:$0]  (!%p3475_p11), %s3896_s4, 5120, %s391_s19, [#allocation6], %s3332_s12, %s3332_s12, %s3333_s13  }
  0x60   : > { %s3334_s6 = smov [#allocation10]   ;;  %s3179_s21 = scalar_lea.hbm %s3902_s10, 1024 }
  0x61   : > { %s428_s8 = sshll.u32 %s3334_s6, 4  ;;  %p3180_p2 = scmp.ne.s32.totalorder %s3902_s10, %s3179_s21  ;;  %s429_s8 = int_to_ptr.vmem [resolvable:$true] %s428_s8 }
  0x62   : > { %p3186_p10 = scmp.lt.u32.totalorder %s3179_s21, %s3902_s10 }
  0x63   : > { %p3182_p8 = pnand %p3180_p2, %p3491_p13 }
  0x65   : > { %p3183_p6 = pneg %p3182_p8 }
  0x67   : > { %p3188_p3 = pnand %p3186_p10, %p3183_p6 }
  0x69   : > { %3191 = shalt.err (!%p3188_p3)
}
  0x6a   : > { %s3192_s19 = scalar_lea.vmem %s429_s8, 1024  ;;  %p3200_p12 = scmp.lt.s32.totalorder %s429_s8, %s429_s8 }
  0x6b   : > { %p3193_p5 = scmp.ne.s32.totalorder %s429_s8, %s3192_s19  ;;  %p3201_p0 = scmp.lt.s32.totalorder %s3192_s19, %s3192_s19 }
  0x6d   : > { %p3195_p7 = pnand %p3193_p5, %p3491_p13  ;;  %p3202_p1 = por %p3201_p0, %p3200_p12 }
  0x6f   : > { %p3196_p9 = pneg %p3195_p7 }
  0x71   : > { %p3203_p4 = pnand %p3202_p1, %p3196_p9 }
  0x73   : > { %3206 = shalt.err (!%p3203_p4)
}
  0x74   : > { %2888 = dma.hbm_to_vmem [thread:$0]  (!%p3475_p11), %s3902_s10, 1024, %s429_s8, [#allocation9], %s3332_s12, %s3332_s12, %s3333_s13  }
  0x75   : > { %s43_s9 = sadd.s32 1, %s3323_s29  ;;  %s50_s23 = sadd.s32 1, %s3315_s27 }
  0x76   : > { %p45_p13 = scmp.ge.s32.totalorder %s43_s9, 2  ;;  %p57_p2 = scmp.ne.s32.totalorder %s3315_s27, %s3311_s26 }
  0x77   : > { %p58_p8 = scmp.eq.s32.totalorder %s3327_s30, 0  ;;  %p2901_p6 = scmp.lt.s32.totalorder %s3327_s30, 2 }
  0x78   : > { %s3954_s9 = smov (%p45_p13, %s43_s9), 0  ;;  %p3930_p3 = scmp.ne.s32.totalorder %s3923_s17, 0 }
  0x79   : > { %p59_p10 = por %p58_p8, %p57_p2  ;;  %s47_s28 = ssub.s32 %s3323_s29, %s3954_s9 }
  0x7a   : > { %p3594_p5 = por %p3930_p3, %p57_p2  ;;  %s452_s25 = sand.u32 1, %s3315_s27  }
  0x7b   : > { %p48_p7 = scmp.eq.s32.totalorder %s47_s28, 0  ;;  %s2853_s8 = smul.u32 12, %s452_s25 }
  0x7c   : > { %p3601_p11 = pnand %p2901_p6, %p59_p10  ;;  %s2854_s15 = smul.u32 192, %s3323_s29 }
  0x7d   : > { %s3606_s24 = scalar_select %p48_p7, %s3315_s27, %s50_s23  }
  0x7e   : > { %s456_s11 = scalar_lea.vmem [#allocation2], %s2853_s8  ;;  %s3612_s14 = scalar_lea.hbm %s3892_s0, %s2854_s15 }
  0x7f   : > { %s463_s22 = sshll.u32 %s456_s11, 4  ;;  %s3616_s5 = scalar_lea.sflag [#allocation3], %s452_s25  ;;  %s3614_s22 = int_to_ptr.vmem [resolvable:$true] %s463_s22 }
  0x80   : > { %s3207_s28 = scalar_lea.hbm %s3612_s14, 192  ;;  %p3209_p12 = pneg %p3601_p11 }
  0x81   : > { %p3208_p9 = scmp.ne.s32.totalorder %s3612_s14, %s3207_s28  ;;  %s3212_s15 = scalar_lea.hbm %s3892_s0, 384 }
  0x82   : > { %p3213_p4 = scmp.lt.u32.totalorder %s3612_s14, %s3892_s0  ;;  %p3214_p13 = scmp.lt.u32.totalorder %s3212_s15, %s3207_s28 }
  0x83   : > { %p3210_p0 = pnand %p3209_p12, %p3208_p9  ;;  %p3216_p8 = scmp.lt.u32.totalorder %s3207_s28, %s3612_s14 }
  0x84   : > { %p3215_p2 = por %p3214_p13, %p3213_p4 }
  0x85   : > { %p3211_p1 = pneg %p3210_p0 }
  0x86   : > { %p3217_p6 = por %p3216_p8, %p3215_p2 }
  0x88   : > { %p3218_p10 = pnand %p3217_p6, %p3211_p1 }
  0x8a   : > { %3221 = shalt.err (!%p3218_p10)
}
  0x8b   : > { %s3222_s25 = scalar_lea.vmem %s3614_s22, 192  ;;  %s3335_s19 = smov [#allocation2]  }
  0x8c   : > { %p3223_p3 = scmp.ne.s32.totalorder %s3614_s22, %s3222_s25  ;;  %s3227_s23 = sshll.u32 %s3335_s19, 4  ;;  %s3228_s23 = int_to_ptr.vmem [resolvable:$false] %s3227_s23 }
  0x8d   : > { %s3229_s8 = scalar_lea.vmem %s3228_s23, 384  ;;  %p3230_p0 = scmp.lt.s32.totalorder %s3614_s22, %s3228_s23 }
  0x8e   : > { %p3225_p7 = pnand %p3223_p3, %p3209_p12  ;;  %p3231_p4 = scmp.lt.s32.totalorder %s3229_s8, %s3222_s25 }
  0x90   : > { %p3226_p9 = pneg %p3225_p7  ;;  %p3232_p13 = por %p3231_p4, %p3230_p0 }
  0x92   : > { %p3233_p2 = pnand %p3232_p13, %p3226_p9 }
  0x94   : > { %3236 = shalt.err (!%p3233_p2)
}
  0x95   : > { %2892 = dma.hbm_to_vmem [thread:$0]  (!%p3601_p11), %s3612_s14, 192, %s3614_s22, %s3616_s5, %s3332_s12, %s3332_s12, %s3333_s13  }
  0x96   : > { %p3933_p12 = scmp.ne.s32.totalorder %s3927_s20, 0 }
  0x97   : > { %s3650_s28 = sand.u32 (!%p3933_p12), 1, %s3311_s26   ;;  %p3934_p1 = scmp.ne.s32.totalorder (!%p3933_p12), %s3924_s18, 0 }
  0x98   : > { %475 = sbr.rel (%p3933_p12) target bundleno = 1208 (0x4b8), region = 72  ;;  %s478_s11 = scalar_lea.sflag (!%p3933_p12), [#allocation3], %s3650_s28 }
  0x99   : > { %s2855_s15 = smul.u32 (!%p3933_p12), 12, %s3650_s28 }
  0x9b   : > { %s3654_s17 = scalar_lea.vmem (!%p3933_p12), [#allocation2], %s2855_s15 }
  0x9f   : > { %3290 = dma.done.wait (%p3934_p1), %s478_s11, 192  }
  0xa0   : > { %3292 = vsyncadd (%p3934_p1), %s478_s11, 4294967104  ;;  %p3935_p11 = scmp.ne.s32.totalorder %s3922_s16, 0 }
  0xa2   : > { %3294 = dma.done.wait (%p3935_p11), [#allocation6], 10240  }
  0xa3   : > { %3296 = vsyncadd (%p3935_p11), [#allocation6], 4294957056 }
  0xa4   : > { %3298 = dma.done.wait (%p3935_p11), [#allocation9], 6144  }
  0xa5   : > { %3300 = vsyncadd (%p3935_p11), [#allocation9], 4294961152  ;;  %v2964_v0 = vld [vmem:[#allocation5 + $0x40] sm:$0xff]   ;;  %v2968_v4 = vld [vmem:[#allocation5 + $0x48] sm:$0xff]   ;;  %v557_v26 = vlaneseq  ;;  %s3936_s22 = sld [smem:[#allocation19_spill]]  ;;  %s3937_s25 = sld [smem:[#allocation20_spill]] }
  0xa6   : > { %v2965_v1 = vld [vmem:[#allocation5 + $0xc0] sm:$0xff]   ;;  %2566 = vmatprep.subr.bf16.mxu0 %v2964_v0  ;;  %v2969_v5 = vld [vmem:[#allocation5 + $0xc8] sm:$0xff]   ;;  %v2972_v8 = vld [vmem:[#allocation5 + $0x50] sm:$0xff]   ;;  %vm3338_vm4 = vmmov 0   ;;  %s3938_s19 = sld [smem:[#allocation17_spill]]  ;;  %s3939_s15 = sld [smem:[#allocation21_spill]] }
  0xa7   : > { %v2966_v2 = vld [vmem:[#allocation5] sm:$0xff]   ;;  %2594 = vmatprep.subr.bf16.mxu1 %v2965_v1  ;;  %v2970_v6 = vld [vmem:[#allocation5 + $0x8] sm:$0xff]   ;;  %v2973_v9 = vld [vmem:[#allocation5 + $0xd0] sm:$0xff]   ;;  %v3668_v31 = vshrl.u32 %v557_v26, 7  ;;  %s3940_s16 = sld [smem:[#allocation22_spill]]  ;;  %s2424_s18 = sshll.u32 %s3650_s28, 3 }
  0xa8   : > { %v2967_v3 = vld [vmem:[#allocation5 + $0x80] sm:$0xff]   ;;  %2567 = vmatpush3.bf16.msra.mxu0 %v2966_v2  ;;  %v2971_v7 = vld [vmem:[#allocation5 + $0x88] sm:$0xff]   ;;  %v2974_v10 = vld [vmem:[#allocation5 + $0x10] sm:$0xff]   ;;  %s3941_s13 = sld [smem:[#allocation23_spill]]  ;;  %s3942_s14 = sld [smem:[#allocation24_spill]] }
  0xa9   : > { %2595 = vmatpush3.bf16.msra.mxu1 %v2967_v3  ;;  %2568 = vmatprep.subr.bf16.mxu0 %v2968_v4  ;;  %v2975_v11 = vld [vmem:[#allocation5 + $0x90] sm:$0xff]   ;;  %v2976_v12 = vld [vmem:[#allocation5 + $0x58] sm:$0xff]   ;;  %v2980_v16 = vld [vmem:[#allocation5 + $0x60] sm:$0xff]   ;;  %vm590_vm0 = vcmp.lt.s32.totalorder %v3668_v31, 1  ;;  %vm597_vm1 = vcmp.lt.s32.totalorder %v3668_v31, 7  ;;  %vm583_vm2 = vcmp.lt.s32.totalorder %v3668_v31, 2 }
  0xaa   : > { %2596 = vmatprep.subr.bf16.mxu1 %v2969_v5  ;;  %v2977_v13 = vld [vmem:[#allocation5 + $0xd8] sm:$0xff]   ;;  %v2981_v17 = vld [vmem:[#allocation5 + $0xe0] sm:$0xff]   ;;  %v2984_v20 = vld [vmem:[#allocation5 + $0x68] sm:$0xff]   ;;  %vm604_vm3 = vcmp.lt.s32.totalorder %v3668_v31, 6  ;;  %s3943_s11 = sld [smem:[#allocation25_spill]] }
  0xab   : > { %v2978_v14 = vld [vmem:[#allocation5 + $0x18] sm:$0xff]   ;;  %v2982_v18 = vld [vmem:[#allocation5 + $0x20] sm:$0xff]   ;;  %v2985_v21 = vld [vmem:[#allocation5 + $0xe8] sm:$0xff]  }
  0xac   : > { %2569 = vmatpush3.bf16.msra.mxu0 %v2970_v6  ;;  %v2979_v15 = vld [vmem:[#allocation5 + $0x98] sm:$0xff]   ;;  %v2983_v19 = vld [vmem:[#allocation5 + $0xa0] sm:$0xff]   ;;  %v2986_v22 = vld [vmem:[#allocation5 + $0x28] sm:$0xff]   ;;  %s2563_s5 = sshll.u32 %s3938_s19, 7 }
  0xad   : > { %2597 = vmatpush3.bf16.msra.mxu1 %v2971_v7  ;;  %2570 = vmatprep.subr.bf16.mxu0 %v2972_v8  ;;  %v2987_v23 = vld [vmem:[#allocation5 + $0xa8] sm:$0xff]   ;;  %v2988_v24 = vld [vmem:[#allocation5 + $0x70] sm:$0xff]   ;;  %v2992_v29 = vld [vmem:[#allocation5 + $0x78] sm:$0xff]  }
  0xae   : > { %2598 = vmatprep.subr.bf16.mxu1 %v2973_v9  ;;  %v2989_v25 = vld [vmem:[#allocation5 + $0xf0] sm:$0xff]   ;;  %v2993_v30 = vld [vmem:[#allocation5 + $0xf8] sm:$0xff]   ;;  %v2997_v39 = vld [vmem:[#allocation5 + $0x100] sm:$0xff]  }
  0xaf   : > { %v2990_v27 = vld [vmem:[#allocation5 + $0x30] sm:$0xff]   ;;  %v2994_v32 = vld [vmem:[#allocation5 + $0x38] sm:$0xff]   ;;  %v2998_v60 = vld [vmem:[#allocation5 + $0x108] sm:$0xff]  }
  0xb0   : > { %2571 = vmatpush3.bf16.msra.mxu0 %v2974_v10  ;;  %v2991_v28 = vld [vmem:[#allocation5 + $0xb0] sm:$0xff]   ;;  %v2995_v33 = vld [vmem:[#allocation5 + $0xb8] sm:$0xff]   ;;  %v3001_v7 = vld [vmem:[#allocation5 + $0x120] sm:$0xff]  }
  0xb1   : > { %2599 = vmatpush3.bf16.msra.mxu1 %v2975_v11  ;;  %2572 = vmatprep.subr.bf16.mxu0 %v2976_v12  ;;  %v554_v34 = vld [vmem:[%s3654_s17] sm:$0xff]   ;;  %v3672_v35 = vld [vmem:[%s3654_s17 + $0x8] sm:$0xf]  ;;  %s3843_s17 = scalar_lea.hbm %s3943_s11, %s2563_s5 }
  0xb2   : > { %2600 = vmatprep.subr.bf16.mxu1 %v2977_v13  ;;  %v3674_v36 = vunpack.c.l.bf16 %v554_v34  ;;  %v578_v37 = vunpack.c.h.bf16 %v554_v34  ;;  %v3677_v38 = vunpack.c.l.bf16 %v3672_v35  ;;  %v2999_v0 = vld [vmem:[#allocation5 + $0x110] sm:$0xff]   ;;  %v3000_v4 = vld [vmem:[#allocation5 + $0x118] sm:$0xff]   ;;  %v3002_v8 = vld [vmem:[#allocation5 + $0x128] sm:$0xff]  }
  0xb3   : > { %v3003_v9 = vld [vmem:[#allocation5 + $0x130] sm:$0xff]   ;;  %v3004_v10 = vld [vmem:[#allocation5 + $0x138] sm:$0xff]   ;;  %v3005_v13 = vld [vmem:[#allocation7 + $0x40] sm:$0xff]  }
  0xb4   : > { %2573 = vmatpush3.bf16.msra.mxu0 %v2978_v14  ;;  %v587_v40 = vrot.slane %v3674_v36, 7  ;;  %v588_v41 = vrot.slane %v578_v37, 7  ;;  %v589_v42 = vrot.slane %v3677_v38, 7  ;;  %v594_v43 = vrot.slane %v3674_v36, 1  ;;  %v3006_v14 = vld [vmem:[#allocation7] sm:$0xff]   ;;  %v3019_v26 = vld [vmem:[#allocation7 + $0xd8] sm:$0xff]  }
  0xb5   : > { %2601 = vmatpush3.bf16.msra.mxu1 %v2979_v15  ;;  %2574 = vmatprep.subr.bf16.mxu0 %v2980_v16  ;;  %v595_v44 = vrot.slane %v578_v37, 1  ;;  %v596_v45 = vrot.slane %v3677_v38, 1  ;;  %v580_v46 = vrot.slane %v3674_v36, 6  ;;  %v581_v47 = vrot.slane %v578_v37, 6  ;;  %v3007_v15 = vld [vmem:[#allocation7 + $0xc0] sm:$0xff]   ;;  %v3085_v31 = vld [vmem:[#allocation8 + $0x138] sm:$0xff]  }
  0xb6   : > { %2602 = vmatprep.subr.bf16.mxu1 %v2981_v17  ;;  %v592_v48 = vsel %vm590_vm0, %v587_v40, %v588_v41  ;;  %v593_v49 = vsel %vm590_vm0, %v589_v42, %v587_v40  ;;  %v582_v50 = vrot.slane %v3677_v38, 6  ;;  %v591_v51 = vsel %vm590_vm0, %v588_v41, %v589_v42  ;;  %v3008_v16 = vld [vmem:[#allocation7 + $0x80] sm:$0xff]   ;;  %v3009_v17 = vld [vmem:[#allocation7 + $0x48] sm:$0xff]  }
  0xb7   : > { %v609_v52 = vpack.c.bf16 %v592_v48, %v593_v49  ;;  %v598_v53 = vsel %vm597_vm1, %v595_v44, %v596_v45  ;;  %v599_v54 = vsel %vm597_vm1, %v594_v43, %v595_v44  ;;  %v585_v55 = vsel %vm583_vm2, %v580_v46, %v581_v47  ;;  %v3026_v40 = vld [vmem:[#allocation7 + $0x28] sm:$0xff]   ;;  %v3036_v48 = vld [vmem:[#allocation7 + $0xf8] sm:$0xff]  }
  0xb8   : > { %2575 = vmatpush3.bf16.msra.mxu0 %v2982_v18  ;;  %v611_v56 = vpack.c.bf16 %v598_v53, %v599_v54  ;;  %v586_v57 = vsel %vm583_vm2, %v582_v50, %v580_v46  ;;  %v614_v58 = vpack.c.bf16 %v591_v51, %v591_v51  ;;  %v601_v61 = vrot.slane %v3674_v36, 2  ;;  %v3010_v18 = vld [vmem:[#allocation7 + $0x8] sm:$0xff]   ;;  %v3030_v46 = vld [vmem:[#allocation7 + $0x70] sm:$0xff]   ;;  %v3037_v49 = vld [vmem:[#allocation7 + $0xb8] sm:$0xff]  }
  0xb9   : > { %2603 = vmatpush3.bf16.msra.mxu1 %v2983_v19  ;;  %2576 = vmatprep.subr.bf16.mxu0 %v2984_v20  ;;  %v608_v59 = vpack.c.bf16 %v585_v55, %v586_v57  ;;  %v602_v62 = vrot.slane %v578_v37, 2  ;;  %v603_v63 = vrot.slane %v3677_v38, 2  ;;  %v584_v1 = vsel %vm583_vm2, %v581_v47, %v582_v50  ;;  %v3011_v19 = vld [vmem:[#allocation7 + $0xc8] sm:$0xff]   ;;  %v3031_v36 = vld [vmem:[#allocation7 + $0x30] sm:$0xff]  }
  0xba   : > { %2604 = vmatprep.subr.bf16.mxu1 %v2985_v21  ;;  %970 = vmatprep.mubr.bf16.mxu0 %v609_v52  ;;  %v613_v5 = vpack.c.bf16 %v584_v1, %v584_v1  ;;  %v3012_v20 = vld [vmem:[#allocation7 + $0x88] sm:$0xff]   ;;  %v3013_v21 = vld [vmem:[#allocation7 + $0x50] sm:$0xff]   ;;  %v600_v37 = vsel %vm597_vm1, %v596_v45, %v594_v43  ;;  %v2426_v42 = vcombine.low %v3672_v35, %v3672_v35  ;;  %v3034_v43 = vld [vmem:[#allocation7 + $0x78] sm:$0xff]  }
  0xbb   : > { %1018 = vmatprep.mubr.bf16.mxu1 %v611_v56  ;;  %v605_v2 = vsel %vm604_vm3, %v602_v62, %v603_v63  ;;  %v606_v3 = vsel %vm604_vm3, %v601_v61, %v602_v62  ;;  %v607_v11 = vsel %vm604_vm3, %v603_v63, %v601_v61  ;;  %v3027_v41 = vld [vmem:[#allocation7 + $0xe8] sm:$0xff]   ;;  %v3032_v47 = vld [vmem:[#allocation7 + $0xf0] sm:$0xff]   ;;  %v3035_v45 = vld [vmem:[#allocation7 + $0x38] sm:$0xff]  }
  0xbc   : > { %2577 = vmatpush3.bf16.msra.mxu0 %v2986_v22  ;;  %v612_v6 = vpack.c.bf16 %v605_v2, %v606_v3  ;;  %v617_v12 = vpack.c.bf16 %v607_v11, %v607_v11  ;;  %v3014_v22 = vld [vmem:[#allocation7 + $0x10] sm:$0xff]   ;;  %v3029_v44 = vld [vmem:[#allocation7 + $0xa8] sm:$0xff]   ;;  %v3038_v35 = vld [vmem:[#allocation7 + $0x100] sm:$0xff]   ;;  %v3336_v11 = vmov 0.0  }
  0xbd   : > { %2605 = vmatpush3.bf16.msra.mxu1 %v2987_v23  ;;  %2578 = vmatprep.subr.bf16.mxu0 %v2988_v24  ;;  %v3015_v23 = vld [vmem:[#allocation7 + $0xd0] sm:$0xff]  }
  0xbe   : > { %2606 = vmatprep.subr.bf16.mxu1 %v2989_v25  ;;  %v3016_v24 = vld [vmem:[#allocation7 + $0x90] sm:$0xff]   ;;  %v3017_v25 = vld [vmem:[#allocation7 + $0x58] sm:$0xff]  }
  0xbf   : > { %v3033_v38 = vld [vmem:[#allocation7 + $0xb0] sm:$0xff]  }
  0xc0   : > { %2579 = vmatpush3.bf16.msra.mxu0 %v2990_v27  ;;  %v3018_v27 = vld [vmem:[#allocation7 + $0x18] sm:$0xff]  }
  0xc1   : > { %2607 = vmatpush3.bf16.msra.mxu1 %v2991_v28  ;;  %2580 = vmatprep.subr.bf16.mxu0 %v2992_v29  ;;  %v3020_v28 = vld [vmem:[#allocation7 + $0x98] sm:$0xff]   ;;  %v3021_v29 = vld [vmem:[#allocation7 + $0x60] sm:$0xff]  }
  0xc2   : > { %2608 = vmatprep.subr.bf16.mxu1 %v2993_v30  ;;  %v3022_v30 = vld [vmem:[#allocation7 + $0x20] sm:$0xff]  }
  0xc4   : > { %2581 = vmatpush3.bf16.msra.mxu0 %v2994_v32  ;;  %v3023_v32 = vld [vmem:[#allocation7 + $0xe0] sm:$0xff]  }
  0xc5   : > { %2609 = vmatpush3.bf16.msra.mxu1 %v2995_v33  ;;  %2773 = vmatprep.subr.bf16.mxu0 %v2997_v39  ;;  %v3024_v33 = vld [vmem:[#allocation7 + $0xa0] sm:$0xff]  }
  0xc6   : > { %2632 = vmatprep.subr.bf16.mxu1 %v3005_v13  ;;  %v3735_v13 = vrot.slane %v3336_v11, 1 }
  0xc7   : > { %971 = vmatmul.mubr.bf16.vlgmr.msra.gmra.mrb[0].mxu0 %v608_v59 }
  0xc8   : > { %1019 = vmatmul.mubr.bf16.vlgmr.msra.gmra.mrb[0].mxu1 %v554_v34  ;;  %2774 = vmatpush3.bf16.msra.mxu0 %v2997_v39  ;;  %v3025_v34 = vld [vmem:[#allocation7 + $0x68] sm:$0xff]   ;;  %v616_v39 = vpack.c.bf16 %v600_v37, %v600_v37 }
  0xc9   : > { %978 = vmatprep.mubr.bf16.mxu0 %v614_v58  ;;  %2775 = vmatprep.subr.bf16.mxu0 %v2998_v60 }
  0xca   : > { %2633 = vmatpush3.bf16.msra.mxu1 %v3006_v14  ;;  %1026 = vmatprep.mubr.bf16.mxu1 %v616_v39  ;;  %v3738_v14 = vrot.slane %v3336_v11, 6 }
  0xcb   : > { %2634 = vmatprep.subr.bf16.mxu1 %v3009_v17 }
  0xcc   : > { %2776 = vmatpush3.bf16.msra.mxu0 %v2998_v60 }
  0xcd   : > { %2777 = vmatprep.subr.bf16.mxu0 %v2999_v0 }
  0xce   : > { %2635 = vmatpush3.bf16.msra.mxu1 %v3010_v18 }
  0xcf   : > { %979 = vmatmul.mubr.bf16.gmra.mrb[4].mxu0 %v613_v5  ;;  %2636 = vmatprep.subr.bf16.mxu1 %v3013_v21 }
  0xd0   : > { %2778 = vmatpush3.bf16.msra.mxu0 %v2999_v0  ;;  %2789 = vmatprep.mubr.bf16.mxu0 %v612_v6 }
  0xd1   : > { %2779 = vmatprep.subr.bf16.mxu0 %v3000_v4  ;;  %1027 = vmatmul.mubr.bf16.gmra.mrb[4].mxu1 %v2426_v42  ;;  %v3042_v42 = vld [vmem:[#allocation7 + $0x120] sm:$0xff]  }
  0xd2   : > { %2637 = vmatpush3.bf16.msra.mxu1 %v3014_v22 }
  0xd3   : > { %2638 = vmatprep.subr.bf16.mxu1 %v3017_v25 }
  0xd4   : > { %2780 = vmatpush3.bf16.msra.mxu0 %v3000_v4  ;;  %v2467_v4 = vld [vmem:[%s3894_s2] ss:$0 sm:$0xff] }
  0xd5   : > { %2781 = vmatprep.subr.bf16.mxu0 %v3001_v7 }
  0xd6   : > { %2639 = vmatpush3.bf16.msra.mxu1 %v3018_v27  ;;  %v3039_v27 = vld [vmem:[#allocation7 + $0x108] sm:$0xff]  }
  0xd7   : > { %2640 = vmatprep.subr.bf16.mxu1 %v3021_v29  ;;  %v3759_v29 = vrot.slane %v3336_v11, 2 }
  0xd8   : > { %2782 = vmatpush3.bf16.msra.mxu0 %v3001_v7  ;;  %v2468_v7 = vld [vmem:[%s3895_s3] ss:$0 sm:$0xff] }
  0xd9   : > { %2783 = vmatprep.subr.bf16.mxu0 %v3002_v8 }
  0xda   : > { %2641 = vmatpush3.bf16.msra.mxu1 %v3022_v30 }
  0xdb   : > { %2642 = vmatprep.subr.bf16.mxu1 %v3025_v34 }
  0xdc   : > { %2784 = vmatpush3.bf16.msra.mxu0 %v3002_v8 }
  0xdd   : > { %2785 = vmatprep.subr.bf16.mxu0 %v3003_v9 }
  0xde   : > { %2643 = vmatpush3.bf16.msra.mxu1 %v3026_v40  ;;  %v3041_v40 = vld [vmem:[#allocation7 + $0x118] sm:$0xff]  }
  0xdf   : > { %2644 = vmatprep.subr.bf16.mxu1 %v3030_v46  ;;  %v3044_v46 = vld [vmem:[#allocation7 + $0x130] sm:$0xff]  }
  0xe0   : > { %2786 = vmatpush3.bf16.msra.mxu0 %v3003_v9 }
  0xe1   : > { %2787 = vmatprep.subr.bf16.mxu0 %v3004_v10 }
  0xe2   : > { %2645 = vmatpush3.bf16.msra.mxu1 %v3031_v36  ;;  %v3045_v36 = vld [vmem:[#allocation7 + $0x138] sm:$0xff]  }
  0xe3   : > { %2646 = vmatprep.subr.bf16.mxu1 %v3034_v43 }
  0xe4   : > { %2788 = vmatpush3.bf16.msra.mxu0 %v3004_v10 }
  0xe5   : > { %2660 = vmatprep.subr.bf16.mxu0 %v3007_v15 }
  0xe6   : > { %2647 = vmatpush3.bf16.msra.mxu1 %v3035_v45 }
  0xe7   : > { %2790 = vmatmul.mubr.bf16.vlgmr.msra.gmra.mrb[8].mxu0 %v617_v12  ;;  %2793 = vmatprep.subr.bf16.mxu1 %v3038_v35  ;;  %v3732_v12 = vrot.slane %v3336_v11, 7 }
  0xe8   : > { %2661 = vmatpush3.bf16.msra.mxu0 %v3008_v16 }
  0xe9   : > { %2662 = vmatprep.subr.bf16.mxu0 %v3011_v19 }
  0xec   : > { %2663 = vmatpush3.bf16.msra.mxu0 %v3012_v20 }
  0xed   : > { %2664 = vmatprep.subr.bf16.mxu0 %v3015_v23 }
  0xf0   : > { %2665 = vmatpush3.bf16.msra.mxu0 %v3016_v24 }
  0xf1   : > { %2666 = vmatprep.subr.bf16.mxu0 %v3019_v26 }
  0xf4   : > { %2667 = vmatpush3.bf16.msra.mxu0 %v3020_v28 }
  0xf5   : > { %2668 = vmatprep.subr.bf16.mxu0 %v3023_v32  ;;  %v3040_v32 = vld [vmem:[#allocation7 + $0x110] sm:$0xff]  }
  0xf8   : > { %2669 = vmatpush3.bf16.msra.mxu0 %v3024_v33 }
  0xf9   : > { %2670 = vmatprep.subr.bf16.mxu0 %v3027_v41 }
  0xfc   : > { %2671 = vmatpush3.bf16.msra.mxu0 %v3029_v44  ;;  %v3043_v44 = vld [vmem:[#allocation7 + $0x128] sm:$0xff]  }
  0xfd   : > { %2672 = vmatprep.subr.bf16.mxu0 %v3032_v47  ;;  %v3772_v47 = vpack.c.bf16 %v3759_v29, %v3759_v29 }
 0x100   : > { %2673 = vmatpush3.bf16.msra.mxu0 %v3033_v38 }
 0x101   : > { %2674 = vmatprep.subr.bf16.mxu0 %v3036_v48 }
 0x104   : > { %2675 = vmatpush3.bf16.msra.mxu0 %v3037_v49  ;;  %v3046_v49 = vld [vmem:[#allocation8 + $0x40] sm:$0xff]  }
 0x105   : > { %2698 = vmatprep.subr.bf16.mxu0 %v3046_v49 }
 0x19a   : > { %v2582_v50 = vpop.f32.mrb[0].mxu0 }
 0x19b   : > { %v2610_v51 = vpop.f32.mrb[0].mxu1  ;;  %v2583_v52 = vpop.f32.mrb[1].mxu0  ;;  %v3048_v50 = vld [vmem:[#allocation8 + $0xc0] sm:$0xff]  }
 0x19c   : > { %v2611_v53 = vpop.f32.mrb[1].mxu1  ;;  %v2585_v54 = vpop.f32.mrb[2].mxu0  ;;  %v3049_v51 = vld [vmem:[#allocation8 + $0x80] sm:$0xff]   ;;  %v3050_v52 = vld [vmem:[#allocation8 + $0x48] sm:$0xff]  }
 0x19d   : > { %v2613_v55 = vpop.f32.mrb[2].mxu1  ;;  %v2586_v56 = vpop.f32.mrb[3].mxu0  ;;  %v3052_v53 = vld [vmem:[#allocation8 + $0xc8] sm:$0xff]  }
 0x19e   : > { %v2614_v57 = vpop.f32.mrb[3].mxu1  ;;  %v2587_v58 = vadd.f32 %v2586_v56, %v2585_v54  ;;  %v3051_v54 = vld [vmem:[#allocation8 + $0x8] sm:$0xff]   ;;  %v3054_v56 = vld [vmem:[#allocation8 + $0x50] sm:$0xff]  }
 0x19f   : > { %v2615_v59 = vadd.f32 %v2614_v57, %v2613_v55  ;;  %v3053_v55 = vld [vmem:[#allocation8 + $0x88] sm:$0xff]   ;;  %v3056_v57 = vld [vmem:[#allocation8 + $0xd0] sm:$0xff]  }
 0x1a1   : > { %v1024_v60 = vadd.f32 %v2615_v59, %v2587_v58  ;;  %v3055_v58 = vld [vmem:[#allocation8 + $0x10] sm:$0xff]  }
 0x1a2   : > { %v2588_v61 = vpop.f32.mrb[4].mxu0  ;;  %v3057_v59 = vld [vmem:[#allocation8 + $0x90] sm:$0xff]  }
 0x1a3   : > { %v2589_v62 = vpop.f32.mrb[5].mxu0  ;;  %v3060_v61 = vld [vmem:[#allocation8 + $0xd8] sm:$0xff]  }
 0x1a4   : > { %v2591_v63 = vpop.f32.mrb[6].mxu0  ;;  %v2616_v38 = vpop.f32.mrb[4].mxu1  ;;  %v3059_v62 = vld [vmem:[#allocation8 + $0x18] sm:$0xff]  }
 0x1a5   : > { %v2592_v0 = vpop.f32.mrb[7].mxu0  ;;  %v2617_v43 = vpop.f32.mrb[5].mxu1  ;;  %v3061_v63 = vld [vmem:[#allocation8 + $0x98] sm:$0xff]   ;;  %v2509_v38 = vld [vmem:[%s3936_s22] ss:$0 sm:$0xff] }
 0x1a6   : > { %v2619_v45 = vpop.f32.mrb[6].mxu1  ;;  %v3062_v0 = vld [vmem:[#allocation8 + $0x60] sm:$0xff]  }
 0x1a7   : > { %v2620_v48 = vpop.f32.mrb[7].mxu1 }
 0x1a8   : > { %v2510_v48 = vld [vmem:[%s3937_s25] ss:$0 sm:$0xff]  ;;  %s543_s25 = scalar_lea.vmem [#allocation11], %s2424_s18  ;;  %s3339_s18 = smov [#allocation11]  }
 0x1a9   : > { %s2275_s23 = sshll.u32 %s543_s25, 4  ;;  %s3241_s20 = sshll.u32 %s3339_s18, 4  ;;  %s3845_s23 = int_to_ptr.vmem [resolvable:$true] %s2275_s23  ;;  %s3242_s20 = int_to_ptr.vmem [resolvable:$false] %s3241_s20 }
 0x1aa   : > { %s3237_s19 = scalar_lea.vmem %s3845_s23, 128  ;;  %s3243_s12 = scalar_lea.vmem %s3242_s20, 256 }
 0x1ab   : > { %p3238_p8 = scmp.ne.s32.totalorder %s3845_s23, %s3237_s19  ;;  %p3244_p3 = scmp.lt.s32.totalorder %s3845_s23, %s3242_s20 }
 0x1ac   : > { %p3245_p7 = scmp.lt.s32.totalorder %s3243_s12, %s3237_s19 }
 0x1ad   : > { %p3239_p6 = pnand %p3238_p8, %p3594_p5 }
 0x1ae   : > { %p3246_p9 = por %p3245_p7, %p3244_p3 }
 0x1af   : > { %p3240_p10 = pneg %p3239_p6 }
 0x1b1   : > { %p3247_p0 = pnand %p3246_p9, %p3240_p10 }
 0x1ba   : > { %v2791_v1 = vpop.f32.mrb[8].mxu0 }
 0x1bb   : > { %v1068_v2 = vpop.f32.mrb[9].mxu0  ;;  %v3063_v1 = vld [vmem:[#allocation8 + $0x20] sm:$0xff]  }
 0x1bc   : > { %v2792_v3 = vpop.f32.mrb[10].mxu0  ;;  %v3064_v2 = vld [vmem:[#allocation8 + $0xe0] sm:$0xff]  }
 0x1bd   : > { %v1071_v5 = vpop.f32.mrb[11].mxu0  ;;  %v3065_v3 = vld [vmem:[#allocation8 + $0xa0] sm:$0xff]  }
 0x1be   : > { %v1072_v6 = vadd.f32 %v1071_v5, %v1024_v60  ;;  %v3058_v60 = vld [vmem:[#allocation8 + $0x58] sm:$0xff]   ;;  %v3777_v5 = vpack.c.bf16 %v3735_v13, %v3735_v13 }
 0x1c0   : > { %v1089_v8 = vmul.f32 %v2467_v4, %v1072_v6  ;;  %v3066_v4 = vld [vmem:[#allocation8 + $0x68] sm:$0xff]  }
 0x1c1   : > { %v3067_v6 = vld [vmem:[#allocation8 + $0x28] sm:$0xff]  }
 0x1c2   : > { %v1098_v9 = vadd.f32 %v2468_v7, %v1089_v8  ;;  %v3068_v7 = vld [vmem:[#allocation8 + $0xe8] sm:$0xff]  }
 0x1c3   : > { %v3069_v8 = vld [vmem:[#allocation8 + $0xa8] sm:$0xff]  }
 0x1c4   : > { %v1101_v10 = vmax.f32 %v1098_v9, 0.0  ;;  %v3337_v9 = vmov 0.0|0.0  }
 0x1c6   : > { %v1121_v15 = vrot.slane %v1101_v10, 7  ;;  %v1127_v16 = vrot.slane %v1101_v10, 1  ;;  %v1115_v17 = vrot.slane %v1101_v10, 6  ;;  %v1140_v26 = vpack.c.bf16 %v1101_v10, %v3336_v11 }
 0x1c7   : > { %v1133_v30 = vrot.slane %v1101_v10, 2  ;;  %v3070_v10 = vld [vmem:[#allocation8 + $0x70] sm:$0xff]  }
 0x1c8   : > { %v1124_v18 = vsel %vm590_vm0, %v3732_v12, %v1121_v15  ;;  %v1129_v19 = vsel %vm597_vm1, %v1127_v16, %v3735_v13  ;;  %v1130_v20 = vsel %vm597_vm1, %v3735_v13, %v1127_v16  ;;  %v1118_v21 = vsel %vm583_vm2, %v3738_v14, %v1115_v17  ;;  %v3072_v16 = vld [vmem:[#allocation8 + $0xf0] sm:$0xff]  }
 0x1c9   : > { %v1139_v22 = vpack.c.bf16 %v1124_v18, %v3732_v12  ;;  %v1141_v23 = vpack.c.bf16 %v1129_v19, %v1130_v20  ;;  %v1138_v24 = vpack.c.bf16 %v1118_v21, %v3738_v14  ;;  %v1123_v25 = vsel %vm590_vm0, %v1121_v15, %v3732_v12  ;;  %v3071_v15 = vld [vmem:[#allocation8 + $0x30] sm:$0xff]   ;;  %v3074_v18 = vld [vmem:[#allocation8 + $0x78] sm:$0xff]  }
 0x1ca   : > { %v1144_v28 = vpack.c.bf16 %v1123_v25, %v1123_v25  ;;  %v1117_v33 = vsel %vm583_vm2, %v1115_v17, %v3738_v14  ;;  %v1135_v34 = vsel %vm604_vm3, %v1133_v30, %v3759_v29  ;;  %v1136_v37 = vsel %vm604_vm3, %v3759_v29, %v1133_v30  ;;  %v3073_v17 = vld [vmem:[#allocation8 + $0xb0] sm:$0xff]   ;;  %v3075_v19 = vld [vmem:[#allocation8 + $0x38] sm:$0xff]  }
 0x1cb   : > { %1500 = vmatprep.mubr.bf16.mxu1 %v1139_v22  ;;  %1548 = vmatprep.mubr.bf16.mxu0 %v1141_v23  ;;  %v1143_v39 = vpack.c.bf16 %v1117_v33, %v1117_v33  ;;  %v1142_v41 = vpack.c.bf16 %v1135_v34, %v1136_v37  ;;  %v3076_v20 = vld [vmem:[#allocation8 + $0xf8] sm:$0xff]   ;;  %v3078_v22 = vld [vmem:[#allocation8 + $0x100] sm:$0xff]  }
 0x1cc   : > { %1501 = vmatmul.mubr.bf16.vlgmr.msra.gmra.mrb[8].mxu1 %v1138_v24  ;;  %1549 = vmatmul.mubr.bf16.vlgmr.msra.gmra.mrb[12].mxu0 %v1140_v26  ;;  %v3077_v21 = vld [vmem:[#allocation8 + $0xb8] sm:$0xff]  }
 0x1cd   : > { %2794 = vmatpush3.bf16.msra.mxu1 %v3038_v35  ;;  %1508 = vmatprep.mubr.bf16.mxu1 %v1144_v28  ;;  %v3047_v35 = vld [vmem:[#allocation8] sm:$0xff]  }
 0x1ce   : > { %2795 = vmatprep.subr.bf16.mxu1 %v3039_v27  ;;  %2699 = vmatpush3.bf16.msra.mxu0 %v3047_v35 }
 0x1cf   : > { %2700 = vmatprep.subr.bf16.mxu0 %v3050_v52  ;;  %1556 = vmatprep.mubr.bf16.mxu0 %v3777_v5 }
 0x1d1   : > { %2796 = vmatpush3.bf16.msra.mxu1 %v3039_v27 }
 0x1d2   : > { %2797 = vmatprep.subr.bf16.mxu1 %v3040_v32  ;;  %2701 = vmatpush3.bf16.msra.mxu0 %v3051_v54 }
 0x1d3   : > { %2702 = vmatprep.subr.bf16.mxu0 %v3054_v56 }
 0x1d4   : > { %1509 = vmatmul.mubr.bf16.gmra.mrb[12].mxu1 %v1143_v39  ;;  %1557 = vmatmul.mubr.bf16.gmra.mrb[16].mxu0 %v3337_v9 }
 0x1d5   : > { %2798 = vmatpush3.bf16.msra.mxu1 %v3040_v32  ;;  %2809 = vmatprep.mubr.bf16.mxu1 %v1142_v41 }
 0x1d6   : > { %2799 = vmatprep.subr.bf16.mxu1 %v3041_v40  ;;  %2703 = vmatpush3.bf16.msra.mxu0 %v3055_v58 }
 0x1d7   : > { %2704 = vmatprep.subr.bf16.mxu0 %v3058_v60 }
 0x1d9   : > { %2800 = vmatpush3.bf16.msra.mxu1 %v3041_v40 }
 0x1da   : > { %2801 = vmatprep.subr.bf16.mxu1 %v3042_v42  ;;  %2705 = vmatpush3.bf16.msra.mxu0 %v3059_v62 }
 0x1db   : > { %2706 = vmatprep.subr.bf16.mxu0 %v3062_v0 }
 0x1dd   : > { %2802 = vmatpush3.bf16.msra.mxu1 %v3042_v42 }
 0x1de   : > { %2803 = vmatprep.subr.bf16.mxu1 %v3043_v44  ;;  %2707 = vmatpush3.bf16.msra.mxu0 %v3063_v1  ;;  %v3080_v1 = vld [vmem:[#allocation8 + $0x110] sm:$0xff]  }
 0x1df   : > { %2708 = vmatprep.subr.bf16.mxu0 %v3066_v4 }
 0x1e1   : > { %2804 = vmatpush3.bf16.msra.mxu1 %v3043_v44 }
 0x1e2   : > { %2805 = vmatprep.subr.bf16.mxu1 %v3044_v46  ;;  %2709 = vmatpush3.bf16.msra.mxu0 %v3067_v6  ;;  %v3081_v6 = vld [vmem:[#allocation8 + $0x118] sm:$0xff]  }
 0x1e3   : > { %2710 = vmatprep.subr.bf16.mxu0 %v3070_v10 }
 0x1e5   : > { %2806 = vmatpush3.bf16.msra.mxu1 %v3044_v46 }
 0x1e6   : > { %2807 = vmatprep.subr.bf16.mxu1 %v3045_v36  ;;  %2711 = vmatpush3.bf16.msra.mxu0 %v3071_v15 }
 0x1e7   : > { %2712 = vmatprep.subr.bf16.mxu0 %v3074_v18  ;;  %v3088_v18 = vld [vmem:[#allocation10 + $0x10] sm:$0xff]  }
 0x1e9   : > { %2808 = vmatpush3.bf16.msra.mxu1 %v3045_v36 }
 0x1ea   : > { %2726 = vmatprep.subr.bf16.mxu1 %v3048_v50  ;;  %2713 = vmatpush3.bf16.msra.mxu0 %v3075_v19  ;;  %v3089_v19 = vld [vmem:[#allocation10 + $0x18] sm:$0xff]  }
 0x1eb   : > { %2813 = vmatprep.subr.bf16.mxu0 %v3078_v22 }
 0x1ec   : > { %2810 = vmatmul.mubr.bf16.vlgmr.msra.gmra.mrb[16].mxu1 %v3772_v47 }
 0x1ed   : > { %2727 = vmatpush3.bf16.msra.mxu1 %v3049_v51 }
 0x1ee   : > { %2728 = vmatprep.subr.bf16.mxu1 %v3052_v53 }
 0x1f1   : > { %2729 = vmatpush3.bf16.msra.mxu1 %v3053_v55 }
 0x1f2   : > { %2730 = vmatprep.subr.bf16.mxu1 %v3056_v57 }
 0x1f5   : > { %2731 = vmatpush3.bf16.msra.mxu1 %v3057_v59 }
 0x1f6   : > { %2732 = vmatprep.subr.bf16.mxu1 %v3060_v61 }
 0x1f9   : > { %2733 = vmatpush3.bf16.msra.mxu1 %v3061_v63  ;;  %v3079_v63 = vld [vmem:[#allocation8 + $0x108] sm:$0xff]  }
 0x1fa   : > { %2734 = vmatprep.subr.bf16.mxu1 %v3064_v2 }
 0x1fd   : > { %2735 = vmatpush3.bf16.msra.mxu1 %v3065_v3 }
 0x1fe   : > { %2736 = vmatprep.subr.bf16.mxu1 %v3068_v7 }
 0x201   : > { %2737 = vmatpush3.bf16.msra.mxu1 %v3069_v8  ;;  %v3084_v8 = vld [vmem:[#allocation8 + $0x130] sm:$0xff]  }
 0x202   : > { %2738 = vmatprep.subr.bf16.mxu1 %v3072_v16  ;;  %v3086_v16 = vld [vmem:[#allocation10] sm:$0xff]  }
 0x205   : > { %2739 = vmatpush3.bf16.msra.mxu1 %v3073_v17  ;;  %v3087_v17 = vld [vmem:[#allocation10 + $0x8] sm:$0xff]  }
 0x206   : > { %2740 = vmatprep.subr.bf16.mxu1 %v3076_v20  ;;  %v3090_v20 = vld [vmem:[#allocation10 + $0x20] sm:$0xff]  }
 0x209   : > { %2741 = vmatpush3.bf16.msra.mxu1 %v3077_v21  ;;  %v3092_v21 = vld [vmem:[#allocation10 + $0x30] sm:$0xff]  }
 0x20a   : > { %2833 = vmatprep.subr.bf16.mxu1 %v3336_v11 }
 0x29f   : > { %v2648_v23 = vpop.f32.mrb[8].mxu1  ;;  %v2676_v24 = vpop.f32.mrb[12].mxu0 }
 0x2a0   : > { %v2649_v25 = vpop.f32.mrb[9].mxu1  ;;  %v2677_v26 = vpop.f32.mrb[13].mxu0 }
 0x2a1   : > { %v2651_v27 = vpop.f32.mrb[10].mxu1  ;;  %v2679_v28 = vpop.f32.mrb[14].mxu0 }
 0x2a2   : > { %v2652_v30 = vpop.f32.mrb[11].mxu1  ;;  %v2680_v32 = vpop.f32.mrb[15].mxu0 }
 0x2a3   : > { %v2653_v33 = vadd.f32 %v2652_v30, %v2651_v27  ;;  %v2681_v34 = vadd.f32 %v2680_v32, %v2679_v28 }
 0x2a5   : > { %v1554_v37 = vadd.f32 %v2681_v34, %v2653_v33 }
 0x2a7   : > { %v2654_v39 = vpop.f32.mrb[12].mxu1 }
 0x2a8   : > { %v2655_v40 = vpop.f32.mrb[13].mxu1 }
 0x2a9   : > { %v2657_v41 = vpop.f32.mrb[14].mxu1 }
 0x2aa   : > { %v2658_v42 = vpop.f32.mrb[15].mxu1 }
 0x2bf   : > { %v2811_v44 = vpop.f32.mrb[16].mxu1 }
 0x2c0   : > { %v1598_v46 = vpop.f32.mrb[17].mxu1 }
 0x2c1   : > { %v2812_v36 = vpop.f32.mrb[18].mxu1 }
 0x2c2   : > { %v1601_v43 = vpop.f32.mrb[19].mxu1 }
 0x2c3   : > { %v1602_v45 = vadd.f32 %v1601_v43, %v1554_v37 }
 0x2c5   : > { %v1619_v49 = vmul.f32 %v2509_v38, %v1602_v45 }
 0x2c7   : > { %v1628_v35 = vadd.f32 %v2510_v48, %v1619_v49  ;;  %v2551_v48 = vld [vmem:[%s3939_s15] ss:$0 sm:$0xff] }
 0x2c9   : > { %v1631_v50 = vmax.f32 %v1628_v35, 0.0 }
 0x2cb   : > { %v1645_v51 = vrot.slane %v1631_v50, 7  ;;  %v1651_v52 = vrot.slane %v1631_v50, 1  ;;  %v1639_v53 = vrot.slane %v1631_v50, 6  ;;  %v1664_v62 = vpack.c.bf16 %v1631_v50, %v3336_v11 }
 0x2cd   : > { %v1648_v54 = vsel %vm590_vm0, %v3732_v12, %v1645_v51  ;;  %v1653_v55 = vsel %vm597_vm1, %v1651_v52, %v3735_v13  ;;  %v1654_v56 = vsel %vm597_vm1, %v3735_v13, %v1651_v52  ;;  %v1642_v57 = vsel %vm583_vm2, %v3738_v14, %v1639_v53 }
 0x2ce   : > { %v1663_v58 = vpack.c.bf16 %v1648_v54, %v3732_v12  ;;  %v1665_v59 = vpack.c.bf16 %v1653_v55, %v1654_v56  ;;  %v1662_v60 = vpack.c.bf16 %v1642_v57, %v3738_v14  ;;  %v1647_v61 = vsel %vm590_vm0, %v1645_v51, %v3732_v12  ;;  %v2553_v55 = vld [vmem:[%s3941_s13] ss:$0 sm:$0xff] }
 0x2cf   : > { %v1668_v0 = vpack.c.bf16 %v1647_v61, %v1647_v61  ;;  %v1657_v13 = vrot.slane %v1631_v50, 2  ;;  %v1641_v2 = vsel %vm583_vm2, %v1639_v53, %v3738_v14  ;;  %v3082_v14 = vld [vmem:[#allocation8 + $0x120] sm:$0xff]   ;;  %v2552_v50 = vld [vmem:[%s3940_s16] ss:$0 sm:$0xff]  ;;  %s2261_s16 = scalar_lea.sflag [#allocation4], %s3650_s28 }
 0x2d0   : > { %2024 = vmatprep.mubr.bf16.mxu0 %v1663_v58  ;;  %2070 = vmatprep.mubr.bf16.mxu1 %v1665_v59  ;;  %v1667_v4 = vpack.c.bf16 %v1641_v2, %v1641_v2  ;;  %v2257_v57 = vld [vmem:[%s3942_s14] sm:$0xff] }
 0x2d1   : > { %2025 = vmatmul.mubr.bf16.vlgmr.msra.gmra.mrb[20].mxu0 %v1662_v60  ;;  %2071 = vmatmul.mubr.bf16.vlgmr.msra.gmra.mrb[20].mxu1 %v1664_v62  ;;  %v1659_v12 = vsel %vm604_vm3, %v1657_v13, %v3759_v29  ;;  %v1660_v3 = vsel %vm604_vm3, %v3759_v29, %v1657_v13  ;;  %v2682_v29 = vpop.f32.mrb[16].mxu0 }
 0x2d2   : > { %2814 = vmatpush3.bf16.msra.mxu0 %v3078_v22  ;;  %2031 = vmatprep.mubr.bf16.mxu0 %v1668_v0  ;;  %v1666_v7 = vpack.c.bf16 %v1659_v12, %v1660_v3  ;;  %v3093_v22 = vld [vmem:[#allocation10 + $0x38] sm:$0xff]  }
 0x2d3   : > { %2815 = vmatprep.subr.bf16.mxu0 %v3079_v63  ;;  %2077 = vmatprep.mubr.bf16.mxu1 %v3777_v5  ;;  %v3083_v5 = vld [vmem:[#allocation8 + $0x128] sm:$0xff]  }
 0x2d4   : > { %2834 = vmatpush3.bf16.msra.mxu1 %v3086_v16 }
 0x2d5   : > { %2835 = vmatprep.subr.bf16.mxu1 %v3336_v11 }
 0x2d6   : > { %2816 = vmatpush3.bf16.msra.mxu0 %v3079_v63 }
 0x2d7   : > { %2817 = vmatprep.subr.bf16.mxu0 %v3080_v1 }
 0x2d8   : > { %2836 = vmatpush3.bf16.msra.mxu1 %v3087_v17 }
 0x2d9   : > { %2032 = vmatmul.mubr.bf16.gmra.mrb[24].mxu0 %v1667_v4  ;;  %2078 = vmatmul.mubr.bf16.gmra.mrb[24].mxu1 %v3337_v9  ;;  %v2683_v9 = vpop.f32.mrb[17].mxu0 }
 0x2da   : > { %2818 = vmatpush3.bf16.msra.mxu0 %v3080_v1  ;;  %2829 = vmatprep.mubr.bf16.mxu0 %v1666_v7  ;;  %v2685_v10 = vpop.f32.mrb[18].mxu0 }
 0x2db   : > { %2819 = vmatprep.subr.bf16.mxu0 %v3081_v6  ;;  %v2686_v15 = vpop.f32.mrb[19].mxu0  ;;  %2837 = vmatprep.subr.bf16.mxu1 %v3336_v11 }
 0x2dc   : > { %2838 = vmatpush3.bf16.msra.mxu1 %v3088_v18  ;;  %2849 = vmatprep.mubr.msk.bf16.mxu1 %vm3338_vm4, %v3336_v11 }
 0x2dd   : > { %2839 = vmatprep.subr.bf16.mxu1 %v3336_v11 }
 0x2de   : > { %2820 = vmatpush3.bf16.msra.mxu0 %v3081_v6 }
 0x2df   : > { %2821 = vmatprep.subr.bf16.mxu0 %v3082_v14 }
 0x2e0   : > { %2840 = vmatpush3.bf16.msra.mxu1 %v3089_v19 }
 0x2e1   : > { %2841 = vmatprep.subr.bf16.mxu1 %v3336_v11 }
 0x2e2   : > { %2822 = vmatpush3.bf16.msra.mxu0 %v3082_v14 }
 0x2e3   : > { %2823 = vmatprep.subr.bf16.mxu0 %v3083_v5 }
 0x2e4   : > { %2842 = vmatpush3.bf16.msra.mxu1 %v3090_v20 }
 0x2e5   : > { %2843 = vmatprep.subr.bf16.mxu1 %v3336_v11 }
 0x2e6   : > { %2824 = vmatpush3.bf16.msra.mxu0 %v3083_v5 }
 0x2e7   : > { %2825 = vmatprep.subr.bf16.mxu0 %v3084_v8 }
 0x2ea   : > { %2826 = vmatpush3.bf16.msra.mxu0 %v3084_v8 }
 0x2eb   : > { %2827 = vmatprep.subr.bf16.mxu0 %v3085_v31 }
 0x2ee   : > { %2828 = vmatpush3.bf16.msra.mxu0 %v3085_v31 }
 0x2f1   : > { %2830 = vmatmul.mubr.bf16.vlgmr.msra.gmra.mrb[28].mxu0 %v3772_v47  ;;  %v3091_v47 = vld [vmem:[#allocation10 + $0x28] sm:$0xff]  }
 0x2f2   : > { %2844 = vmatpush3.bf16.msra.mxu1 %v3091_v47 }
 0x2f3   : > { %2845 = vmatprep.subr.bf16.mxu1 %v3336_v11 }
 0x2f6   : > { %2846 = vmatpush3.bf16.msra.mxu1 %v3092_v21 }
 0x2f7   : > { %2847 = vmatprep.subr.bf16.mxu1 %v3336_v11 }
 0x2fa   : > { %2848 = vmatpush3.bf16.msra.mxu1 %v3093_v22 }
 0x3a4   : > { %v2714_v23 = vpop.f32.mrb[20].mxu0  ;;  %v2742_v24 = vpop.f32.mrb[20].mxu1 }
 0x3a5   : > { %v2715_v25 = vpop.f32.mrb[21].mxu0  ;;  %v2743_v26 = vpop.f32.mrb[21].mxu1 }
 0x3a6   : > { %v2717_v27 = vpop.f32.mrb[22].mxu0  ;;  %v2745_v28 = vpop.f32.mrb[22].mxu1 }
 0x3a7   : > { %v2718_v30 = vpop.f32.mrb[23].mxu0  ;;  %v2746_v32 = vpop.f32.mrb[23].mxu1 }
 0x3a8   : > { %v2719_v33 = vadd.f32 %v2718_v30, %v2717_v27  ;;  %v2747_v34 = vadd.f32 %v2746_v32, %v2745_v28 }
 0x3aa   : > { %v2075_v37 = vadd.f32 %v2747_v34, %v2719_v33 }
 0x3ac   : > { %v2720_v39 = vpop.f32.mrb[24].mxu0  ;;  %v2748_v40 = vpop.f32.mrb[24].mxu1 }
 0x3ad   : > { %v2721_v41 = vpop.f32.mrb[25].mxu0  ;;  %v2749_v42 = vpop.f32.mrb[25].mxu1 }
 0x3ae   : > { %v2723_v44 = vpop.f32.mrb[26].mxu0  ;;  %v2751_v46 = vpop.f32.mrb[26].mxu1 }
 0x3af   : > { %v2724_v36 = vpop.f32.mrb[27].mxu0  ;;  %v2752_v11 = vpop.f32.mrb[27].mxu1 }
 0x3c4   : > { %v2831_v38 = vpop.f32.mrb[28].mxu0 }
 0x3c5   : > { %v2118_v43 = vpop.f32.mrb[29].mxu0 }
 0x3c6   : > { %v2832_v45 = vpop.f32.mrb[30].mxu0 }
 0x3c7   : > { %v2120_v49 = vpop.f32.mrb[31].mxu0 }
 0x3c8   : > { %v2121_v35 = vadd.f32 %v2120_v49, %v2075_v37 }
 0x3ca   : > { %v2136_v51 = vmul.f32 %v2551_v48, %v2121_v35 }
 0x3cc   : > { %v2143_v52 = vadd.f32 %v2552_v50, %v2136_v51 }
 0x3ce   : > { %v2144_v53 = vmax.f32 %v2143_v52, 0.0 }
 0x3d0   : > { %v2145_v54 = vpack.c.bf16 %v2144_v53, %v2144_v53 }
 0x3d2   : > { %2850 = vmatmul.mubr.bf16.vlgmr.msra.gmra.mrb[28].mxu1 %v2145_v54 }
 0x4a5   : > { %v2251_v56 = vpop.f32.mrb[28].mxu1 }
 0x4a6   : > { %v2252_v58 = vadd.f32 %v2553_v55, %v2251_v56  ;;  %v2851_v59 = vpop.f32.mrb[29].mxu1 }
 0x4a7   : > { %v2254_v60 = vpop.f32.mrb[30].mxu1 }
 0x4a8   : > { %v2258_v61 = vadd.f32 %v2257_v57, %v2252_v58  ;;  %v2852_v62 = vpop.f32.mrb[31].mxu1 }
 0x4aa   : > { %2259 = vst [vmem:[%s543_s25] sm:$0xff] %v2258_v61 }
 0x4ab   : > { %3250 = shalt.err (!%p3247_p0)
}
 0x4ac   : > { %s3251_s28 = scalar_lea.hbm %s3843_s17, 128  ;;  %s3255_s22 = scalar_lea.hbm %s3943_s11, 256 }
 0x4ad   : > { %p3252_p4 = scmp.ne.s32.totalorder %s3843_s17, %s3251_s28  ;;  %p3256_p12 = scmp.lt.u32.totalorder %s3843_s17, %s3943_s11 }
 0x4ae   : > { %p3257_p1 = scmp.lt.u32.totalorder %s3255_s22, %s3251_s28  ;;  %p3259_p8 = scmp.lt.u32.totalorder %s3251_s28, %s3843_s17 }
 0x4af   : > { %p3253_p13 = pnand %p3252_p4, %p3594_p5 }
 0x4b0   : > { %p3258_p11 = por %p3257_p1, %p3256_p12 }
 0x4b1   : > { %p3254_p2 = pneg %p3253_p13 }
 0x4b2   : > { %p3260_p6 = por %p3259_p8, %p3258_p11 }
 0x4b4   : > { %p3261_p10 = pnand %p3260_p6, %p3254_p2 }
 0x4b6   : > { %3264 = shalt.err (!%p3261_p10)
}
 0x4b7   : > { %2874 = dma.vmem_to_hbm [thread:$0]  (%p3594_p5), %s3845_s23, 128, %s3843_s17, %s2261_s16  }
 0x4b8 PF: > { %s3944_s25 = sld [smem:[#allocation16_spill]]  ;;  %s3945_s8 = sld [smem:[#allocation18_spill]] }
 0x4b9   : > { %p3947_p7 = scmp.ge.s32.totalorder %s3327_s30, 2 }
 0x4be   : > { %s2287_s15 = sand.u32 1, %s3944_s25   ;;  %p3946_p3 = scmp.ne.s32.totalorder %s3945_s8, 0 }
 0x4bf   : > { %s2288_s19 = scalar_lea.sflag [#allocation4], %s2287_s15 }
 0x4c0   : > { %p2894_p9 = pnand %p3947_p7, %p3946_p3 }
 0x4c2   : > { %3302 = dma.done.wait (!%p2894_p9), %s2288_s19, 128  }
 0x4c3   : > { %3304 = vsyncadd (!%p2894_p9), %s2288_s19, 4294967168  ;;  %s31_s30 = sadd.s32 1, %s3327_s30   ;;  %s3948_s25 = smov %s3311_s26 }
 0x4c4   : > { %p28_p0 = scmp.ge.s32.totalorder %s31_s30, 4   ;;  %s3949_s26 = smov %s3315_s27 }
 0x4c5   : > { %s3950_s27 = smov %s3606_s24  ;;  %s3951_s28 = smov %s3323_s29 }
 0x4c6   : > { %s3952_s29 = smov %s3954_s9  ;;  %30 = sbr.rel (!%p28_p0) target bundleno = 16 (0x10), region = 137 }
 0x4cd   :  { %2293 = vsyncpa [#allocation3], 1 }
 0x4ce   :  { %2295 = vsyncpa [#allocation3 + $0x1], 1 }
 0x4cf   :  { %2296 = vsyncpa [#allocation6], 1 }
 0x4d0   :  { %2297 = vsyncpa [#allocation9], 1 }
 0x4d1   :  { %2298 = vsyncpa [#allocation4], 1 }
 0x4d2   :  { %2300 = vsyncpa [#allocation4 + $0x1], 1 }

</bundles_post_ra>
